<compile_context>
chip_gen: v5e
topology: v5e:2x2
jax: 0.10.0
libtpu: 0.0.40
codegen_flags: <defaults>
</compile_context>

<pallas_src>
import jax
import jax.numpy as jnp
from jax import lax
from jax.experimental import pallas as pl
from jax.experimental.pallas import tpu as pltpu

# ----------------------------- small config ---------------------------------
S = 64            # chess squares / sequence length (fixed by the module)
TC_OUT = 32       # token_compress output width (fixed by the module)
HIDDEN = 64       # hidden_size (small config)
NUM_HEADS = 2
COMPRESS = 128    # compress_size (small config, lane-friendly)
BATCH = 2
LN_EPS = 1e-5     # nn.LayerNorm default


# ----------------------------- Pallas kernel ---------------------------------
def _smolgen_kernel(x_ref, w1_ref, b1_ref, hpw_ref, hpb_ref, alpw_ref, alpb_ref, o_ref):
    # x_ref   : [TB, S*HID]  f32   (x.reshape(B, -1); reshape done in the wrapper)
    # w1_ref  : [S*HID, C]   bf16  (token_compress folded into position_compress linear)
    # b1_ref  : [1, C]       f32
    # hpw_ref : [C, H*C]     bf16  (head projections, LN affine folded in, heads on lanes)
    # hpb_ref : [1, H*C]     f32
    # alpw_ref: [C, S*S]     bf16  (attention_logits_proj, SHARED across heads)
    # alpb_ref: [1, S*S]     f32
    # o_ref   : [TB, H*S*S]  f32   (head-major, lane-dense logits slab)
    C = alpw_ref.shape[0]
    H = hpw_ref.shape[1] // C
    tb = x_ref.shape[0]

    x = x_ref[...].astype(jnp.bfloat16)

    # (token_compress ∘ position_compress linear) + ReLU; bf16 MXU, f32 accumulate
    pre = jnp.dot(x, w1_ref[...], preferred_element_type=jnp.float32) + b1_ref[...]
    pre = jnp.maximum(pre, 0.0)

    # LayerNorm core (f32, biased variance, eps=1e-5); affine folded into hpw/hpb
    mean = jnp.mean(pre, axis=-1, keepdims=True)
    var = jnp.mean((pre - mean) ** 2, axis=-1, keepdims=True)
    z = (pre - mean) * lax.rsqrt(var + LN_EPS)

    # All heads' projections as one lane-dense matmul -> [TB, H*C]
    hv = jnp.dot(z.astype(jnp.bfloat16), hpw_ref[...],
                 preferred_element_type=jnp.float32) + hpb_ref[...]

    # Restack per-head columns along sublanes -> [H*TB, C], then ONE matmul
    # against the shared attention_logits_proj weight.
    hv_stack = jnp.concatenate(
        [hv[:, h * C:(h + 1) * C] for h in range(H)], axis=0).astype(jnp.bfloat16)
    logits = jnp.dot(hv_stack, alpw_ref[...],
                     preferred_element_type=jnp.float32) + alpb_ref[...]

    # Store head h's [TB, S*S] block into its lane-aligned slot of the slab.
    for h in range(H):
        o_ref[:, h * S * S:(h + 1) * S * S] = \
            logits[h * tb:(h + 1) * tb, :].astype(o_ref.dtype)


def smolgen_forward(kp, x, *, tb=128):
    """x: [B, 64, hidden] f32 -> supplemental logits [B, num_heads, 64, 64] f32."""
    B, S_, hid = x.shape
    assert S_ == S
    C = kp["alp_w"].shape[0]
    H = kp["hp_w"].shape[1] // C
    SH = S * hid

    x_flat = x.reshape(B, SH)                      # contiguous, free reshape

    # Batch tiling: TB rows per grid step (multiple of 8 when gridded); when the
    # whole batch is smaller than one tile, the single block equals the full dim.
    if B >= tb:
        TB = tb
        n_tiles = pl.cdiv(B, TB)
        Bp = n_tiles * TB
        if Bp != B:
            x_flat = jnp.pad(x_flat, ((0, Bp - B), (0, 0)))
    else:
        TB = B
        n_tiles = 1
        Bp = B

    const = lambda i: (0, 0)   # weights: fetched once, resident across the grid
    out = pl.pallas_call(
        _smolgen_kernel,
        out_shape=jax.ShapeDtypeStruct((Bp, H * S * S), jnp.float32),
        grid=(n_tiles,),
        in_specs=[
            pl.BlockSpec((TB, SH), lambda i: (i, 0)),        # x tiles over batch
            pl.BlockSpec((SH, C), const),                    # w1
            pl.BlockSpec((1, C), const),                     # b1
            pl.BlockSpec((C, H * C), const),                 # hp_w (stacked heads)
            pl.BlockSpec((1, H * C), const),                 # hp_b
            pl.BlockSpec((C, S * S), const),                 # alp_w (shared)
            pl.BlockSpec((1, S * S), const),                 # alp_b
        ],
        out_specs=pl.BlockSpec((TB, H * S * S), lambda i: (i, 0)),
        compiler_params=pltpu.CompilerParams(
            dimension_semantics=("parallel",)),              # v7x: split batch tiles
    )(x_flat, kp["w1"], kp["b1"], kp["hp_w"], kp["hp_b"], kp["alp_w"], kp["alp_b"])

    return out[:B].reshape(B, H, S, S)


# ----------------------------- parameters ------------------------------------
class KeyGen:
    def __init__(self, key):
        self._key = key

    def __call__(self):
        self._key, sub = jax.random.split(self._key)
        return sub


def _xavier(key, fan_in, fan_out, shape=None):
    std = (2.0 / (fan_in + fan_out)) ** 0.5
    shape = (fan_in, fan_out) if shape is None else shape
    return std * jax.random.normal(key, shape, dtype=jnp.float32)


def init_params(key, hidden=HIDDEN, num_heads=NUM_HEADS, compress=COMPRESS):
    """Module parameters in [in_features, out_features] layout (y = x @ W + b)."""
    kg = KeyGen(key)
    return {
        "tc_w": _xavier(kg(), hidden, TC_OUT),                            # token_compress (no bias)
        "pc_w": _xavier(kg(), S * TC_OUT, compress),                      # position_compress[0]
        "pc_b": jnp.zeros((compress,), jnp.float32),
        "ln_g": jnp.ones((compress,), jnp.float32),                       # position_compress[2]
        "ln_b": jnp.zeros((compress,), jnp.float32),
        "hp_w": _xavier(kg(), compress, compress,
                        shape=(num_heads, compress, compress)),           # head_projections
        "hp_b": jnp.zeros((num_heads, compress), jnp.float32),
        "alp_w": _xavier(kg(), compress, S * S),                          # attention_logits_proj
        "alp_b": jnp.zeros((S * S,), jnp.float32),
    }


def prepare_kernel_params(p):
    """Exact-algebra weight prep (done once, f32) + bf16 casts for MXU operands.

    - w1 = token_compress folded into the position_compress linear.
    - LayerNorm affine (ln_g, ln_b) folded into the head-projection weights.
    - alp_w kept SHARED (not pre-multiplied per head) to halve streamed weights.
    """
    hid = p["tc_w"].shape[0]
    C = p["pc_w"].shape[1]
    H = p["hp_w"].shape[0]

    # W1[s*hid + h, c] = sum_j tc_w[h, j] * pc_w[s*32 + j, c]
    pc_w3 = p["pc_w"].reshape(S, TC_OUT, C)
    w1 = jnp.einsum("hj,sjc->shc", p["tc_w"], pc_w3).reshape(S * hid, C)

    # Fold LN affine:  pv @ hp_w[h] + hp_b[h]
    #   = z @ (diag(ln_g) @ hp_w[h]) + (ln_b @ hp_w[h] + hp_b[h])
    hpw = p["ln_g"][None, :, None] * p["hp_w"]                         # [H, C, C]
    hpb = p["hp_b"] + jnp.einsum("c,hcd->hd", p["ln_b"], p["hp_w"])    # [H, C]
    hpw_stacked = jnp.transpose(hpw, (1, 0, 2)).reshape(C, H * C)      # heads on lanes
    hpb_stacked = hpb.reshape(1, H * C)

    return {
        "w1": w1.astype(jnp.bfloat16),
        "b1": p["pc_b"].reshape(1, C),
        "hp_w": hpw_stacked.astype(jnp.bfloat16),
        "hp_b": hpb_stacked,
        "alp_w": p["alp_w"].astype(jnp.bfloat16),
        "alp_b": p["alp_b"].reshape(1, S * S),
    }


# ----------------------------- pure-JAX reference -----------------------------
def smolgen_ref(p, x):
    """Literal (unfolded, f32) transcription of SmolgenModule.forward."""
    B = x.shape[0]
    ct = jnp.einsum("bsh,hj->bsj", x, p["tc_w"])                  # token_compress
    flat = ct.reshape(B, -1)
    pre = jax.nn.relu(flat @ p["pc_w"] + p["pc_b"])
    mean = pre.mean(-1, keepdims=True)
    var = ((pre - mean) ** 2).mean(-1, keepdims=True)
    pv = p["ln_g"] * (pre - mean) / jnp.sqrt(var + LN_EPS) + p["ln_b"]
    outs = []
    for h in range(p["hp_w"].shape[0]):
        hv = pv @ p["hp_w"][h] + p["hp_b"][h]
        outs.append((hv @ p["alp_w"] + p["alp_b"]).reshape(B, S, S))
    return jnp.stack(outs, axis=1)                                # [B, H, 64, 64]


# ----------------------------- main -------------------------------------------
if __name__ == "__main__":
    root = jax.random.PRNGKey(0)
    pkey, xkey = jax.random.split(root)

    params = init_params(pkey)
    kparams = prepare_kernel_params(params)
    x = jax.random.normal(xkey, (BATCH, S, HIDDEN), dtype=jnp.float32)

    fwd = jax.jit(smolgen_forward)
    out = fwd(kparams, x)
    jax.block_until_ready(out)

    assert out.shape == (BATCH, NUM_HEADS, S, S)
    assert bool(jnp.all(jnp.isfinite(out)))

    # sanity-check against the literal f32 reference (kernel matmuls run in bf16)
    ref = smolgen_ref(params, x)
    err = float(jnp.max(jnp.abs(out - ref)))
    assert err < 1e-1, f"max abs error vs reference too large: {err}"

    print("KERNEL_OK")
</pallas_src>

<mosaic_0001>
module attributes {stable_mosaic.version = 11 : i64} {
  func.func @_smolgen_kernel(%arg0: i32, %arg1: memref<2x4096xf32, #tpu.memory_space<vmem>>, %arg2: memref<4096x128xbf16, #tpu.memory_space<vmem>>, %arg3: memref<1x128xf32, #tpu.memory_space<vmem>>, %arg4: memref<128x256xbf16, #tpu.memory_space<vmem>>, %arg5: memref<1x256xf32, #tpu.memory_space<vmem>>, %arg6: memref<128x4096xbf16, #tpu.memory_space<vmem>>, %arg7: memref<1x4096xf32, #tpu.memory_space<vmem>>, %arg8: memref<2x8192xf32, #tpu.memory_space<vmem>>) attributes {dimension_semantics = [#tpu.dimension_semantics<parallel>], iteration_bounds = array<i64: 1>, scalar_prefetch = 0 : i64, scratch_operands = 0 : i64, tpu.core_type = #tpu.core_type<tc>, window_params = [{transform_indices = @transform_0, window_bounds = array<i64: 2, 4096>}, {pipeline_mode = #tpu.pipeline_mode<synchronous>, transform_indices = @transform_1, window_bounds = array<i64: 4096, 128>}, {pipeline_mode = #tpu.pipeline_mode<synchronous>, transform_indices = @transform_2, window_bounds = array<i64: 1, 128>}, {pipeline_mode = #tpu.pipeline_mode<synchronous>, transform_indices = @transform_3, window_bounds = array<i64: 128, 256>}, {pipeline_mode = #tpu.pipeline_mode<synchronous>, transform_indices = @transform_4, window_bounds = array<i64: 1, 256>}, {pipeline_mode = #tpu.pipeline_mode<synchronous>, transform_indices = @transform_5, window_bounds = array<i64: 128, 4096>}, {pipeline_mode = #tpu.pipeline_mode<synchronous>, transform_indices = @transform_6, window_bounds = array<i64: 1, 4096>}, {transform_indices = @transform_7, window_bounds = array<i64: 2, 8192>}]} {
    %c0 = arith.constant 0 : index
    %c0_0 = arith.constant 0 : index
    %0 = vector.load %arg1[%c0, %c0_0] : memref<2x4096xf32, #tpu.memory_space<vmem>>, vector<2x4096xf32>
    %1 = arith.truncf %0 : vector<2x4096xf32> to vector<2x4096xbf16>
    %c0_1 = arith.constant 0 : index
    %c0_2 = arith.constant 0 : index
    %2 = vector.load %arg2[%c0_1, %c0_2] : memref<4096x128xbf16, #tpu.memory_space<vmem>>, vector<4096x128xbf16>
    %cst = arith.constant dense<0.000000e+00> : vector<2x128xf32>
    %3 = tpu.matmul %1, %2, %cst {dimension_numbers = #tpu.dot_dimension_numbers<[1], [0], [0], [1], [0, 0, 1, 1], [], []>} : vector<2x4096xbf16>, vector<4096x128xbf16>, vector<2x128xf32> -> vector<2x128xf32>
    %c0_3 = arith.constant 0 : index
    %c0_4 = arith.constant 0 : index
    %4 = vector.load %arg3[%c0_3, %c0_4] : memref<1x128xf32, #tpu.memory_space<vmem>>, vector<1x128xf32>
    %5 = vector.broadcast %4 : vector<1x128xf32> to vector<2x128xf32>
    %6 = arith.addf %3, %5 : vector<2x128xf32>
    %cst_5 = arith.constant 0.000000e+00 : f32
    %7 = vector.broadcast %cst_5 : f32 to vector<2x128xf32>
    %8 = arith.maximumf %6, %7 : vector<2x128xf32>
    %cst_6 = arith.constant dense<0.000000e+00> : vector<2xf32>
    %9 = vector.multi_reduction <add>, %8, %cst_6 [1] : vector<2x128xf32> to vector<2xf32>
    %10 = vector.shape_cast %9 : vector<2xf32> to vector<2x1xf32>
    %cst_7 = arith.constant 1.280000e+02 : f32
    %11 = vector.broadcast %cst_7 : f32 to vector<2x1xf32>
    %12 = arith.divf %10, %11 : vector<2x1xf32>
    %13 = vector.broadcast %12 : vector<2x1xf32> to vector<2x128xf32>
    %14 = arith.subf %8, %13 : vector<2x128xf32>
    %15 = arith.mulf %14, %14 : vector<2x128xf32>
    %cst_8 = arith.constant dense<0.000000e+00> : vector<2xf32>
    %16 = vector.multi_reduction <add>, %15, %cst_8 [1] : vector<2x128xf32> to vector<2xf32>
    %17 = vector.shape_cast %16 : vector<2xf32> to vector<2x1xf32>
    %cst_9 = arith.constant 1.280000e+02 : f32
    %18 = vector.broadcast %cst_9 : f32 to vector<2x1xf32>
    %19 = arith.divf %17, %18 : vector<2x1xf32>
    %20 = vector.broadcast %12 : vector<2x1xf32> to vector<2x128xf32>
    %21 = arith.subf %8, %20 : vector<2x128xf32>
    %cst_10 = arith.constant 9.99999974E-6 : f32
    %22 = vector.broadcast %cst_10 : f32 to vector<2x1xf32>
    %23 = arith.addf %19, %22 : vector<2x1xf32>
    %24 = math.rsqrt %23 : vector<2x1xf32>
    %25 = vector.broadcast %24 : vector<2x1xf32> to vector<2x128xf32>
    %26 = arith.mulf %21, %25 : vector<2x128xf32>
    %27 = arith.truncf %26 : vector<2x128xf32> to vector<2x128xbf16>
    %c0_11 = arith.constant 0 : index
    %c0_12 = arith.constant 0 : index
    %28 = vector.load %arg4[%c0_11, %c0_12] : memref<128x256xbf16, #tpu.memory_space<vmem>>, vector<128x256xbf16>
    %cst_13 = arith.constant dense<0.000000e+00> : vector<2x256xf32>
    %29 = tpu.matmul %27, %28, %cst_13 {dimension_numbers = #tpu.dot_dimension_numbers<[1], [0], [0], [1], [0, 0, 1, 1], [], []>} : vector<2x128xbf16>, vector<128x256xbf16>, vector<2x256xf32> -> vector<2x256xf32>
    %c0_14 = arith.constant 0 : index
    %c0_15 = arith.constant 0 : index
    %30 = vector.load %arg5[%c0_14, %c0_15] : memref<1x256xf32, #tpu.memory_space<vmem>>, vector<1x256xf32>
    %31 = vector.broadcast %30 : vector<1x256xf32> to vector<2x256xf32>
    %32 = arith.addf %29, %31 : vector<2x256xf32>
    %33 = vector.extract_strided_slice %32 {offsets = [0, 0], sizes = [2, 128], strides = [1, 1]} : vector<2x256xf32> to vector<2x128xf32>
    %34 = vector.extract_strided_slice %32 {offsets = [0, 128], sizes = [2, 128], strides = [1, 1]} : vector<2x256xf32> to vector<2x128xf32>
    %35 = tpu.concatenate %33, %34 in 0 : vector<2x128xf32>, vector<2x128xf32> -> vector<4x128xf32>
    %36 = arith.truncf %35 : vector<4x128xf32> to vector<4x128xbf16>
    %c0_16 = arith.constant 0 : index
    %c0_17 = arith.constant 0 : index
    %37 = vector.load %arg6[%c0_16, %c0_17] : memref<128x4096xbf16, #tpu.memory_space<vmem>>, vector<128x4096xbf16>
    %cst_18 = arith.constant dense<0.000000e+00> : vector<4x4096xf32>
    %38 = tpu.matmul %36, %37, %cst_18 {dimension_numbers = #tpu.dot_dimension_numbers<[1], [0], [0], [1], [0, 0, 1, 1], [], []>} : vector<4x128xbf16>, vector<128x4096xbf16>, vector<4x4096xf32> -> vector<4x4096xf32>
    %c0_19 = arith.constant 0 : index
    %c0_20 = arith.constant 0 : index
    %39 = vector.load %arg7[%c0_19, %c0_20] : memref<1x4096xf32, #tpu.memory_space<vmem>>, vector<1x4096xf32>
    %40 = vector.broadcast %39 : vector<1x4096xf32> to vector<4x4096xf32>
    %41 = arith.addf %38, %40 : vector<4x4096xf32>
    %42 = vector.extract_strided_slice %41 {offsets = [0, 0], sizes = [2, 4096], strides = [1, 1]} : vector<4x4096xf32> to vector<2x4096xf32>
    %c0_21 = arith.constant 0 : index
    %c0_22 = arith.constant 0 : index
    %43 = vector.load %arg8[%c0_21, %c0_22] : memref<2x8192xf32, #tpu.memory_space<vmem>>, vector<2x4096xf32>
    tpu.vector_store %arg8[%c0_21, %c0_22], %42 {strides = array<i32>} : memref<2x8192xf32, #tpu.memory_space<vmem>>, vector<2x4096xf32>,
    %44 = vector.extract_strided_slice %41 {offsets = [2, 0], sizes = [2, 4096], strides = [1, 1]} : vector<4x4096xf32> to vector<2x4096xf32>
    %c0_23 = arith.constant 0 : index
    %c4096 = arith.constant 4096 : index
    %45 = vector.load %arg8[%c0_23, %c4096] : memref<2x8192xf32, #tpu.memory_space<vmem>>, vector<2x4096xf32>
    tpu.vector_store %arg8[%c0_23, %c4096], %44 {strides = array<i32>} : memref<2x8192xf32, #tpu.memory_space<vmem>>, vector<2x4096xf32>,
    return
  }
  func.func @transform_0(%arg0: i32) -> (i32, i32) {
    %c0_i32 = arith.constant 0 : i32
    %c0_i32_0 = arith.constant 0 : i32
    return %arg0, %c0_i32 : i32, i32
  }
  func.func @transform_1(%arg0: i32) -> (i32, i32) {
    %c0_i32 = arith.constant 0 : i32
    %c0_i32_0 = arith.constant 0 : i32
    %c0_i32_1 = arith.constant 0 : i32
    return %c0_i32, %c0_i32_0 : i32, i32
  }
  func.func @transform_2(%arg0: i32) -> (i32, i32) {
    %c0_i32 = arith.constant 0 : i32
    %c0_i32_0 = arith.constant 0 : i32
    %c0_i32_1 = arith.constant 0 : i32
    return %c0_i32, %c0_i32_0 : i32, i32
  }
  func.func @transform_3(%arg0: i32) -> (i32, i32) {
    %c0_i32 = arith.constant 0 : i32
    %c0_i32_0 = arith.constant 0 : i32
    %c0_i32_1 = arith.constant 0 : i32
    return %c0_i32, %c0_i32_0 : i32, i32
  }
  func.func @transform_4(%arg0: i32) -> (i32, i32) {
    %c0_i32 = arith.constant 0 : i32
    %c0_i32_0 = arith.constant 0 : i32
    %c0_i32_1 = arith.constant 0 : i32
    return %c0_i32, %c0_i32_0 : i32, i32
  }
  func.func @transform_5(%arg0: i32) -> (i32, i32) {
    %c0_i32 = arith.constant 0 : i32
    %c0_i32_0 = arith.constant 0 : i32
    %c0_i32_1 = arith.constant 0 : i32
    return %c0_i32, %c0_i32_0 : i32, i32
  }
  func.func @transform_6(%arg0: i32) -> (i32, i32) {
    %c0_i32 = arith.constant 0 : i32
    %c0_i32_0 = arith.constant 0 : i32
    %c0_i32_1 = arith.constant 0 : i32
    return %c0_i32, %c0_i32_0 : i32, i32
  }
  func.func @transform_7(%arg0: i32) -> (i32, i32) {
    %c0_i32 = arith.constant 0 : i32
    %c0_i32_0 = arith.constant 0 : i32
    return %arg0, %c0_i32 : i32, i32
  }
}

</mosaic_0001>

<bundles_post_ra>
// kernel: smolgen_forward.1
= control target key start
LH: loop header
LB: loop body
LE: loop exit
PB: predicated region body
PF: predicated region fallthrough
CT: control target
= control target key end

     0   :  { %12 = vsyncpa [#allocation3], 0  ;;  %s8056_s0 = inlined_call_operand.vmem [shape: f32[2,4096], index: 0, kind: input, shape index: {}]   ;;  %s8057_s1 = inlined_call_operand.hbm [shape: bf16[4096,128], index: 1, kind: input, shape index: {}]   ;;  %s8058_s2 = inlined_call_operand.vmem [shape: f32[1,128], index: 2, kind: input, shape index: {}]   ;;  %s8059_s3 = inlined_call_operand.vmem [shape: bf16[128,256], index: 3, kind: input, shape index: {}]   ;;  %s8060_s4 = inlined_call_operand.vmem [shape: f32[1,256], index: 4, kind: input, shape index: {}]   ;;  %s8061_s5 = inlined_call_operand.hbm [shape: bf16[128,4096], index: 5, kind: input, shape index: {}]   ;;  %s8062_s6 = inlined_call_operand.vmem [shape: f32[1,4096], index: 6, kind: input, shape index: {}]   ;;  %s8063_s7 = inlined_call_operand.vmem [shape: f32[2,8192], index: 7, kind: output, shape index: {}]  }
   0x1   :  { %s20_s26 = sshll.u32 %s8057_s1, 4  ;;  %s21_s26 = int_to_ptr.hbm [resolvable:$true] %s20_s26 }
   0x2   :  { %13 = vsyncpa [#allocation5], 0  ;;  %s7702_s27 = smov [#allocation2]   ;;  %s39_s8 = sshll.u32 %s8061_s5, 4  ;;  %s40_s8 = int_to_ptr.hbm [resolvable:$true] %s39_s8 }
   0x3   :  { %s22_s28 = sshll.u32 %s7702_s27, 4  ;;  %s7703_s9 = smov 64   ;;  %s23_s28 = int_to_ptr.vmem [resolvable:$true] %s22_s28 }
   0x4   :  { %s7704_s10 = smov 4   ;;  %s7705_s11 = smov [#allocation4]  }
   0x5   :  { %28 = dma.hbm_to_vmem [thread:$0]  %s21_s26, 32768, %s23_s28, [#allocation3], %s7703_s9, %s7703_s9, %s7704_s10  }
   0x6   :  { %s41_s12 = sshll.u32 %s7705_s11, 4  ;;  %s7706_s13 = smov 2048   ;;  %s42_s12 = int_to_ptr.vmem [resolvable:$true] %s41_s12 }
   0x7   :  { %s7707_s14 = smov 128  }
   0x8   :  { %47 = dma.hbm_to_vmem [thread:$0]  %s40_s8, 32768, %s42_s12, [#allocation5], %s7706_s13, %s7706_s13, %s7707_s14  }
   0x9   :  { %7698 = dma.done.wait [#allocation3], 32768  }
   0xa   :  { %7699 = vsyncadd [#allocation3], 4294934528 }
   0xb   :  { %7700 = dma.done.wait [#allocation5], 32768  }
   0xc   :  { %7701 = vsyncadd [#allocation5], 4294934528  ;;  %v7117_v0 = vld [vmem:[#allocation2 + $0x38] sm:$0xff]  ;;  %v7116_v4 = vld [vmem:[#allocation2 + $0x30] sm:$0xff]  ;;  %vm2648_vm0 = vcmask 1041408   ;;  %vm4893_vm5 = vcmask 1045508  }
   0xd   :  { %v7125_v1 = vld [vmem:[#allocation2 + $0x78] sm:$0xff]  ;;  %2231 = vmatpush.bf16.msra.mxu0 %v7117_v0  ;;  %v7124_v5 = vld [vmem:[#allocation2 + $0x70] sm:$0xff]  ;;  %v7115_v8 = vld [vmem:[#allocation2 + $0x28] sm:$0xff]  ;;  %vm4895_vm6 = vcmask 1043456  }
   0xe   :  { %v7133_v2 = vld [vmem:[#allocation2 + $0xb8] sm:$0xff]  ;;  %2244 = vmatpush.bf16.msra.mxu1 %v7125_v1  ;;  %v7132_v6 = vld [vmem:[#allocation2 + $0xb0] sm:$0xff]  ;;  %v7123_v9 = vld [vmem:[#allocation2 + $0x68] sm:$0xff] }
   0xf   :  { %v7141_v3 = vld [vmem:[#allocation2 + $0xf8] sm:$0xff]  ;;  %2257 = vmatpush.bf16.msra.mxu2 %v7133_v2  ;;  %v7140_v7 = vld [vmem:[#allocation2 + $0xf0] sm:$0xff]  ;;  %v7131_v10 = vld [vmem:[#allocation2 + $0xa8] sm:$0xff] }
  0x10   :  { %2270 = vmatpush.bf16.msra.mxu3 %v7141_v3  ;;  %v7139_v11 = vld [vmem:[#allocation2 + $0xe8] sm:$0xff]  ;;  %v7114_v12 = vld [vmem:[#allocation2 + $0x20] sm:$0xff]  ;;  %v7113_v16 = vld [vmem:[#allocation2 + $0x18] sm:$0xff] }
  0x11   :  { %2232 = vmatpush.bf16.msra.mxu0 %v7116_v4  ;;  %v7122_v13 = vld [vmem:[#allocation2 + $0x60] sm:$0xff]  ;;  %v7121_v17 = vld [vmem:[#allocation2 + $0x58] sm:$0xff]  ;;  %v7112_v21 = vld [vmem:[#allocation2 + $0x10] sm:$0xff] }
  0x12   :  { %2245 = vmatpush.bf16.msra.mxu1 %v7124_v5  ;;  %v7130_v14 = vld [vmem:[#allocation2 + $0xa0] sm:$0xff]  ;;  %v7129_v18 = vld [vmem:[#allocation2 + $0x98] sm:$0xff]  ;;  %v7120_v22 = vld [vmem:[#allocation2 + $0x50] sm:$0xff] }
  0x13   :  { %2258 = vmatpush.bf16.msra.mxu2 %v7132_v6  ;;  %v7138_v15 = vld [vmem:[#allocation2 + $0xe0] sm:$0xff]  ;;  %v7137_v19 = vld [vmem:[#allocation2 + $0xd8] sm:$0xff]  ;;  %v7128_v23 = vld [vmem:[#allocation2 + $0x90] sm:$0xff] }
  0x14   :  { %2271 = vmatpush.bf16.msra.mxu3 %v7140_v7  ;;  %v58_v20 = vld [vmem:[%s8056_s0] sm:$0xff]  ;;  %v7136_v24 = vld [vmem:[#allocation2 + $0xd0] sm:$0xff]  ;;  %v7111_v25 = vld [vmem:[#allocation2 + $0x8] sm:$0xff] }
  0x15   :  { %2233 = vmatpush.bf16.msra.mxu0 %v7115_v8  ;;  %74 = vst [vmem:[#allocation1] ss:$4 sm:$0xff] %v58_v20  ;;  %v7119_v26 = vld [vmem:[#allocation2 + $0x48] sm:$0xff]  ;;  %v7110_v29 = vld [vmem:[#allocation2] sm:$0xff]  ;;  %v7149_v38 = vld [vmem:[#allocation2 + $0x138] sm:$0xff] }
  0x16   :  { %2246 = vmatpush.bf16.msra.mxu1 %v7123_v9  ;;  %v7127_v27 = vld [vmem:[#allocation2 + $0x88] sm:$0xff]  ;;  %v7118_v30 = vld [vmem:[#allocation2 + $0x40] sm:$0xff]  ;;  %v7157_v39 = vld [vmem:[#allocation2 + $0x178] sm:$0xff] }
  0x17   :  { %2259 = vmatpush.bf16.msra.mxu2 %v7131_v10  ;;  %v7135_v28 = vld [vmem:[#allocation2 + $0xc8] sm:$0xff]  ;;  %v7126_v31 = vld [vmem:[#allocation2 + $0x80] sm:$0xff]  ;;  %v7165_v40 = vld [vmem:[#allocation2 + $0x1b8] sm:$0xff] }
  0x18   :  { %2272 = vmatpush.bf16.msra.mxu3 %v7139_v11  ;;  %v7134_v33 = vld [vmem:[#allocation2 + $0xc0] sm:$0xff]  ;;  %v60_v35 = vld [vmem:[%s8056_s0 + $0x10] sm:$0xff]  ;;  %v7173_v41 = vld [vmem:[#allocation2 + $0x1f8] sm:$0xff] }
  0x19   :  { %2234 = vmatpush.bf16.msra.mxu0 %v7114_v12  ;;  %v59_v42 = vld [vmem:[%s8056_s0 + $0x8] sm:$0xff]  ;;  %v7148_v47 = vld [vmem:[#allocation2 + $0x130] sm:$0xff]  ;;  %v7147_v51 = vld [vmem:[#allocation2 + $0x128] sm:$0xff] }
  0x1a   :  { %2247 = vmatpush.bf16.msra.mxu1 %v7122_v13  ;;  %76 = vst [vmem:[#allocation1 + $0x20] ss:$4 sm:$0xff] %v59_v42  ;;  %v7156_v48 = vld [vmem:[#allocation2 + $0x170] sm:$0xff]  ;;  %v7155_v52 = vld [vmem:[#allocation2 + $0x168] sm:$0xff]  ;;  %v7146_v55 = vld [vmem:[#allocation2 + $0x120] sm:$0xff] }
  0x1b   :  { %2260 = vmatpush.bf16.msra.mxu2 %v7130_v14  ;;  %v7164_v49 = vld [vmem:[#allocation2 + $0x1b0] sm:$0xff]  ;;  %v7163_v53 = vld [vmem:[#allocation2 + $0x1a8] sm:$0xff]  ;;  %v7154_v57 = vld [vmem:[#allocation2 + $0x160] sm:$0xff] }
  0x1c   :  { %2273 = vmatpush.bf16.msra.mxu3 %v7138_v15  ;;  %v79_v32 = vld.sshfl [vmem:[#allocation1 + $0x10] sm:$0xff pattern:$0x73625140]  ;;  %v77_v34 = vld.sshfl [vmem:[#allocation1] sm:$0xff pattern:$0x73625140] }
  0x1d   :  { %2235 = vmatpush.bf16.msra.mxu0 %v7113_v16  ;;  %v80_v36 = vld.sshfl [vmem:[#allocation1 + $0x18] sm:$0xff pattern:$0x73625140]  ;;  %v78_v37 = vld.sshfl [vmem:[#allocation1 + $0x8] sm:$0xff pattern:$0x73625140]  ;;  %v149_v43 = vpack.c.bf16 %v79_v32, %v79_v32  ;;  %v147_v44 = vpack.c.bf16 %v77_v34, %v77_v34 }
  0x1e   :  { %2248 = vmatpush.bf16.msra.mxu1 %v7121_v17  ;;  %85 = vst [vmem:[#allocation1] ss:$4 sm:$0xff] %v60_v35  ;;  %v150_v45 = vpack.c.bf16 %v80_v36, %v80_v36  ;;  %v148_v46 = vpack.c.bf16 %v78_v37, %v78_v37  ;;  %v7172_v50 = vld [vmem:[#allocation2 + $0x1f0] sm:$0xff]  ;;  %v7171_v54 = vld [vmem:[#allocation2 + $0x1e8] sm:$0xff]  ;;  %v7162_v62 = vld [vmem:[#allocation2 + $0x1a0] sm:$0xff] }
  0x1f   :  { %2261 = vmatpush.bf16.msra.mxu2 %v7129_v18  ;;  %v61_v59 = vld [vmem:[%s8056_s0 + $0x18] sm:$0xff]  ;;  %v7170_v63 = vld [vmem:[#allocation2 + $0x1e0] sm:$0xff]  ;;  %v7145_v0 = vld [vmem:[#allocation2 + $0x118] sm:$0xff] }
  0x20   :  { %2274 = vmatpush.bf16.msra.mxu3 %v7137_v19  ;;  %v7153_v1 = vld [vmem:[#allocation2 + $0x158] sm:$0xff]  ;;  %v7144_v4 = vld [vmem:[#allocation2 + $0x110] sm:$0xff]  ;;  %v7143_v8 = vld [vmem:[#allocation2 + $0x108] sm:$0xff] }
  0x21   :  { %2236 = vmatpush.bf16.msra.mxu0 %v7112_v21  ;;  %v7764_v56 = vld.sshfl [vmem:[#allocation1 + $0x30] sm:$0xff pattern:$0x73625140]  ;;  %v7766_v58 = vld.sshfl [vmem:[#allocation1 + $0x20] sm:$0xff pattern:$0x73625140] }
  0x22   :  { %2249 = vmatpush.bf16.msra.mxu1 %v7120_v22  ;;  %v84_v60 = vld.sshfl [vmem:[#allocation1 + $0x38] sm:$0xff pattern:$0x73625140]  ;;  %v82_v61 = vld.sshfl [vmem:[#allocation1 + $0x28] sm:$0xff pattern:$0x73625140]  ;;  %v153_v20 = vpack.c.bf16 %v7764_v56, %v7764_v56  ;;  %v151_v21 = vpack.c.bf16 %v7766_v58, %v7766_v58 }
  0x23   :  { %2262 = vmatpush.bf16.msra.mxu2 %v7128_v23  ;;  %86 = vst [vmem:[#allocation1 + $0x20] ss:$4 sm:$0xff] %v61_v59  ;;  %v7161_v2 = vld [vmem:[#allocation2 + $0x198] sm:$0xff]  ;;  %v7152_v5 = vld [vmem:[#allocation2 + $0x150] sm:$0xff]  ;;  %v7151_v9 = vld [vmem:[#allocation2 + $0x148] sm:$0xff]  ;;  %v154_v22 = vpack.c.bf16 %v84_v60, %v84_v60  ;;  %v152_v23 = vpack.c.bf16 %v82_v61, %v82_v61 }
  0x24   :  { %2275 = vmatpush.bf16.msra.mxu3 %v7136_v24  ;;  %v7169_v3 = vld [vmem:[#allocation2 + $0x1d8] sm:$0xff]  ;;  %v7160_v6 = vld [vmem:[#allocation2 + $0x190] sm:$0xff]  ;;  %v7159_v10 = vld [vmem:[#allocation2 + $0x188] sm:$0xff] }
  0x25   :  { %2237 = vmatpush.bf16.msra.mxu0 %v7111_v25  ;;  %v7168_v7 = vld [vmem:[#allocation2 + $0x1d0] sm:$0xff]  ;;  %v7167_v11 = vld [vmem:[#allocation2 + $0x1c8] sm:$0xff]  ;;  %v7142_v12 = vld [vmem:[#allocation2 + $0x100] sm:$0xff] }
  0x26   :  { %2250 = vmatpush.bf16.msra.mxu1 %v7119_v26  ;;  %v7150_v13 = vld [vmem:[#allocation2 + $0x140] sm:$0xff]  ;;  %v7181_v16 = vld [vmem:[#allocation2 + $0x238] sm:$0xff]  ;;  %v7180_v24 = vld [vmem:[#allocation2 + $0x230] sm:$0xff] }
  0x27   :  { %2263 = vmatpush.bf16.msra.mxu2 %v7127_v27  ;;  %v7158_v14 = vld [vmem:[#allocation2 + $0x180] sm:$0xff]  ;;  %v7189_v17 = vld [vmem:[#allocation2 + $0x278] sm:$0xff]  ;;  %v7188_v25 = vld [vmem:[#allocation2 + $0x270] sm:$0xff] }
  0x28   :  { %2276 = vmatpush.bf16.msra.mxu3 %v7135_v28  ;;  %v7166_v15 = vld [vmem:[#allocation2 + $0x1c0] sm:$0xff]  ;;  %v7197_v18 = vld [vmem:[#allocation2 + $0x2b8] sm:$0xff]  ;;  %v7196_v26 = vld [vmem:[#allocation2 + $0x2b0] sm:$0xff] }
  0x29   :  { %2238 = vmatpush.bf16.msra.mxu0 %v7110_v29  ;;  %v7205_v19 = vld [vmem:[#allocation2 + $0x2f8] sm:$0xff]  ;;  %v7204_v27 = vld [vmem:[#allocation2 + $0x2f0] sm:$0xff]  ;;  %v7179_v28 = vld [vmem:[#allocation2 + $0x228] sm:$0xff] }
  0x2a   :  { %2251 = vmatpush.bf16.msra.mxu1 %v7118_v30  ;;  %v7187_v29 = vld [vmem:[#allocation2 + $0x268] sm:$0xff]  ;;  %v7178_v32 = vld [vmem:[#allocation2 + $0x220] sm:$0xff]  ;;  %v7177_v36 = vld [vmem:[#allocation2 + $0x218] sm:$0xff] }
  0x2b   :  { %2264 = vmatpush.bf16.msra.mxu2 %v7126_v31  ;;  %v7195_v30 = vld [vmem:[#allocation2 + $0x2a8] sm:$0xff]  ;;  %v7194_v34 = vld [vmem:[#allocation2 + $0x2a0] sm:$0xff]  ;;  %v7185_v37 = vld [vmem:[#allocation2 + $0x258] sm:$0xff] }
  0x2c   :  { %2277 = vmatpush.bf16.msra.mxu3 %v7134_v33  ;;  %2239 = vmatmul.bf16.vlgmr.msra.gmra.mxu0 %v147_v44  ;;  %v7203_v31 = vld [vmem:[#allocation2 + $0x2e8] sm:$0xff]  ;;  %v7186_v33 = vld [vmem:[#allocation2 + $0x260] sm:$0xff]  ;;  %v7192_v42 = vld [vmem:[#allocation2 + $0x290] sm:$0xff] }
  0x2d   :  { %2283 = vmatpush.bf16.msrb.mxu0 %v7149_v38  ;;  %2252 = vmatmul.bf16.vlgmr.msra.gmra.mxu1 %v148_v46  ;;  %v7202_v35 = vld [vmem:[#allocation2 + $0x2e0] sm:$0xff]  ;;  %v7193_v38 = vld [vmem:[#allocation2 + $0x298] sm:$0xff]  ;;  %v7175_v44 = vld [vmem:[#allocation2 + $0x208] sm:$0xff] }
  0x2e   :  { %2296 = vmatpush.bf16.msrb.mxu1 %v7157_v39  ;;  %2265 = vmatmul.bf16.vlgmr.msra.gmra.mxu2 %v149_v43  ;;  %v7201_v39 = vld [vmem:[#allocation2 + $0x2d8] sm:$0xff]  ;;  %v7200_v43 = vld [vmem:[#allocation2 + $0x2d0] sm:$0xff]  ;;  %v7191_v46 = vld [vmem:[#allocation2 + $0x288] sm:$0xff] }
  0x2f   :  { %2309 = vmatpush.bf16.msrb.mxu2 %v7165_v40  ;;  %2278 = vmatmul.bf16.vlgmr.msra.gmra.mxu3 %v150_v45  ;;  %v7176_v40 = vld [vmem:[#allocation2 + $0x210] sm:$0xff]  ;;  %v7183_v45 = vld [vmem:[#allocation2 + $0x248] sm:$0xff]  ;;  %v88_v56 = vld.sshfl [vmem:[#allocation1 + $0x8] sm:$0xff pattern:$0x73625140] }
  0x30   :  { %2322 = vmatpush.bf16.msrb.mxu3 %v7173_v41  ;;  %v7184_v41 = vld [vmem:[#allocation2 + $0x250] sm:$0xff]  ;;  %v7229_v58 = vld [vmem:[#allocation2 + $0x3b8] sm:$0xff] }
  0x31   :  { %2284 = vmatpush.bf16.msrb.mxu0 %v7148_v47  ;;  %v7199_v47 = vld [vmem:[#allocation2 + $0x2c8] sm:$0xff]  ;;  %v7237_v59 = vld [vmem:[#allocation2 + $0x3f8] sm:$0xff] }
  0x32   :  { %2297 = vmatpush.bf16.msrb.mxu1 %v7156_v48  ;;  %v7174_v48 = vld [vmem:[#allocation2 + $0x200] sm:$0xff] }
  0x33   :  { %2310 = vmatpush.bf16.msrb.mxu2 %v7164_v49  ;;  %v7182_v49 = vld [vmem:[#allocation2 + $0x240] sm:$0xff] }
  0x34   :  { %2323 = vmatpush.bf16.msrb.mxu3 %v7172_v50  ;;  %v7190_v50 = vld [vmem:[#allocation2 + $0x280] sm:$0xff] }
  0x35   :  { %2285 = vmatpush.bf16.msrb.mxu0 %v7147_v51  ;;  %v7198_v51 = vld [vmem:[#allocation2 + $0x2c0] sm:$0xff] }
  0x36   :  { %2298 = vmatpush.bf16.msrb.mxu1 %v7155_v52  ;;  %v7213_v52 = vld [vmem:[#allocation2 + $0x338] sm:$0xff] }
  0x37   :  { %2311 = vmatpush.bf16.msrb.mxu2 %v7163_v53  ;;  %v7221_v53 = vld [vmem:[#allocation2 + $0x378] sm:$0xff] }
  0x38   :  { %2324 = vmatpush.bf16.msrb.mxu3 %v7171_v54  ;;  %v87_v54 = vld.sshfl [vmem:[#allocation1] sm:$0xff pattern:$0x73625140] }
  0x39   :  { %2286 = vmatpush.bf16.msrb.mxu0 %v7146_v55  ;;  %v89_v55 = vld.sshfl [vmem:[#allocation1 + $0x10] sm:$0xff pattern:$0x73625140]  ;;  %v155_v60 = vpack.c.bf16 %v87_v54, %v87_v54  ;;  %v7249_v54 = vld [vmem:[#allocation2 + $0x458] sm:$0xff] }
  0x3a   :  { %2299 = vmatpush.bf16.msrb.mxu1 %v7154_v57  ;;  %v90_v57 = vld.sshfl [vmem:[#allocation1 + $0x18] sm:$0xff pattern:$0x73625140]  ;;  %v157_v61 = vpack.c.bf16 %v89_v55, %v89_v55  ;;  %v7257_v55 = vld [vmem:[#allocation2 + $0x498] sm:$0xff] }
  0x3b   :  { %2312 = vmatpush.bf16.msrb.mxu2 %v7162_v62  ;;  %v156_v62 = vpack.c.bf16 %v88_v56, %v88_v56  ;;  %v7265_v56 = vld [vmem:[#allocation2 + $0x4d8] sm:$0xff] }
  0x3c   :  { %2325 = vmatpush.bf16.msrb.mxu3 %v7170_v63  ;;  %v158_v63 = vpack.c.bf16 %v90_v57, %v90_v57  ;;  %v7240_v57 = vld [vmem:[#allocation2 + $0x410] sm:$0xff] }
  0x3d   :  { %2287 = vmatpush.bf16.msrb.mxu0 %v7145_v0  ;;  %v7212_v0 = vld [vmem:[#allocation2 + $0x330] sm:$0xff] }
  0x3e   :  { %2300 = vmatpush.bf16.msrb.mxu1 %v7153_v1  ;;  %v7220_v1 = vld [vmem:[#allocation2 + $0x370] sm:$0xff] }
  0x3f   :  { %2313 = vmatpush.bf16.msrb.mxu2 %v7161_v2  ;;  %v7228_v2 = vld [vmem:[#allocation2 + $0x3b0] sm:$0xff] }
  0x40   :  { %2326 = vmatpush.bf16.msrb.mxu3 %v7169_v3  ;;  %v7236_v3 = vld [vmem:[#allocation2 + $0x3f0] sm:$0xff] }
  0x41   :  { %2288 = vmatpush.bf16.msrb.mxu0 %v7144_v4  ;;  %v7211_v4 = vld [vmem:[#allocation2 + $0x328] sm:$0xff] }
  0x42   :  { %2301 = vmatpush.bf16.msrb.mxu1 %v7152_v5  ;;  %v7219_v5 = vld [vmem:[#allocation2 + $0x368] sm:$0xff] }
  0x43   :  { %2314 = vmatpush.bf16.msrb.mxu2 %v7160_v6  ;;  %v7227_v6 = vld [vmem:[#allocation2 + $0x3a8] sm:$0xff] }
  0x44   :  { %2327 = vmatpush.bf16.msrb.mxu3 %v7168_v7  ;;  %v7235_v7 = vld [vmem:[#allocation2 + $0x3e8] sm:$0xff] }
  0x45   :  { %2289 = vmatpush.bf16.msrb.mxu0 %v7143_v8  ;;  %v7210_v8 = vld [vmem:[#allocation2 + $0x320] sm:$0xff] }
  0x46   :  { %2302 = vmatpush.bf16.msrb.mxu1 %v7151_v9  ;;  %v7218_v9 = vld [vmem:[#allocation2 + $0x360] sm:$0xff] }
  0x47   :  { %2315 = vmatpush.bf16.msrb.mxu2 %v7159_v10  ;;  %v7226_v10 = vld [vmem:[#allocation2 + $0x3a0] sm:$0xff] }
  0x48   :  { %2328 = vmatpush.bf16.msrb.mxu3 %v7167_v11  ;;  %v7234_v11 = vld [vmem:[#allocation2 + $0x3e0] sm:$0xff] }
  0x49   :  { %2290 = vmatpush.bf16.msrb.mxu0 %v7142_v12  ;;  %v7209_v12 = vld [vmem:[#allocation2 + $0x318] sm:$0xff] }
  0x4a   :  { %2303 = vmatpush.bf16.msrb.mxu1 %v7150_v13  ;;  %v7217_v13 = vld [vmem:[#allocation2 + $0x358] sm:$0xff] }
  0x4b   :  { %2316 = vmatpush.bf16.msrb.mxu2 %v7158_v14  ;;  %v7225_v14 = vld [vmem:[#allocation2 + $0x398] sm:$0xff] }
  0x4c   :  { %2329 = vmatpush.bf16.msrb.mxu3 %v7166_v15  ;;  %2291 = vmatmul.bf16.vlgmr.msrb.gmra.mxu0 %v151_v21  ;;  %v7233_v15 = vld [vmem:[#allocation2 + $0x3d8] sm:$0xff]  ;;  %v7215_v21 = vld [vmem:[#allocation2 + $0x348] sm:$0xff] }
  0x4d   :  { %2335 = vmatpush.bf16.msra.mxu0 %v7181_v16  ;;  %2304 = vmatmul.bf16.vlgmr.msrb.gmra.mxu1 %v152_v23  ;;  %v7208_v16 = vld [vmem:[#allocation2 + $0x310] sm:$0xff]  ;;  %v7223_v23 = vld [vmem:[#allocation2 + $0x388] sm:$0xff] }
  0x4e   :  { %2348 = vmatpush.bf16.msra.mxu1 %v7189_v17  ;;  %2317 = vmatmul.bf16.vlgmr.msrb.gmra.mxu2 %v153_v20  ;;  %v7216_v17 = vld [vmem:[#allocation2 + $0x350] sm:$0xff]  ;;  %v7207_v20 = vld [vmem:[#allocation2 + $0x308] sm:$0xff] }
  0x4f   :  { %2361 = vmatpush.bf16.msra.mxu2 %v7197_v18  ;;  %2330 = vmatmul.bf16.vlgmr.msrb.gmra.mxu3 %v154_v22  ;;  %v7224_v18 = vld [vmem:[#allocation2 + $0x390] sm:$0xff]  ;;  %v62_v22 = vld [vmem:[%s8056_s0 + $0x20] sm:$0xff] }
  0x50   :  { %2374 = vmatpush.bf16.msra.mxu3 %v7205_v19  ;;  %v7232_v19 = vld [vmem:[#allocation2 + $0x3d0] sm:$0xff]  ;;  %95 = vst [vmem:[#allocation1] ss:$4 sm:$0xff] %v62_v22  ;;  %v7275_v22 = vld [vmem:[#allocation2 + $0x528] sm:$0xff] }
  0x51   :  { %2336 = vmatpush.bf16.msra.mxu0 %v7180_v24  ;;  %v7231_v24 = vld [vmem:[#allocation2 + $0x3c8] sm:$0xff] }
  0x52   :  { %2349 = vmatpush.bf16.msra.mxu1 %v7188_v25  ;;  %v7206_v25 = vld [vmem:[#allocation2 + $0x300] sm:$0xff] }
  0x53   :  { %2362 = vmatpush.bf16.msra.mxu2 %v7196_v26  ;;  %v7214_v26 = vld [vmem:[#allocation2 + $0x340] sm:$0xff] }
  0x54   :  { %2375 = vmatpush.bf16.msra.mxu3 %v7204_v27  ;;  %v7222_v27 = vld [vmem:[#allocation2 + $0x380] sm:$0xff] }
  0x55   :  { %2337 = vmatpush.bf16.msra.mxu0 %v7179_v28  ;;  %v7230_v28 = vld [vmem:[#allocation2 + $0x3c0] sm:$0xff] }
  0x56   :  { %2350 = vmatpush.bf16.msra.mxu1 %v7187_v29  ;;  %v7245_v29 = vld [vmem:[#allocation2 + $0x438] sm:$0xff] }
  0x57   :  { %2363 = vmatpush.bf16.msra.mxu2 %v7195_v30  ;;  %v7253_v30 = vld [vmem:[#allocation2 + $0x478] sm:$0xff] }
  0x58   :  { %2376 = vmatpush.bf16.msra.mxu3 %v7203_v31  ;;  %v91_v31 = vld.sshfl [vmem:[#allocation1 + $0x20] sm:$0xff pattern:$0x73625140] }
  0x59   :  { %2338 = vmatpush.bf16.msra.mxu0 %v7178_v32  ;;  %v93_v32 = vld.sshfl [vmem:[#allocation1 + $0x30] sm:$0xff pattern:$0x73625140] }
  0x5a   :  { %2351 = vmatpush.bf16.msra.mxu1 %v7186_v33  ;;  %v92_v33 = vld.sshfl [vmem:[#allocation1 + $0x28] sm:$0xff pattern:$0x73625140] }
  0x5b   :  { %2364 = vmatpush.bf16.msra.mxu2 %v7194_v34  ;;  %v94_v34 = vld.sshfl [vmem:[#allocation1 + $0x38] sm:$0xff pattern:$0x73625140] }
  0x5c   :  { %2377 = vmatpush.bf16.msra.mxu3 %v7202_v35  ;;  %v7261_v35 = vld [vmem:[#allocation2 + $0x4b8] sm:$0xff] }
  0x5d   :  { %2339 = vmatpush.bf16.msra.mxu0 %v7177_v36  ;;  %v7269_v36 = vld [vmem:[#allocation2 + $0x4f8] sm:$0xff] }
  0x5e   :  { %2352 = vmatpush.bf16.msra.mxu1 %v7185_v37  ;;  %v159_v37 = vpack.c.bf16 %v91_v31, %v91_v31 }
  0x5f   :  { %2365 = vmatpush.bf16.msra.mxu2 %v7193_v38  ;;  %v161_v38 = vpack.c.bf16 %v93_v32, %v93_v32  ;;  %v7290_v32 = vld [vmem:[#allocation2 + $0x5a0] sm:$0xff] }
  0x60   :  { %2378 = vmatpush.bf16.msra.mxu3 %v7201_v39  ;;  %v160_v39 = vpack.c.bf16 %v92_v33, %v92_v33  ;;  %v7298_v33 = vld [vmem:[#allocation2 + $0x5e0] sm:$0xff] }
  0x61   :  { %2340 = vmatpush.bf16.msra.mxu0 %v7176_v40  ;;  %v162_v40 = vpack.c.bf16 %v94_v34, %v94_v34 }
  0x62   :  { %2353 = vmatpush.bf16.msra.mxu1 %v7184_v41  ;;  %v7244_v41 = vld [vmem:[#allocation2 + $0x430] sm:$0xff] }
  0x63   :  { %2366 = vmatpush.bf16.msra.mxu2 %v7192_v42  ;;  %v7252_v42 = vld [vmem:[#allocation2 + $0x470] sm:$0xff] }
  0x64   :  { %2379 = vmatpush.bf16.msra.mxu3 %v7200_v43  ;;  %v7260_v43 = vld [vmem:[#allocation2 + $0x4b0] sm:$0xff] }
  0x65   :  { %2341 = vmatpush.bf16.msra.mxu0 %v7175_v44  ;;  %v7268_v44 = vld [vmem:[#allocation2 + $0x4f0] sm:$0xff] }
  0x66   :  { %2354 = vmatpush.bf16.msra.mxu1 %v7183_v45  ;;  %v7243_v45 = vld [vmem:[#allocation2 + $0x428] sm:$0xff] }
  0x67   :  { %2367 = vmatpush.bf16.msra.mxu2 %v7191_v46  ;;  %v7251_v46 = vld [vmem:[#allocation2 + $0x468] sm:$0xff] }
  0x68   :  { %2380 = vmatpush.bf16.msra.mxu3 %v7199_v47  ;;  %v7259_v47 = vld [vmem:[#allocation2 + $0x4a8] sm:$0xff] }
  0x69   :  { %2342 = vmatpush.bf16.msra.mxu0 %v7174_v48  ;;  %v7267_v48 = vld [vmem:[#allocation2 + $0x4e8] sm:$0xff] }
  0x6a   :  { %2355 = vmatpush.bf16.msra.mxu1 %v7182_v49  ;;  %v7242_v49 = vld [vmem:[#allocation2 + $0x420] sm:$0xff] }
  0x6b   :  { %2368 = vmatpush.bf16.msra.mxu2 %v7190_v50  ;;  %v7250_v50 = vld [vmem:[#allocation2 + $0x460] sm:$0xff] }
  0x6c   :  { %2381 = vmatpush.bf16.msra.mxu3 %v7198_v51  ;;  %2343 = vmatmul.bf16.vlgmr.msra.gmra.mxu0 %v155_v60  ;;  %v7258_v51 = vld [vmem:[#allocation2 + $0x4a0] sm:$0xff]  ;;  %v7264_v60 = vld [vmem:[#allocation2 + $0x4d0] sm:$0xff] }
  0x6d   :  { %2387 = vmatpush.bf16.msrb.mxu0 %v7213_v52  ;;  %2356 = vmatmul.bf16.vlgmr.msra.gmra.mxu1 %v156_v62  ;;  %v7266_v52 = vld [vmem:[#allocation2 + $0x4e0] sm:$0xff]  ;;  %v7247_v62 = vld [vmem:[#allocation2 + $0x448] sm:$0xff] }
  0x6e   :  { %2400 = vmatpush.bf16.msrb.mxu1 %v7221_v53  ;;  %2369 = vmatmul.bf16.vlgmr.msra.gmra.mxu2 %v157_v61  ;;  %v7241_v53 = vld [vmem:[#allocation2 + $0x418] sm:$0xff]  ;;  %v7239_v61 = vld [vmem:[#allocation2 + $0x408] sm:$0xff] }
  0x6f   :  { %2413 = vmatpush.bf16.msrb.mxu2 %v7229_v58  ;;  %2382 = vmatmul.bf16.vlgmr.msra.gmra.mxu3 %v158_v63  ;;  %v7248_v58 = vld [vmem:[#allocation2 + $0x450] sm:$0xff]  ;;  %v63_v63 = vld [vmem:[%s8056_s0 + $0x28] sm:$0xff] }
  0x70   :  { %2426 = vmatpush.bf16.msrb.mxu3 %v7237_v59  ;;  %v7256_v59 = vld [vmem:[#allocation2 + $0x490] sm:$0xff]  ;;  %96 = vst [vmem:[#allocation1 + $0x20] ss:$4 sm:$0xff] %v63_v63 }
  0x71   :  { %2388 = vmatpush.bf16.msrb.mxu0 %v7212_v0  ;;  %v7255_v0 = vld [vmem:[#allocation2 + $0x488] sm:$0xff] }
  0x72   :  { %2401 = vmatpush.bf16.msrb.mxu1 %v7220_v1  ;;  %v7263_v1 = vld [vmem:[#allocation2 + $0x4c8] sm:$0xff] }
  0x73   :  { %2414 = vmatpush.bf16.msrb.mxu2 %v7228_v2  ;;  %v7238_v2 = vld [vmem:[#allocation2 + $0x400] sm:$0xff] }
  0x74   :  { %2427 = vmatpush.bf16.msrb.mxu3 %v7236_v3  ;;  %v7246_v3 = vld [vmem:[#allocation2 + $0x440] sm:$0xff] }
  0x75   :  { %2389 = vmatpush.bf16.msrb.mxu0 %v7211_v4  ;;  %v7254_v4 = vld [vmem:[#allocation2 + $0x480] sm:$0xff] }
  0x76   :  { %2402 = vmatpush.bf16.msrb.mxu1 %v7219_v5  ;;  %v7262_v5 = vld [vmem:[#allocation2 + $0x4c0] sm:$0xff] }
  0x77   :  { %2415 = vmatpush.bf16.msrb.mxu2 %v7227_v6  ;;  %v7277_v6 = vld [vmem:[#allocation2 + $0x538] sm:$0xff]  ;;  %v103_v63 = vld.sshfl [vmem:[#allocation1 + $0x30] sm:$0xff pattern:$0x73625140] }
  0x78   :  { %2428 = vmatpush.bf16.msrb.mxu3 %v7235_v7  ;;  %v7285_v7 = vld [vmem:[#allocation2 + $0x578] sm:$0xff] }
  0x79   :  { %2390 = vmatpush.bf16.msrb.mxu0 %v7210_v8  ;;  %v97_v8 = vld.sshfl [vmem:[#allocation1] sm:$0xff pattern:$0x73625140] }
  0x7a   :  { %2403 = vmatpush.bf16.msrb.mxu1 %v7218_v9  ;;  %v99_v9 = vld.sshfl [vmem:[#allocation1 + $0x10] sm:$0xff pattern:$0x73625140] }
  0x7b   :  { %2416 = vmatpush.bf16.msrb.mxu2 %v7226_v10  ;;  %v98_v10 = vld.sshfl [vmem:[#allocation1 + $0x8] sm:$0xff pattern:$0x73625140] }
  0x7c   :  { %2429 = vmatpush.bf16.msrb.mxu3 %v7234_v11  ;;  %v100_v11 = vld.sshfl [vmem:[#allocation1 + $0x18] sm:$0xff pattern:$0x73625140] }
  0x7d   :  { %2391 = vmatpush.bf16.msrb.mxu0 %v7209_v12  ;;  %v7293_v12 = vld [vmem:[#allocation2 + $0x5b8] sm:$0xff] }
  0x7e   :  { %2404 = vmatpush.bf16.msrb.mxu1 %v7217_v13  ;;  %v7301_v13 = vld [vmem:[#allocation2 + $0x5f8] sm:$0xff] }
  0x7f   :  { %2417 = vmatpush.bf16.msrb.mxu2 %v7225_v14  ;;  %v163_v14 = vpack.c.bf16 %v97_v8, %v97_v8  ;;  %v7308_v8 = vld [vmem:[#allocation2 + $0x630] sm:$0xff] }
  0x80   :  { %2430 = vmatpush.bf16.msrb.mxu3 %v7233_v15  ;;  %v165_v15 = vpack.c.bf16 %v99_v9, %v99_v9  ;;  %v7316_v9 = vld [vmem:[#allocation2 + $0x670] sm:$0xff] }
  0x81   :  { %2392 = vmatpush.bf16.msrb.mxu0 %v7208_v16  ;;  %v164_v16 = vpack.c.bf16 %v98_v10, %v98_v10  ;;  %v7324_v10 = vld [vmem:[#allocation2 + $0x6b0] sm:$0xff] }
  0x82   :  { %2405 = vmatpush.bf16.msrb.mxu1 %v7216_v17  ;;  %v166_v17 = vpack.c.bf16 %v100_v11, %v100_v11  ;;  %v7332_v11 = vld [vmem:[#allocation2 + $0x6f0] sm:$0xff] }
  0x83   :  { %2418 = vmatpush.bf16.msrb.mxu2 %v7224_v18  ;;  %v7276_v18 = vld [vmem:[#allocation2 + $0x530] sm:$0xff] }
  0x84   :  { %2431 = vmatpush.bf16.msrb.mxu3 %v7232_v19  ;;  %v7284_v19 = vld [vmem:[#allocation2 + $0x570] sm:$0xff] }
  0x85   :  { %2393 = vmatpush.bf16.msrb.mxu0 %v7207_v20  ;;  %v7292_v20 = vld [vmem:[#allocation2 + $0x5b0] sm:$0xff] }
  0x86   :  { %2406 = vmatpush.bf16.msrb.mxu1 %v7215_v21  ;;  %v7300_v21 = vld [vmem:[#allocation2 + $0x5f0] sm:$0xff] }
  0x87   :  { %2419 = vmatpush.bf16.msrb.mxu2 %v7223_v23  ;;  %v7283_v23 = vld [vmem:[#allocation2 + $0x568] sm:$0xff] }
  0x88   :  { %2432 = vmatpush.bf16.msrb.mxu3 %v7231_v24  ;;  %v7645_v24 = vld [vmem:[%s8058_s2] ss:$0 sm:$0xff] }
  0x89   :  { %2394 = vmatpush.bf16.msrb.mxu0 %v7206_v25  ;;  %v7291_v25 = vld [vmem:[#allocation2 + $0x5a8] sm:$0xff] }
  0x8a   :  { %2407 = vmatpush.bf16.msrb.mxu1 %v7214_v26  ;;  %v7299_v26 = vld [vmem:[#allocation2 + $0x5e8] sm:$0xff] }
  0x8b   :  { %2420 = vmatpush.bf16.msrb.mxu2 %v7222_v27 }
  0x8c   :  { %2433 = vmatpush.bf16.msrb.mxu3 %v7230_v28  ;;  %2395 = vmatmul.bf16.vlgmr.msrb.gmra.mxu0 %v159_v37  ;;  %v7274_v28 = vld [vmem:[#allocation2 + $0x520] sm:$0xff]  ;;  %v7289_v37 = vld [vmem:[#allocation2 + $0x598] sm:$0xff] }
  0x8d   :  { %2439 = vmatpush.bf16.msra.mxu0 %v7245_v29  ;;  %2408 = vmatmul.bf16.vlgmr.msrb.gmra.mxu1 %v160_v39  ;;  %v7282_v29 = vld [vmem:[#allocation2 + $0x560] sm:$0xff] }
  0x8e   :  { %2452 = vmatpush.bf16.msra.mxu1 %v7253_v30  ;;  %2421 = vmatmul.bf16.vlgmr.msrb.gmra.mxu2 %v161_v38  ;;  %v7297_v38 = vld [vmem:[#allocation2 + $0x5d8] sm:$0xff] }
  0x8f   :  { %2465 = vmatpush.bf16.msra.mxu2 %v7261_v35  ;;  %2434 = vmatmul.bf16.vlgmr.msrb.gmra.mxu3 %v162_v40  ;;  %v7273_v35 = vld [vmem:[#allocation2 + $0x518] sm:$0xff] }
  0x90   :  { %2478 = vmatpush.bf16.msra.mxu3 %v7269_v36  ;;  %v7281_v36 = vld [vmem:[#allocation2 + $0x558] sm:$0xff] }
  0x91   :  { %2440 = vmatpush.bf16.msra.mxu0 %v7244_v41 }
  0x92   :  { %2453 = vmatpush.bf16.msra.mxu1 %v7252_v42 }
  0x93   :  { %2466 = vmatpush.bf16.msra.mxu2 %v7260_v43  ;;  %v7272_v43 = vld [vmem:[#allocation2 + $0x510] sm:$0xff] }
  0x94   :  { %2479 = vmatpush.bf16.msra.mxu3 %v7268_v44  ;;  %v7280_v44 = vld [vmem:[#allocation2 + $0x550] sm:$0xff] }
  0x95   :  { %2441 = vmatpush.bf16.msra.mxu0 %v7243_v45 }
  0x96   :  { %2454 = vmatpush.bf16.msra.mxu1 %v7251_v46 }
  0x97   :  { %2467 = vmatpush.bf16.msra.mxu2 %v7259_v47  ;;  %v7288_v47 = vld [vmem:[#allocation2 + $0x590] sm:$0xff] }
  0x98   :  { %2480 = vmatpush.bf16.msra.mxu3 %v7267_v48  ;;  %v7296_v48 = vld [vmem:[#allocation2 + $0x5d0] sm:$0xff] }
  0x99   :  { %2442 = vmatpush.bf16.msra.mxu0 %v7242_v49  ;;  %v7271_v49 = vld [vmem:[#allocation2 + $0x508] sm:$0xff] }
  0x9a   :  { %2455 = vmatpush.bf16.msra.mxu1 %v7250_v50  ;;  %v7279_v50 = vld [vmem:[#allocation2 + $0x548] sm:$0xff] }
  0x9b   :  { %2468 = vmatpush.bf16.msra.mxu2 %v7258_v51  ;;  %v64_v51 = vld [vmem:[%s8056_s0 + $0x30] sm:$0xff] }
  0x9c   :  { %2481 = vmatpush.bf16.msra.mxu3 %v7266_v52  ;;  %v7287_v52 = vld [vmem:[#allocation2 + $0x588] sm:$0xff]  ;;  %105 = vst [vmem:[#allocation1] ss:$4 sm:$0xff] %v64_v51 }
  0x9d   :  { %2443 = vmatpush.bf16.msra.mxu0 %v7241_v53  ;;  %v7295_v53 = vld [vmem:[#allocation2 + $0x5c8] sm:$0xff] }
  0x9e   :  { %2456 = vmatpush.bf16.msra.mxu1 %v7249_v54 }
  0x9f   :  { %2469 = vmatpush.bf16.msra.mxu2 %v7257_v55 }
  0xa0   :  { %2482 = vmatpush.bf16.msra.mxu3 %v7265_v56  ;;  %v7270_v56 = vld [vmem:[#allocation2 + $0x500] sm:$0xff] }
  0xa1   :  { %2444 = vmatpush.bf16.msra.mxu0 %v7240_v57  ;;  %v7278_v57 = vld [vmem:[#allocation2 + $0x540] sm:$0xff] }
  0xa2   :  { %2457 = vmatpush.bf16.msra.mxu1 %v7248_v58  ;;  %v7286_v58 = vld [vmem:[#allocation2 + $0x580] sm:$0xff] }
  0xa3   :  { %2470 = vmatpush.bf16.msra.mxu2 %v7256_v59  ;;  %v7294_v59 = vld [vmem:[#allocation2 + $0x5c0] sm:$0xff]  ;;  %v107_v51 = vld.sshfl [vmem:[#allocation1] sm:$0xff pattern:$0x73625140] }
  0xa4   :  { %2483 = vmatpush.bf16.msra.mxu3 %v7264_v60  ;;  %v7309_v60 = vld [vmem:[#allocation2 + $0x638] sm:$0xff] }
  0xa5   :  { %2445 = vmatpush.bf16.msra.mxu0 %v7239_v61  ;;  %v7317_v61 = vld [vmem:[#allocation2 + $0x678] sm:$0xff] }
  0xa6   :  { %2458 = vmatpush.bf16.msra.mxu1 %v7247_v62  ;;  %v101_v62 = vld.sshfl [vmem:[#allocation1 + $0x20] sm:$0xff pattern:$0x73625140] }
  0xa7   :  { %2471 = vmatpush.bf16.msra.mxu2 %v7255_v0  ;;  %v102_v0 = vld.sshfl [vmem:[#allocation1 + $0x28] sm:$0xff pattern:$0x73625140] }
  0xa8   :  { %2484 = vmatpush.bf16.msra.mxu3 %v7263_v1  ;;  %v104_v1 = vld.sshfl [vmem:[#allocation1 + $0x38] sm:$0xff pattern:$0x73625140] }
  0xa9   :  { %2446 = vmatpush.bf16.msra.mxu0 %v7238_v2  ;;  %v2240_v27 = vpop.f32.mrf.mxu0  ;;  %v7325_v2 = vld [vmem:[#allocation2 + $0x6b8] sm:$0xff] }
  0xaa   :  { %2459 = vmatpush.bf16.msra.mxu1 %v7246_v3  ;;  %v2241_v30 = vadd.f32 %v7645_v24, %v2240_v27  ;;  %v2253_v31 = vpop.f32.mrf.mxu1  ;;  %v7333_v3 = vld [vmem:[#allocation2 + $0x6f8] sm:$0xff] }
  0xab   :  { %2472 = vmatpush.bf16.msra.mxu2 %v7254_v4  ;;  %v167_v4 = vpack.c.bf16 %v101_v62, %v101_v62  ;;  %v7305_v24 = vld [vmem:[#allocation2 + $0x618] sm:$0xff]  ;;  %v7348_v62 = vld [vmem:[#allocation2 + $0x770] sm:$0xff] }
  0xac   :  { %2485 = vmatpush.bf16.msra.mxu3 %v7262_v5  ;;  %2447 = vmatmul.bf16.vlgmr.msra.gmra.mxu0 %v163_v14  ;;  %v2254_v34 = vadd.f32 %v2253_v31, %v2241_v30  ;;  %v169_v5 = vpack.c.bf16 %v103_v63, %v103_v63  ;;  %v7323_v14 = vld [vmem:[#allocation2 + $0x6a8] sm:$0xff]  ;;  %v7329_v27 = vld [vmem:[#allocation2 + $0x6d8] sm:$0xff]  ;;  %v7356_v63 = vld [vmem:[#allocation2 + $0x7b0] sm:$0xff] }
  0xad   :  { %2491 = vmatpush.bf16.msrb.mxu0 %v7277_v6  ;;  %2460 = vmatmul.bf16.vlgmr.msra.gmra.mxu1 %v164_v16  ;;  %v168_v6 = vpack.c.bf16 %v102_v0, %v102_v0  ;;  %v7364_v0 = vld [vmem:[#allocation2 + $0x7f0] sm:$0xff] }
  0xae   :  { %2504 = vmatpush.bf16.msrb.mxu1 %v7285_v7  ;;  %2473 = vmatmul.bf16.vlgmr.msra.gmra.mxu2 %v165_v15  ;;  %v170_v7 = vpack.c.bf16 %v104_v1, %v104_v1  ;;  %v7331_v15 = vld [vmem:[#allocation2 + $0x6e8] sm:$0xff] }
  0xaf   :  { %2517 = vmatpush.bf16.msrb.mxu2 %v7293_v12  ;;  %2486 = vmatmul.bf16.vlgmr.msra.gmra.mxu3 %v166_v17  ;;  %v7307_v12 = vld [vmem:[#allocation2 + $0x628] sm:$0xff]  ;;  %v7306_v17 = vld [vmem:[#allocation2 + $0x620] sm:$0xff] }
  0xb0   :  { %2530 = vmatpush.bf16.msrb.mxu3 %v7301_v13  ;;  %v7315_v13 = vld [vmem:[#allocation2 + $0x668] sm:$0xff] }
  0xb1   :  { %2492 = vmatpush.bf16.msrb.mxu0 %v7276_v18  ;;  %v2266_v39 = vpop.f32.mrf.mxu2  ;;  %v2242_v42 = vpop.f32.mrf.mxu0  ;;  %v7314_v18 = vld [vmem:[#allocation2 + $0x660] sm:$0xff]  ;;  %v7339_v1 = vld [vmem:[#allocation2 + $0x728] sm:$0xff] }
  0xb2   :  { %2505 = vmatpush.bf16.msrb.mxu1 %v7284_v19  ;;  %v2267_v40 = vadd.f32 %v2266_v39, %v2254_v34  ;;  %v2279_v41 = vpop.f32.mrf.mxu3  ;;  %v2255_v46 = vpop.f32.mrf.mxu1  ;;  %v7303_v39 = vld [vmem:[#allocation2 + $0x608] sm:$0xff] }
  0xb3   :  { %2518 = vmatpush.bf16.msrb.mxu2 %v7292_v20  ;;  %v7327_v42 = vld [vmem:[#allocation2 + $0x6c8] sm:$0xff]  ;;  %v7310_v46 = vld [vmem:[#allocation2 + $0x640] sm:$0xff] }
  0xb4   :  { %2531 = vmatpush.bf16.msrb.mxu3 %v7300_v21  ;;  %v7784_v45 = vadd.f32 %v2279_v41, %v2267_v40  ;;  %v7322_v21 = vld [vmem:[#allocation2 + $0x6a0] sm:$0xff]  ;;  %v7311_v40 = vld [vmem:[#allocation2 + $0x648] sm:$0xff] }
  0xb5   :  { %2493 = vmatpush.bf16.msrb.mxu0 %v7275_v22  ;;  %v7330_v22 = vld [vmem:[#allocation2 + $0x6e0] sm:$0xff]  ;;  %v7319_v41 = vld [vmem:[#allocation2 + $0x688] sm:$0xff] }
  0xb6   :  { %2506 = vmatpush.bf16.msrb.mxu1 %v7283_v23 }
  0xb7   :  { %2519 = vmatpush.bf16.msrb.mxu2 %v7291_v25  ;;  %v7313_v25 = vld [vmem:[#allocation2 + $0x658] sm:$0xff] }
  0xb8   :  { %2532 = vmatpush.bf16.msrb.mxu3 %v7299_v26  ;;  %v7321_v26 = vld [vmem:[#allocation2 + $0x698] sm:$0xff] }
  0xb9   :  { %2494 = vmatpush.bf16.msrb.mxu0 %v7274_v28  ;;  %v2268_v54 = vpop.f32.mrf.mxu2 }
  0xba   :  { %2507 = vmatpush.bf16.msrb.mxu1 %v7282_v29  ;;  %v2281_v55 = vpop.f32.mrf.mxu3  ;;  %v110_v54 = vld.sshfl [vmem:[#allocation1 + $0x18] sm:$0xff pattern:$0x73625140] }
  0xbb   :  { %2520 = vmatpush.bf16.msrb.mxu2 %v7290_v32  ;;  %v7304_v32 = vld [vmem:[#allocation2 + $0x610] sm:$0xff]  ;;  %v7357_v55 = vld [vmem:[#allocation2 + $0x7b8] sm:$0xff] }
  0xbc   :  { %2533 = vmatpush.bf16.msrb.mxu3 %v7298_v33  ;;  %v7312_v33 = vld [vmem:[#allocation2 + $0x650] sm:$0xff] }
  0xbd   :  { %2495 = vmatpush.bf16.msrb.mxu0 %v7273_v35 }
  0xbe   :  { %2508 = vmatpush.bf16.msrb.mxu1 %v7281_v36  ;;  %v7320_v36 = vld [vmem:[#allocation2 + $0x690] sm:$0xff] }
  0xbf   :  { %2521 = vmatpush.bf16.msrb.mxu2 %v7289_v37  ;;  %v7328_v37 = vld [vmem:[#allocation2 + $0x6d0] sm:$0xff] }
  0xc0   :  { %2534 = vmatpush.bf16.msrb.mxu3 %v7297_v38  ;;  %v65_v38 = vld [vmem:[%s8056_s0 + $0x38] sm:$0xff] }
  0xc1   :  { %2496 = vmatpush.bf16.msrb.mxu0 %v7272_v43  ;;  %106 = vst [vmem:[#allocation1 + $0x20] ss:$4 sm:$0xff] %v65_v38 }
  0xc2   :  { %2509 = vmatpush.bf16.msrb.mxu1 %v7280_v44 }
  0xc3   :  { %2522 = vmatpush.bf16.msrb.mxu2 %v7288_v47  ;;  %v7318_v47 = vld [vmem:[#allocation2 + $0x680] sm:$0xff] }
  0xc4   :  { %2535 = vmatpush.bf16.msrb.mxu3 %v7296_v48  ;;  %v7326_v48 = vld [vmem:[#allocation2 + $0x6c0] sm:$0xff] }
  0xc5   :  { %2497 = vmatpush.bf16.msrb.mxu0 %v7271_v49  ;;  %v7341_v49 = vld [vmem:[#allocation2 + $0x738] sm:$0xff] }
  0xc6   :  { %2510 = vmatpush.bf16.msrb.mxu1 %v7279_v50  ;;  %v7349_v50 = vld [vmem:[#allocation2 + $0x778] sm:$0xff] }
  0xc7   :  { %2523 = vmatpush.bf16.msrb.mxu2 %v7287_v52  ;;  %v109_v52 = vld.sshfl [vmem:[#allocation1 + $0x10] sm:$0xff pattern:$0x73625140] }
  0xc8   :  { %2536 = vmatpush.bf16.msrb.mxu3 %v7295_v53  ;;  %v108_v53 = vld.sshfl [vmem:[#allocation1 + $0x8] sm:$0xff pattern:$0x73625140] }
  0xc9   :  { %2498 = vmatpush.bf16.msrb.mxu0 %v7270_v56  ;;  %v2292_v16 = vpop.f32.mrf.mxu0  ;;  %v7365_v56 = vld [vmem:[#allocation2 + $0x7f8] sm:$0xff]  ;;  %v112_v38 = vld.sshfl [vmem:[#allocation1 + $0x28] sm:$0xff pattern:$0x73625140] }
  0xca   :  { %2511 = vmatpush.bf16.msrb.mxu1 %v7278_v57  ;;  %v2293_v19 = vadd.f32 %v2292_v16, %v7784_v45  ;;  %v2305_v20 = vpop.f32.mrf.mxu1  ;;  %v7302_v45 = vld [vmem:[#allocation2 + $0x600] sm:$0xff]  ;;  %v171_v57 = vpack.c.bf16 %v107_v51, %v107_v51  ;;  %v7361_v16 = vld [vmem:[#allocation2 + $0x7d8] sm:$0xff] }
  0xcb   :  { %2524 = vmatpush.bf16.msrb.mxu2 %v7286_v58  ;;  %v173_v58 = vpack.c.bf16 %v109_v52, %v109_v52 }
  0xcc   :  { %2537 = vmatpush.bf16.msrb.mxu3 %v7294_v59  ;;  %2499 = vmatmul.bf16.vlgmr.msrb.gmra.mxu0 %v167_v4  ;;  %v2306_v23 = vadd.f32 %v2305_v20, %v2293_v19  ;;  %v172_v59 = vpack.c.bf16 %v108_v53, %v108_v53  ;;  %v7363_v4 = vld [vmem:[#allocation2 + $0x7e8] sm:$0xff] }
  0xcd   :  { %2543 = vmatpush.bf16.msra.mxu0 %v7309_v60  ;;  %2512 = vmatmul.bf16.vlgmr.msrb.gmra.mxu1 %v168_v6  ;;  %v174_v60 = vpack.c.bf16 %v110_v54, %v110_v54 }
  0xce   :  { %2556 = vmatpush.bf16.msra.mxu1 %v7317_v61  ;;  %2525 = vmatmul.bf16.vlgmr.msrb.gmra.mxu2 %v169_v5  ;;  %v7340_v61 = vld [vmem:[#allocation2 + $0x730] sm:$0xff] }
  0xcf   :  { %2569 = vmatpush.bf16.msra.mxu2 %v7325_v2  ;;  %2538 = vmatmul.bf16.vlgmr.msrb.gmra.mxu3 %v170_v7  ;;  %v7347_v2 = vld [vmem:[#allocation2 + $0x768] sm:$0xff]  ;;  %v7338_v7 = vld [vmem:[#allocation2 + $0x720] sm:$0xff] }
  0xd0   :  { %2582 = vmatpush.bf16.msra.mxu3 %v7333_v3  ;;  %v7355_v3 = vld [vmem:[#allocation2 + $0x7a8] sm:$0xff] }
  0xd1   :  { %2544 = vmatpush.bf16.msra.mxu0 %v7308_v8  ;;  %v2318_v28 = vpop.f32.mrf.mxu2  ;;  %v2294_v31 = vpop.f32.mrf.mxu0  ;;  %v7346_v8 = vld [vmem:[#allocation2 + $0x760] sm:$0xff] }
  0xd2   :  { %2557 = vmatpush.bf16.msra.mxu1 %v7316_v9  ;;  %v2319_v29 = vadd.f32 %v2318_v28, %v2306_v23  ;;  %v2331_v30 = vpop.f32.mrf.mxu3  ;;  %v2307_v35 = vpop.f32.mrf.mxu1  ;;  %v7344_v23 = vld [vmem:[#allocation2 + $0x750] sm:$0xff]  ;;  %v7343_v28 = vld [vmem:[#allocation2 + $0x748] sm:$0xff] }
  0xd3   :  { %2570 = vmatpush.bf16.msra.mxu2 %v7324_v10  ;;  %v7354_v10 = vld [vmem:[#allocation2 + $0x7a0] sm:$0xff] }
  0xd4   :  { %2583 = vmatpush.bf16.msra.mxu3 %v7332_v11  ;;  %v7790_v34 = vadd.f32 %v2331_v30, %v2319_v29  ;;  %v7362_v11 = vld [vmem:[#allocation2 + $0x7e0] sm:$0xff]  ;;  %v7351_v29 = vld [vmem:[#allocation2 + $0x788] sm:$0xff] }
  0xd5   :  { %2545 = vmatpush.bf16.msra.mxu0 %v7307_v12  ;;  %v7359_v30 = vld [vmem:[#allocation2 + $0x7c8] sm:$0xff]  ;;  %v7350_v35 = vld [vmem:[#allocation2 + $0x780] sm:$0xff] }
  0xd6   :  { %2558 = vmatpush.bf16.msra.mxu1 %v7315_v13  ;;  %v7337_v13 = vld [vmem:[#allocation2 + $0x718] sm:$0xff] }
  0xd7   :  { %2571 = vmatpush.bf16.msra.mxu2 %v7323_v14  ;;  %v7345_v14 = vld [vmem:[#allocation2 + $0x758] sm:$0xff] }
  0xd8   :  { %2584 = vmatpush.bf16.msra.mxu3 %v7331_v15  ;;  %v7353_v15 = vld [vmem:[#allocation2 + $0x798] sm:$0xff] }
  0xd9   :  { %2546 = vmatpush.bf16.msra.mxu0 %v7306_v17  ;;  %v2320_v43 = vpop.f32.mrf.mxu2 }
  0xda   :  { %2559 = vmatpush.bf16.msra.mxu1 %v7314_v18  ;;  %v2333_v44 = vpop.f32.mrf.mxu3 }
  0xdb   :  { %2572 = vmatpush.bf16.msra.mxu2 %v7322_v21 }
  0xdc   :  { %2585 = vmatpush.bf16.msra.mxu3 %v7330_v22  ;;  %v7336_v22 = vld [vmem:[#allocation2 + $0x710] sm:$0xff] }
  0xdd   :  { %2547 = vmatpush.bf16.msra.mxu0 %v7305_v24 }
  0xde   :  { %2560 = vmatpush.bf16.msra.mxu1 %v7313_v25  ;;  %v7352_v25 = vld [vmem:[#allocation2 + $0x790] sm:$0xff] }
  0xdf   :  { %2573 = vmatpush.bf16.msra.mxu2 %v7321_v26  ;;  %v7360_v26 = vld [vmem:[#allocation2 + $0x7d0] sm:$0xff] }
  0xe0   :  { %2586 = vmatpush.bf16.msra.mxu3 %v7329_v27  ;;  %v7335_v27 = vld [vmem:[#allocation2 + $0x708] sm:$0xff] }
  0xe1   :  { %2548 = vmatpush.bf16.msra.mxu0 %v7304_v32  ;;  %v7334_v32 = vld [vmem:[#allocation2 + $0x700] sm:$0xff] }
  0xe2   :  { %2561 = vmatpush.bf16.msra.mxu1 %v7312_v33 }
  0xe3   :  { %2574 = vmatpush.bf16.msra.mxu2 %v7320_v36  ;;  %v7358_v36 = vld [vmem:[#allocation2 + $0x7c0] sm:$0xff] }
  0xe4   :  { %2587 = vmatpush.bf16.msra.mxu3 %v7328_v37  ;;  %v111_v37 = vld.sshfl [vmem:[#allocation1 + $0x20] sm:$0xff pattern:$0x73625140] }
  0xe5   :  { %2549 = vmatpush.bf16.msra.mxu0 %v7303_v39  ;;  %v113_v39 = vld.sshfl [vmem:[#allocation1 + $0x30] sm:$0xff pattern:$0x73625140] }
  0xe6   :  { %2562 = vmatpush.bf16.msra.mxu1 %v7311_v40  ;;  %v114_v40 = vld.sshfl [vmem:[#allocation1 + $0x38] sm:$0xff pattern:$0x73625140]  ;;  %v177_v43 = vpack.c.bf16 %v113_v39, %v113_v39 }
  0xe7   :  { %2575 = vmatpush.bf16.msra.mxu2 %v7319_v41  ;;  %v175_v41 = vpack.c.bf16 %v111_v37, %v111_v37  ;;  %v178_v44 = vpack.c.bf16 %v114_v40, %v114_v40 }
  0xe8   :  { %2588 = vmatpush.bf16.msra.mxu3 %v7327_v42  ;;  %v176_v42 = vpack.c.bf16 %v112_v38, %v112_v38 }
  0xe9   :  { %2550 = vmatpush.bf16.msra.mxu0 %v7302_v45  ;;  %v2344_v5 = vpop.f32.mrf.mxu0 }
  0xea   :  { %2563 = vmatpush.bf16.msra.mxu1 %v7310_v46  ;;  %v2345_v6 = vadd.f32 %v2344_v5, %v7790_v34  ;;  %v2357_v9 = vpop.f32.mrf.mxu1  ;;  %v7342_v34 = vld [vmem:[#allocation2 + $0x740] sm:$0xff] }
  0xeb   :  { %2576 = vmatpush.bf16.msra.mxu2 %v7318_v47 }
  0xec   :  { %2589 = vmatpush.bf16.msra.mxu3 %v7326_v48  ;;  %2551 = vmatmul.bf16.vlgmr.msra.gmra.mxu0 %v171_v57  ;;  %v2358_v12 = vadd.f32 %v2357_v9, %v2345_v6 }
  0xed   :  { %2595 = vmatpush.bf16.msrb.mxu0 %v7341_v49  ;;  %2564 = vmatmul.bf16.vlgmr.msra.gmra.mxu1 %v172_v59 }
  0xee   :  { %2608 = vmatpush.bf16.msrb.mxu1 %v7349_v50  ;;  %2577 = vmatmul.bf16.vlgmr.msra.gmra.mxu2 %v173_v58 }
  0xef   :  { %2621 = vmatpush.bf16.msrb.mxu2 %v7357_v55  ;;  %2590 = vmatmul.bf16.vlgmr.msra.gmra.mxu3 %v174_v60 }
  0xf0   :  { %2634 = vmatpush.bf16.msrb.mxu3 %v7365_v56 }
  0xf1   :  { %2596 = vmatpush.bf16.msrb.mxu0 %v7340_v61  ;;  %v2370_v17 = vpop.f32.mrf.mxu2  ;;  %v2346_v20 = vpop.f32.mrf.mxu0 }
  0xf2   :  { %2609 = vmatpush.bf16.msrb.mxu1 %v7348_v62  ;;  %v2371_v18 = vadd.f32 %v2370_v17, %v2358_v12  ;;  %v2383_v19 = vpop.f32.mrf.mxu3  ;;  %v2359_v24 = vpop.f32.mrf.mxu1 }
  0xf3   :  { %2622 = vmatpush.bf16.msrb.mxu2 %v7356_v63 }
  0xf4   :  { %2635 = vmatpush.bf16.msrb.mxu3 %v7364_v0  ;;  %v2384_v21 = vadd.f32 %v2383_v19, %v2371_v18 }
  0xf5   :  { %2597 = vmatpush.bf16.msrb.mxu0 %v7339_v1 }
  0xf6   :  { %2610 = vmatpush.bf16.msrb.mxu1 %v7347_v2 }
  0xf7   :  { %2623 = vmatpush.bf16.msrb.mxu2 %v7355_v3 }
  0xf8   :  { %2636 = vmatpush.bf16.msrb.mxu3 %v7363_v4 }
  0xf9   :  { %2598 = vmatpush.bf16.msrb.mxu0 %v7338_v7  ;;  %v2372_v31 = vpop.f32.mrf.mxu2 }
  0xfa   :  { %2611 = vmatpush.bf16.msrb.mxu1 %v7346_v8  ;;  %v2385_v33 = vpop.f32.mrf.mxu3 }
  0xfb   :  { %2624 = vmatpush.bf16.msrb.mxu2 %v7354_v10 }
  0xfc   :  { %2637 = vmatpush.bf16.msrb.mxu3 %v7362_v11 }
  0xfd   :  { %2599 = vmatpush.bf16.msrb.mxu0 %v7337_v13 }
  0xfe   :  { %2612 = vmatpush.bf16.msrb.mxu1 %v7345_v14 }
  0xff   :  { %2625 = vmatpush.bf16.msrb.mxu2 %v7353_v15 }
 0x100   :  { %2638 = vmatpush.bf16.msrb.mxu3 %v7361_v16 }
 0x101   :  { %2600 = vmatpush.bf16.msrb.mxu0 %v7336_v22 }
 0x102   :  { %2613 = vmatpush.bf16.msrb.mxu1 %v7344_v23 }
 0x103   :  { %2626 = vmatpush.bf16.msrb.mxu2 %v7352_v25 }
 0x104   :  { %2639 = vmatpush.bf16.msrb.mxu3 %v7360_v26 }
 0x105   :  { %2601 = vmatpush.bf16.msrb.mxu0 %v7335_v27 }
 0x106   :  { %2614 = vmatpush.bf16.msrb.mxu1 %v7343_v28 }
 0x107   :  { %2627 = vmatpush.bf16.msrb.mxu2 %v7351_v29 }
 0x108   :  { %2640 = vmatpush.bf16.msrb.mxu3 %v7359_v30 }
 0x109   :  { %2602 = vmatpush.bf16.msrb.mxu0 %v7334_v32  ;;  %v2396_v45 = vpop.f32.mrf.mxu0 }
 0x10a   :  { %2615 = vmatpush.bf16.msrb.mxu1 %v7342_v34  ;;  %v2397_v46 = vadd.f32 %v2396_v45, %v2384_v21  ;;  %v2409_v47 = vpop.f32.mrf.mxu1  ;;  %v7381_v45 = vld [vmem:[%s8059_s3 + $0x74] sm:$0xf0] }
 0x10b   :  { %2628 = vmatpush.bf16.msrb.mxu2 %v7350_v35 }
 0x10c   :  { %2641 = vmatpush.bf16.msrb.mxu3 %v7358_v36  ;;  %2603 = vmatmul.bf16.vlgmr.msrb.gmra.mxu0 %v175_v41  ;;  %v2410_v48 = vadd.f32 %v2409_v47, %v2397_v46  ;;  %v7380_v46 = vld [vmem:[%s8059_s3 + $0x74] sm:$0xf] }
 0x10d   :  { %2616 = vmatmul.bf16.vlgmr.msrb.gmra.mxu1 %v176_v42 }
 0x10e   :  { %2629 = vmatmul.bf16.vlgmr.msrb.gmra.mxu2 %v177_v43  ;;  %v7708_v43 = vmov 128.0  }
 0x10f   :  { %2642 = vmatmul.bf16.vlgmr.msrb.gmra.mxu3 %v178_v44  ;;  %7646 = vrcp.f32 %v7708_v43  ;;  %v6080_v44 = vld [vmem:[%s8059_s3 + $0x70] sm:$0xf]  ;;  %v6986_v43 = vld [vmem:[#allocation4 + $0x780] sm:$0xf0] }
 0x110   :  { %v6081_v47 = vor.u32 %v7381_v45, %v6080_v44  ;;  %v6992_v44 = vld [vmem:[#allocation4 + $0x708] sm:$0xf] }
 0x111   :  { %v2422_v49 = vpop.f32.mrf.mxu2  ;;  %v2398_v52 = vpop.f32.mrf.mxu0  ;;  %v7623_v45 = vld [vmem:[#allocation4 + $0x784] sm:$0xf0] }
 0x112   :  { %v2423_v50 = vadd.f32 %v2422_v49, %v2410_v48  ;;  %v2435_v51 = vpop.f32.mrf.mxu3  ;;  %v2411_v54 = vpop.f32.mrf.mxu1  ;;  %v6082_v48 = vld [vmem:[%s8059_s3 + $0x78] sm:$0xf0]  ;;  %v6072_v49 = vld [vmem:[%s8059_s3 + $0x60] sm:$0xf]  ;;  %v7378_v52 = vld [vmem:[%s8059_s3 + $0x64] sm:$0xf]  ;;  %2781 = vmatpush.bf16.msra.mxu0 %v6081_v47  ;;  %v6993_v47 = vor.u32 %v7623_v45, %v6992_v44 }
 0x113   :  { %v6346_v44 = vld [vmem:[#allocation4 + $0x280] sm:$0xf0]  ;;  %v6352_v45 = vld [vmem:[#allocation4 + $0x208] sm:$0xf] }
 0x114   :  { %v2436_v53 = vadd.f32 %v2435_v51, %v2423_v50  ;;  %v7379_v50 = vld [vmem:[%s8059_s3 + $0x64] sm:$0xf0]  ;;  %v6085_v51 = vor.u32 %v7380_v46, %v6082_v48  ;;  %v7607_v48 = vld [vmem:[#allocation4 + $0x70c] sm:$0xf] }
 0x115   :  { %v7647_v54 = vpop.eup %7646 }
 0x116   :  { %2794 = vmatpush.bf16.msra.mxu1 %v6085_v51  ;;  %vm2657_vm1 = vweird.f32 %v7647_v54 }
 0x119   :  { %v2424_v55 = vpop.f32.mrf.mxu2 }
 0x11a   :  { %v2437_v56 = vpop.f32.mrf.mxu3  ;;  %v6073_v55 = vor.u32 %v7379_v50, %v6072_v49  ;;  %v6994_v49 = vld [vmem:[#allocation4 + $0x788] sm:$0xf0]  ;;  %v6856_v50 = vld [vmem:[#allocation4 + $0x600] sm:$0xf] }
 0x11b   :  { %v6997_v51 = vor.u32 %v7607_v48, %v6994_v49  ;;  %v6354_v48 = vld [vmem:[#allocation4 + $0x288] sm:$0xf0] }
 0x11c   :  { %2782 = vmatpush.bf16.msra.mxu0 %v6073_v55 }
 0x129   :  { %v2448_v57 = vpop.f32.mrf.mxu0 }
 0x12a   :  { %v2449_v58 = vadd.f32 %v2448_v57, %v2436_v53  ;;  %v2461_v59 = vpop.f32.mrf.mxu1  ;;  %v6074_v53 = vld [vmem:[%s8059_s3 + $0x68] sm:$0xf0]  ;;  %v2653_v57 = vmul.f32 128.0, %v7647_v54 }
 0x12b   :  { %v6077_v56 = vor.u32 %v7378_v52, %v6074_v53  ;;  %v7590_v52 = vld [vmem:[#allocation4 + $0x67c] sm:$0xf0]  ;;  %v7574_v53 = vld [vmem:[#allocation4 + $0x604] sm:$0xf] }
 0x12c   :  { %v2462_v60 = vadd.f32 %v2461_v59, %v2449_v58  ;;  %v2654_v58 = vsub.f32 1.0, %v2653_v57  ;;  %v6857_v55 = vor.u32 %v7590_v52, %v6856_v50  ;;  %v6864_v57 = vld [vmem:[#allocation4 + $0x608] sm:$0xf] }
 0x12d   :  { %2795 = vmatpush.bf16.msra.mxu1 %v6077_v56 }
 0x12e   :  { %v2655_v59 = vmul.f32 %v7647_v54, %v2654_v58  ;;  %v7591_v58 = vld [vmem:[#allocation4 + $0x684] sm:$0xf0] }
 0x131   :  { %v2474_v61 = vpop.f32.mrf.mxu2  ;;  %v2450_v0 = vpop.f32.mrf.mxu0 }
 0x132   :  { %v2475_v62 = vadd.f32 %v2474_v61, %v2462_v60  ;;  %v2487_v63 = vpop.f32.mrf.mxu3  ;;  %v2463_v2 = vpop.f32.mrf.mxu1  ;;  %v2656_v60 = vadd.f32 %v7647_v54, %v2655_v59  ;;  %v7575_v59 = vld [vmem:[#allocation4 + $0x60c] sm:$0xf] }
 0x134   :  { %v2488_v1 = vadd.f32 %v2487_v63, %v2475_v62  ;;  %v7821_v61 = vsel %vm2657_vm1, %v7647_v54, %v2656_v60  ;;  %v6858_v54 = vld [vmem:[#allocation4 + $0x680] sm:$0xf0] }
 0x135   :  { %v6861_v56 = vor.u32 %v7574_v53, %v6858_v54  ;;  %v7430_v54 = vld [vmem:[#allocation4 + $0x17c] sm:$0xf0] }
 0x139   :  { %v2476_v3 = vpop.f32.mrf.mxu2 }
 0x13a   :  { %v2489_v4 = vpop.f32.mrf.mxu3  ;;  %v6064_v3 = vld [vmem:[%s8059_s3 + $0x50] sm:$0xf] }
 0x13b   :  { %v7377_v4 = vld [vmem:[%s8059_s3 + $0x54] sm:$0xf0] }
 0x149   :  { %v2500_v5 = vpop.f32.mrf.mxu0 }
 0x14a   :  { %v2513_v6 = vpop.f32.mrf.mxu1  ;;  %v2501_v16 = vadd.f32 %v2500_v5, %v2488_v1  ;;  %v7376_v5 = vld [vmem:[%s8059_s3 + $0x54] sm:$0xf] }
 0x14c   :  { %v2514_v20 = vadd.f32 %v2513_v6, %v2501_v16  ;;  %v6065_v6 = vor.u32 %v7377_v4, %v6064_v3  ;;  %v7373_v16 = vld [vmem:[%s8059_s3 + $0x34] sm:$0xf0] }
 0x14e   :  { %2783 = vmatpush.bf16.msra.mxu0 %v6065_v6  ;;  %v6730_v6 = vld [vmem:[#allocation4 + $0x580] sm:$0xf0] }
 0x151   :  { %v2526_v7 = vpop.f32.mrf.mxu2  ;;  %v2502_v9 = vpop.f32.mrf.mxu0 }
 0x152   :  { %v2539_v8 = vpop.f32.mrf.mxu3  ;;  %v2515_v10 = vpop.f32.mrf.mxu1  ;;  %v2527_v21 = vadd.f32 %v2526_v7, %v2514_v20  ;;  %v6066_v7 = vld [vmem:[%s8059_s3 + $0x58] sm:$0xf0]  ;;  %v6056_v9 = vld [vmem:[%s8059_s3 + $0x40] sm:$0xf] }
 0x153   :  { %v7375_v10 = vld [vmem:[%s8059_s3 + $0x44] sm:$0xf0] }
 0x154   :  { %v2540_v24 = vadd.f32 %v2539_v8, %v2527_v21  ;;  %v6069_v8 = vor.u32 %v7376_v5, %v6066_v7  ;;  %v6040_v21 = vld [vmem:[%s8059_s3 + $0x20] sm:$0xf]  ;;  %v7542_v5 = vld [vmem:[#allocation4 + $0x504] sm:$0xf]  ;;  %v6736_v7 = vld [vmem:[#allocation4 + $0x508] sm:$0xf] }
 0x156   :  { %2796 = vmatpush.bf16.msra.mxu1 %v6069_v8 }
 0x159   :  { %v2528_v11 = vpop.f32.mrf.mxu2 }
 0x15a   :  { %v2541_v12 = vpop.f32.mrf.mxu3  ;;  %v7374_v11 = vld [vmem:[%s8059_s3 + $0x44] sm:$0xf] }
 0x15b   :  { %v6057_v12 = vor.u32 %v7375_v10, %v6056_v9  ;;  %v7559_v9 = vld [vmem:[#allocation4 + $0x584] sm:$0xf0]  ;;  %v7543_v10 = vld [vmem:[#allocation4 + $0x50c] sm:$0xf] }
 0x15d   :  { %2784 = vmatpush.bf16.msra.mxu0 %v6057_v12 }
 0x169   :  { %v2552_v13 = vpop.f32.mrf.mxu0 }
 0x16a   :  { %v2565_v14 = vpop.f32.mrf.mxu1  ;;  %v2553_v25 = vadd.f32 %v2552_v13, %v2540_v24  ;;  %v6058_v13 = vld [vmem:[%s8059_s3 + $0x48] sm:$0xf0] }
 0x16c   :  { %v2566_v26 = vadd.f32 %v2565_v14, %v2553_v25  ;;  %v6061_v14 = vor.u32 %v7374_v11, %v6058_v13  ;;  %v6042_v25 = vld [vmem:[%s8059_s3 + $0x28] sm:$0xf0]  ;;  %v6738_v11 = vld [vmem:[#allocation4 + $0x588] sm:$0xf0]  ;;  %v6733_v13 = vor.u32 %v7542_v5, %v6730_v6  ;;  %v6088_v6 = vld [vmem:[#allocation4] sm:$0xf] }
 0x16e   :  { %2797 = vmatpush.bf16.msra.mxu1 %v6061_v14  ;;  %v6737_v14 = vor.u32 %v7559_v9, %v6736_v7  ;;  %v7398_v7 = vld [vmem:[#allocation4 + $0x7c] sm:$0xf0] }
 0x171   :  { %v2578_v15 = vpop.f32.mrf.mxu2  ;;  %v2554_v18 = vpop.f32.mrf.mxu0 }
 0x172   :  { %v2591_v17 = vpop.f32.mrf.mxu3  ;;  %v2567_v19 = vpop.f32.mrf.mxu1  ;;  %v2579_v27 = vadd.f32 %v2578_v15, %v2566_v26  ;;  %v6048_v15 = vld [vmem:[%s8059_s3 + $0x30] sm:$0xf] }
 0x173   :  { %v6049_v18 = vor.u32 %v7373_v16, %v6048_v15  ;;  %v6050_v19 = vld [vmem:[%s8059_s3 + $0x38] sm:$0xf0]  ;;  %v6600_v15 = vld [vmem:[#allocation4 + $0x400] sm:$0xf] }
 0x174   :  { %v2592_v28 = vadd.f32 %v2591_v17, %v2579_v27  ;;  %v7372_v17 = vld [vmem:[%s8059_s3 + $0x34] sm:$0xf]  ;;  %v6032_v27 = vld [vmem:[%s8059_s3 + $0x10] sm:$0xf]  ;;  %v7526_v16 = vld [vmem:[#allocation4 + $0x47c] sm:$0xf0] }
 0x175   :  { %v6053_v20 = vor.u32 %v7372_v17, %v6050_v19  ;;  %2785 = vmatpush.bf16.msra.mxu0 %v6049_v18  ;;  %v6741_v17 = vor.u32 %v7543_v10, %v6738_v11  ;;  %v6602_v18 = vld [vmem:[#allocation4 + $0x480] sm:$0xf0]  ;;  %v6608_v19 = vld [vmem:[#allocation4 + $0x408] sm:$0xf] }
 0x176   :  { %v7382_v10 = vld [vmem:[#allocation4 + $0x4] sm:$0xf] }
 0x177   :  { %2798 = vmatpush.bf16.msra.mxu1 %v6053_v20  ;;  %v7527_v20 = vld [vmem:[#allocation4 + $0x484] sm:$0xf0]  ;;  %v6090_v11 = vld [vmem:[#allocation4 + $0x80] sm:$0xf0] }
 0x179   :  { %v2580_v22 = vpop.f32.mrf.mxu2 }
 0x17a   :  { %v2593_v23 = vpop.f32.mrf.mxu3  ;;  %v7371_v22 = vld [vmem:[%s8059_s3 + $0x24] sm:$0xf0] }
 0x17b   :  { %v7370_v23 = vld [vmem:[%s8059_s3 + $0x24] sm:$0xf]  ;;  %v6041_v24 = vor.u32 %v7371_v22, %v6040_v21  ;;  %v7511_v21 = vld [vmem:[#allocation4 + $0x40c] sm:$0xf] }
 0x17c   :  { %v6045_v26 = vor.u32 %v7370_v23, %v6042_v25  ;;  %v6610_v22 = vld [vmem:[#allocation4 + $0x488] sm:$0xf0]  ;;  %v6601_v23 = vor.u32 %v7526_v16, %v6600_v15  ;;  %v6609_v25 = vor.u32 %v7527_v20, %v6608_v19  ;;  %v7608_v19 = vld [vmem:[#allocation4 + $0x714] sm:$0xf] }
 0x17d   :  { %2786 = vmatpush.bf16.msra.mxu0 %v6041_v24  ;;  %v6098_v15 = vld [vmem:[#allocation4 + $0x88] sm:$0xf0] }
 0x17e   :  { %2799 = vmatpush.bf16.msra.mxu1 %v6045_v26  ;;  %v6472_v26 = vld [vmem:[#allocation4 + $0x300] sm:$0xf] }
 0x189   :  { %v2604_v29 = vpop.f32.mrf.mxu0 }
 0x18a   :  { %v2617_v30 = vpop.f32.mrf.mxu1  ;;  %v2605_v31 = vadd.f32 %v2604_v29, %v2592_v28  ;;  %v7369_v28 = vld [vmem:[%s8059_s3 + $0x14] sm:$0xf0]  ;;  %v7368_v29 = vld [vmem:[%s8059_s3 + $0x14] sm:$0xf] }
 0x18c   :  { %v2618_v32 = vadd.f32 %v2617_v30, %v2605_v31  ;;  %v6033_v30 = vor.u32 %v7369_v28, %v6032_v27  ;;  %v6034_v31 = vld [vmem:[%s8059_s3 + $0x18] sm:$0xf0]  ;;  %v7494_v27 = vld [vmem:[#allocation4 + $0x37c] sm:$0xf0]  ;;  %v7478_v28 = vld [vmem:[#allocation4 + $0x304] sm:$0xf] }
 0x18e   :  { %2787 = vmatpush.bf16.msra.mxu0 %v6033_v30  ;;  %v6474_v30 = vld [vmem:[#allocation4 + $0x380] sm:$0xf0] }
 0x191   :  { %v2630_v33 = vpop.f32.mrf.mxu2  ;;  %v2606_v36 = vpop.f32.mrf.mxu0 }
 0x192   :  { %v2643_v34 = vpop.f32.mrf.mxu3  ;;  %v2631_v35 = vadd.f32 %v2630_v33, %v2618_v32  ;;  %v2619_v37 = vpop.f32.mrf.mxu1  ;;  %v6037_v32 = vor.u32 %v7368_v29, %v6034_v31  ;;  %v6024_v33 = vld [vmem:[%s8059_s3] sm:$0xf]  ;;  %v6613_v29 = vor.u32 %v7511_v21, %v6610_v22  ;;  %v6480_v31 = vld [vmem:[#allocation4 + $0x308] sm:$0xf]  ;;  %v7002_v21 = vld [vmem:[#allocation4 + $0x790] sm:$0xf0] }
 0x193   :  { %v6026_v37 = vld [vmem:[%s8059_s3 + $0x8] sm:$0xf0]  ;;  %v7008_v22 = vld [vmem:[#allocation4 + $0x718] sm:$0xf] }
 0x194   :  { %v2644_v38 = vadd.f32 %v2643_v34, %v2631_v35  ;;  %2800 = vmatpush.bf16.msra.mxu1 %v6037_v32  ;;  %v7367_v34 = vld [vmem:[%s8059_s3 + $0x4] sm:$0xf0]  ;;  %v7366_v35 = vld [vmem:[%s8059_s3 + $0x4] sm:$0xf]  ;;  %v7495_v32 = vld [vmem:[#allocation4 + $0x384] sm:$0xf0] }
 0x195   :  { %v6025_v36 = vor.u32 %v7367_v34, %v6024_v33  ;;  %v7479_v33 = vld [vmem:[#allocation4 + $0x30c] sm:$0xf] }
 0x196   :  { %v2647_v39 = vmax.f32 %v2644_v38, 0.0  ;;  %v6029_v38 = vor.u32 %v7366_v35, %v6026_v37  ;;  %v6482_v34 = vld [vmem:[#allocation4 + $0x388] sm:$0xf0]  ;;  %v6473_v35 = vor.u32 %v7494_v27, %v6472_v26  ;;  %v6477_v37 = vor.u32 %v7478_v28, %v6474_v30  ;;  %v7609_v26 = vld [vmem:[#allocation4 + $0x71c] sm:$0xf] }
 0x197   :  { %2788 = vmatpush.bf16.msra.mxu0 %v6025_v36  ;;  %v7010_v27 = vld [vmem:[#allocation4 + $0x798] sm:$0xf0] }
 0x198   :  { %v2649_v40 = vsel %vm2648_vm0, %v2647_v39, 0.0  ;;  %2801 = vmatpush.bf16.msra.mxu1 %v6029_v38  ;;  %v6481_v38 = vor.u32 %v7495_v32, %v6480_v31  ;;  %v7005_v31 = vor.u32 %v7608_v19, %v7002_v21  ;;  %v7448_v19 = vld [vmem:[#allocation4 + $0x214] sm:$0xf] }
 0x199   :  { %v2632_v41 = vpop.f32.mrf.mxu2  ;;  %2650 = vadd.xlane.f32.xlu0 %v2649_v40  ;;  %v7622_v40 = vld [vmem:[#allocation4 + $0x77c] sm:$0xf0]  ;;  %v6362_v21 = vld [vmem:[#allocation4 + $0x290] sm:$0xf0] }
 0x19a   :  { %v2645_v42 = vpop.f32.mrf.mxu3  ;;  %v7606_v41 = vld [vmem:[#allocation4 + $0x704] sm:$0xf] }
 0x19b   :  { %v6989_v46 = vor.u32 %v7606_v41, %v6986_v43  ;;  %4446 = vmatpush.bf16.msrb.mxu0 %v6993_v47  ;;  %v7446_v41 = vld [vmem:[#allocation4 + $0x204] sm:$0xf]  ;;  %v6485_v43 = vor.u32 %v7479_v33, %v6482_v34  ;;  %v7447_v47 = vld [vmem:[#allocation4 + $0x20c] sm:$0xf]  ;;  %v6872_v33 = vld [vmem:[#allocation4 + $0x610] sm:$0xf] }
 0x19c   :  { %4459 = vmatpush.bf16.msrb.mxu1 %v6997_v51  ;;  %v6216_v51 = vld [vmem:[#allocation4 + $0x100] sm:$0xf]  ;;  %v6349_v52 = vor.u32 %v7446_v41, %v6346_v44  ;;  %v7592_v34 = vld [vmem:[#allocation4 + $0x68c] sm:$0xf0] }
 0x19d   :  { %4433 = vmatpush.bf16.msra.mxu3 %v6989_v46  ;;  %v7463_v46 = vld [vmem:[#allocation4 + $0x284] sm:$0xf0]  ;;  %v6873_v41 = vor.u32 %v7592_v34, %v6872_v33  ;;  %v6744_v44 = vld [vmem:[#allocation4 + $0x510] sm:$0xf]  ;;  %v6234_v34 = vld [vmem:[#allocation4 + $0x190] sm:$0xf0] }
 0x19e   :  { %v6353_v53 = vor.u32 %v7463_v46, %v6352_v45  ;;  %v7560_v45 = vld [vmem:[#allocation4 + $0x58c] sm:$0xf0]  ;;  %v7544_v46 = vld [vmem:[#allocation4 + $0x514] sm:$0xf] }
 0x1a1   :  { %4434 = vmatpush.bf16.msra.mxu3 %v6861_v56  ;;  %v6218_v56 = vld [vmem:[#allocation4 + $0x180] sm:$0xf0] }
 0x1a5   :  { %4435 = vmatpush.bf16.msra.mxu3 %v6733_v13  ;;  %v6096_v13 = vld [vmem:[#allocation4 + $0x8] sm:$0xf] }
 0x20c   :  { %v2651_v62 = vpop.xlane.xlu0 %2650 }
 0x20d   :  { %v2659_v63 = vmul.f32 %v7821_v61, %v2651_v62  ;;  %v6865_v62 = vor.u32 %v7591_v58, %v6864_v57  ;;  %v6357_v58 = vor.u32 %v7447_v47, %v6354_v48  ;;  %v6746_v48 = vld [vmem:[#allocation4 + $0x590] sm:$0xf0] }
 0x20f   :  { %v7824_v0 = vsub.f32 %v2647_v39, %v2659_v63  ;;  %v6984_v39 = vld [vmem:[#allocation4 + $0x700] sm:$0xf]  ;;  %v6866_v63 = vld [vmem:[#allocation4 + $0x688] sm:$0xf0]  ;;  %4447 = vmatpush.bf16.msrb.mxu0 %v6865_v62 }
 0x210   :  { %v6985_v42 = vor.u32 %v7622_v40, %v6984_v39  ;;  %v6869_v4 = vor.u32 %v7575_v59, %v6866_v63  ;;  %v6344_v39 = vld [vmem:[#allocation4 + $0x200] sm:$0xf]  ;;  %v6224_v59 = vld [vmem:[#allocation4 + $0x108] sm:$0xf]  ;;  %v7415_v62 = vld [vmem:[#allocation4 + $0x10c] sm:$0xf] }
 0x211   :  { %v2661_v1 = vmul.f32 %v7824_v0, %v7824_v0  ;;  %v7462_v40 = vld [vmem:[#allocation4 + $0x27c] sm:$0xf0]  ;;  %v6226_v63 = vld [vmem:[#allocation4 + $0x188] sm:$0xf0] }
 0x212   :  { %4420 = vmatpush.bf16.msra.mxu2 %v6985_v42  ;;  %4460 = vmatpush.bf16.msrb.mxu1 %v6869_v4  ;;  %v6345_v50 = vor.u32 %v7462_v40, %v6344_v39  ;;  %v6229_v9 = vor.u32 %v7415_v62, %v6226_v63  ;;  %v7577_v39 = vld [vmem:[#allocation4 + $0x61c] sm:$0xf]  ;;  %v6624_v62 = vld [vmem:[#allocation4 + $0x418] sm:$0xf] }
 0x213   :  { %v2662_v2 = vsel %vm2648_vm0, %v2661_v1, 0.0  ;;  %v6728_v1 = vld [vmem:[#allocation4 + $0x500] sm:$0xf]  ;;  %4448 = vmatpush.bf16.msrb.mxu0 %v6737_v14  ;;  %v7399_v14 = vld [vmem:[#allocation4 + $0x84] sm:$0xf0] }
 0x214   :  { %2663 = vadd.xlane.f32.xlu0 %v2662_v2  ;;  %v7558_v2 = vld [vmem:[#allocation4 + $0x57c] sm:$0xf0]  ;;  %v6882_v40 = vld [vmem:[#allocation4 + $0x698] sm:$0xf0]  ;;  %v7529_v63 = vld [vmem:[#allocation4 + $0x494] sm:$0xf0] }
 0x215   :  { %v6729_v8 = vor.u32 %v7558_v2, %v6728_v1  ;;  %v6217_v2 = vor.u32 %v7430_v54, %v6216_v51  ;;  %v6885_v47 = vor.u32 %v7577_v39, %v6882_v40  ;;  %v7545_v51 = vld [vmem:[#allocation4 + $0x51c] sm:$0xf]  ;;  %v6749_v54 = vor.u32 %v7544_v46, %v6746_v48  ;;  %v6112_v46 = vld [vmem:[#allocation4 + $0x18] sm:$0xf] }
 0x216   :  { %4421 = vmatpush.bf16.msra.mxu2 %v6857_v55  ;;  %4461 = vmatpush.bf16.msrb.mxu1 %v6741_v17  ;;  %v7414_v55 = vld [vmem:[#allocation4 + $0x104] sm:$0xf]  ;;  %v6089_v17 = vor.u32 %v7398_v7, %v6088_v6  ;;  %v6488_v6 = vld [vmem:[#allocation4 + $0x310] sm:$0xf]  ;;  %v6242_v39 = vld [vmem:[#allocation4 + $0x198] sm:$0xf0] }
 0x217   :  { %4449 = vmatpush.bf16.msrb.mxu0 %v6609_v25  ;;  %v6221_v4 = vor.u32 %v7414_v55, %v6218_v56  ;;  %v6097_v25 = vor.u32 %v7399_v14, %v6096_v13  ;;  %v6616_v56 = vld [vmem:[#allocation4 + $0x410] sm:$0xf]  ;;  %v7497_v13 = vld [vmem:[#allocation4 + $0x394] sm:$0xf0]  ;;  %v7481_v14 = vld [vmem:[#allocation4 + $0x31c] sm:$0xf] }
 0x218   :  { %v7496_v7 = vld [vmem:[#allocation4 + $0x38c] sm:$0xf0] }
 0x21a   :  { %4422 = vmatpush.bf16.msra.mxu2 %v6729_v8  ;;  %4462 = vmatpush.bf16.msrb.mxu1 %v6613_v29 }
 0x21b   :  { %4450 = vmatpush.bf16.msrb.mxu0 %v6481_v38  ;;  %v7593_v38 = vld [vmem:[#allocation4 + $0x694] sm:$0xf0] }
 0x21e   :  { %4423 = vmatpush.bf16.msra.mxu2 %v6601_v23  ;;  %4463 = vmatpush.bf16.msrb.mxu1 %v6485_v43  ;;  %v7625_v23 = vld [vmem:[#allocation4 + $0x794] sm:$0xf0] }
 0x21f   :  { %4451 = vmatpush.bf16.msrb.mxu0 %v6353_v53  ;;  %v7009_v32 = vor.u32 %v7625_v23, %v7008_v22  ;;  %v6745_v53 = vor.u32 %v7560_v45, %v6744_v44  ;;  %v6368_v22 = vld [vmem:[#allocation4 + $0x218] sm:$0xf]  ;;  %v6106_v45 = vld [vmem:[#allocation4 + $0x90] sm:$0xf0] }
 0x220   :  { %v7465_v23 = vld [vmem:[#allocation4 + $0x294] sm:$0xf0] }
 0x222   :  { %4424 = vmatpush.bf16.msra.mxu2 %v6473_v35  ;;  %4464 = vmatpush.bf16.msrb.mxu1 %v6357_v58  ;;  %v7576_v35 = vld [vmem:[#allocation4 + $0x614] sm:$0xf] }
 0x223   :  { %v7512_v58 = vld [vmem:[#allocation4 + $0x414] sm:$0xf] }
 0x226   :  { %4425 = vmatpush.bf16.msra.mxu2 %v6345_v50  ;;  %4465 = vmatpush.bf16.msrb.mxu1 %v6229_v9  ;;  %v7561_v50 = vld [vmem:[#allocation4 + $0x594] sm:$0xf0] }
 0x22a   :  { %4426 = vmatpush.bf16.msra.mxu2 %v6217_v2  ;;  %v6626_v2 = vld [vmem:[#allocation4 + $0x498] sm:$0xf0] }
 0x22e   :  { %4427 = vmatpush.bf16.msra.mxu2 %v6089_v17 }
 0x287   :  { %v2664_v60 = vpop.xlane.xlu0 %2663 }
 0x288   :  { %v2665_v3 = vmul.f32 %v2664_v60, %v7821_v61  ;;  %v7510_v61 = vld [vmem:[#allocation4 + $0x404] sm:$0xf]  ;;  %v7431_v60 = vld [vmem:[#allocation4 + $0x184] sm:$0xf0] }
 0x289   :  { %v6605_v24 = vor.u32 %v7510_v61, %v6602_v18  ;;  %v6225_v5 = vor.u32 %v7431_v60, %v6224_v59  ;;  %v7000_v61 = vld [vmem:[#allocation4 + $0x710] sm:$0xf]  ;;  %v6618_v60 = vld [vmem:[#allocation4 + $0x490] sm:$0xf0] }
 0x28a   :  { %v7902_v12 = vadd.f32 1e-05, %v2665_v3  ;;  %v7624_v18 = vld [vmem:[#allocation4 + $0x78c] sm:$0xf0] }
 0x28b   :  { %4436 = vmatpush.bf16.msra.mxu3 %v6605_v24  ;;  %4452 = vmatpush.bf16.msrb.mxu0 %v6225_v5  ;;  %v6093_v24 = vor.u32 %v7382_v10, %v6090_v11  ;;  %v7001_v30 = vor.u32 %v7624_v18, %v7000_v61  ;;  %v6625_v5 = vor.u32 %v7529_v63, %v6624_v62  ;;  %v6490_v10 = vld [vmem:[#allocation4 + $0x390] sm:$0xf0]  ;;  %v6496_v11 = vld [vmem:[#allocation4 + $0x318] sm:$0xf]  ;;  %v6360_v61 = vld [vmem:[#allocation4 + $0x210] sm:$0xf] }
 0x28c   :  { %7648 = vrsqrt.f32 %v7902_v12  ;;  %vm2673_vm3 = vweird.f32 %v7902_v12  ;;  %v6497_v17 = vor.u32 %v7497_v13, %v6496_v11  ;;  %v7464_v18 = vld [vmem:[#allocation4 + $0x28c] sm:$0xf0]  ;;  %v7610_v62 = vld [vmem:[#allocation4 + $0x724] sm:$0xf]  ;;  %v6888_v11 = vld [vmem:[#allocation4 + $0x620] sm:$0xf] }
 0x28d   :  { %4472 = vmatpush.bf16.msrb.mxu2 %v7001_v30  ;;  %v6232_v30 = vld [vmem:[#allocation4 + $0x110] sm:$0xf]  ;;  %v7594_v13 = vld [vmem:[#allocation4 + $0x69c] sm:$0xf0] }
 0x28f   :  { %4437 = vmatpush.bf16.msra.mxu3 %v6477_v37  ;;  %v6880_v37 = vld [vmem:[#allocation4 + $0x618] sm:$0xf]  ;;  %4453 = vmatpush.bf16.msrb.mxu0 %v6097_v25  ;;  %v6370_v25 = vld [vmem:[#allocation4 + $0x298] sm:$0xf0] }
 0x290   :  { %v6881_v43 = vor.u32 %v7593_v38, %v6880_v37  ;;  %v7417_v38 = vld [vmem:[#allocation4 + $0x11c] sm:$0xf] }
 0x291   :  { %4473 = vmatpush.bf16.msrb.mxu2 %v6873_v41  ;;  %v6245_v40 = vor.u32 %v7417_v38, %v6242_v39  ;;  %v6104_v41 = vld [vmem:[#allocation4 + $0x10] sm:$0xf]  ;;  %v7514_v39 = vld [vmem:[#allocation4 + $0x424] sm:$0xf] }
 0x292   :  { %v7649_v36 = vpop.eup %7648 }
 0x293   :  { %v2668_v42 = vmul.f32 %v7649_v36, %v7902_v12  ;;  %vm2674_vm2 = vweird.f32 %v7649_v36  ;;  %4438 = vmatpush.bf16.msra.mxu3 %v6349_v52  ;;  %v7383_v12 = vld [vmem:[#allocation4 + $0xc] sm:$0xf]  ;;  %v6754_v52 = vld [vmem:[#allocation4 + $0x598] sm:$0xf0] }
 0x294   :  { %vm7907_vm4 = vmor %vm2673_vm3, %vm2674_vm2  ;;  %v6101_v29 = vor.u32 %v7383_v12, %v6098_v15  ;;  %v6757_v59 = vor.u32 %v7545_v51, %v6754_v52  ;;  %v6498_v12 = vld [vmem:[#allocation4 + $0x398] sm:$0xf0]  ;;  %v6489_v15 = vor.u32 %v7496_v7, %v6488_v6  ;;  %v7026_v6 = vld [vmem:[#allocation4 + $0x7a8] sm:$0xf0] }
 0x295   :  { %v2669_v49 = vmul.f32 %v7649_v36, %v2668_v42  ;;  %4474 = vmatpush.bf16.msrb.mxu2 %v6745_v53  ;;  %v6114_v51 = vld [vmem:[#allocation4 + $0x98] sm:$0xf0]  ;;  %v2695_v53 = vld [vmem:[%s8060_s4] sm:$0x3] }
 0x296   :  { %4466 = vmatpush.bf16.msrb.mxu1 %v6101_v29 }
 0x297   :  { %v2670_v57 = vmul.f32 0.5, %v2669_v49  ;;  %4439 = vmatpush.bf16.msra.mxu3 %v6221_v4  ;;  %v6752_v49 = vld [vmem:[#allocation4 + $0x518] sm:$0xf]  ;;  %v6621_v4 = vor.u32 %v7512_v58, %v6618_v60  ;;  %v7626_v60 = vld [vmem:[#allocation4 + $0x79c] sm:$0xf0] }
 0x298   :  { %v6753_v55 = vor.u32 %v7561_v50, %v6752_v49  ;;  %v7385_v50 = vld [vmem:[#allocation4 + $0x1c] sm:$0xf] }
 0x299   :  { %v2671_v1 = vsub.f32 1.5, %v2670_v57  ;;  %v7528_v57 = vld [vmem:[#allocation4 + $0x48c] sm:$0xf0]  ;;  %v6117_v52 = vor.u32 %v7385_v50, %v6114_v51  ;;  %v7482_v51 = vld [vmem:[#allocation4 + $0x324] sm:$0xf] }
 0x29a   :  { %v6617_v3 = vor.u32 %v7528_v57, %v6616_v56 }
 0x29b   :  { %v2672_v8 = vmul.f32 %v7649_v36, %v2671_v1  ;;  %4440 = vmatpush.bf16.msra.mxu3 %v6093_v24  ;;  %v7513_v1 = vld [vmem:[#allocation4 + $0x41c] sm:$0xf] }
 0x29c   :  { %v6629_v9 = vor.u32 %v7513_v1, %v6626_v2  ;;  %4475 = vmatpush.bf16.msrb.mxu2 %v6617_v3  ;;  %v7449_v24 = vld [vmem:[#allocation4 + $0x21c] sm:$0xf]  ;;  %v7018_v2 = vld [vmem:[#allocation4 + $0x7a0] sm:$0xf0]  ;;  %v7024_v3 = vld [vmem:[#allocation4 + $0x728] sm:$0xf] }
 0x29d   :  { %v2676_v16 = vsel %vm7907_vm4, %v7649_v36, %v2672_v8  ;;  %v6874_v36 = vld [vmem:[#allocation4 + $0x690] sm:$0xf0]  ;;  %v6373_v29 = vor.u32 %v7449_v24, %v6370_v25  ;;  %v6760_v24 = vld [vmem:[#allocation4 + $0x520] sm:$0xf] }
 0x29e   :  { %v2677_v20 = vmul.f32 %v2676_v16, %v7824_v0  ;;  %v7013_v0 = vor.u32 %v7609_v26, %v7010_v27  ;;  %v6877_v42 = vor.u32 %v7576_v35, %v6874_v36  ;;  %v7480_v8 = vld [vmem:[#allocation4 + $0x314] sm:$0xf]  ;;  %v6361_v26 = vor.u32 %v7464_v18, %v6360_v61  ;;  %v6240_v35 = vld [vmem:[#allocation4 + $0x118] sm:$0xf]  ;;  %v7562_v25 = vld [vmem:[#allocation4 + $0x59c] sm:$0xf0] }
 0x29f   :  { %4485 = vmatpush.bf16.msrb.mxu3 %v7005_v31  ;;  %v6493_v16 = vor.u32 %v7480_v8, %v6490_v10  ;;  %v6365_v27 = vor.u32 %v7448_v19, %v6362_v21  ;;  %v7432_v31 = vld [vmem:[#allocation4 + $0x18c] sm:$0xf0]  ;;  %v7021_v10 = vor.u32 %v7610_v62, %v7018_v2  ;;  %v7595_v19 = vld [vmem:[#allocation4 + $0x6a4] sm:$0xf0]  ;;  %v6898_v21 = vld [vmem:[#allocation4 + $0x6a8] sm:$0xf0] }
 0x2a0   :  { %v2678_v28 = vpack.c.bf16 %v2677_v20, %v2677_v20  ;;  %v6501_v20 = vor.u32 %v7481_v14, %v6498_v12  ;;  %4476 = vmatpush.bf16.msrb.mxu2 %v6489_v15  ;;  %v6233_v33 = vor.u32 %v7432_v31, %v6232_v30  ;;  %v7578_v15 = vld [vmem:[#allocation4 + $0x624] sm:$0xf]  ;;  %v6768_v30 = vld [vmem:[#allocation4 + $0x528] sm:$0xf] }
 0x2a1   :  { %v7563_v31 = vld [vmem:[#allocation4 + $0x5a4] sm:$0xf0]  ;;  %v6378_v2 = vld [vmem:[#allocation4 + $0x2a0] sm:$0xf0] }
 0x2a2   :  { %2789 = vmatmul.bf16.vlgmr.msra.gmra.mxu0 %v2678_v28  ;;  %2802 = vmatmul.bf16.vlgmr.msra.gmra.mxu1 %v2678_v28  ;;  %v6369_v28 = vor.u32 %v7465_v23, %v6368_v22  ;;  %v6889_v22 = vor.u32 %v7594_v13, %v6888_v11  ;;  %v7434_v11 = vld [vmem:[#allocation4 + $0x19c] sm:$0xf0] }
 0x2a3   :  { %4498 = vmatpush.bf16.msra.mxu0 %v7009_v32  ;;  %4511 = vmatpush.bf16.msra.mxu1 %v7013_v0  ;;  %v7416_v32 = vld [vmem:[#allocation4 + $0x114] sm:$0xf]  ;;  %v7433_v0 = vld [vmem:[#allocation4 + $0x194] sm:$0xf0] }
 0x2a4   :  { %4486 = vmatpush.bf16.msrb.mxu3 %v6877_v42  ;;  %4477 = vmatpush.bf16.msrb.mxu2 %v6361_v26  ;;  %v6237_v36 = vor.u32 %v7416_v32, %v6234_v34  ;;  %v6241_v37 = vor.u32 %v7433_v0, %v6240_v35  ;;  %v7400_v42 = vld [vmem:[#allocation4 + $0x8c] sm:$0xf0]  ;;  %v7547_v32 = vld [vmem:[#allocation4 + $0x52c] sm:$0xf]  ;;  %v6761_v34 = vor.u32 %v7562_v25, %v6760_v24  ;;  %v6632_v0 = vld [vmem:[#allocation4 + $0x420] sm:$0xf] }
 0x2a5   :  { %v6105_v44 = vor.u32 %v7400_v42, %v6104_v41  ;;  %v6640_v41 = vld [vmem:[#allocation4 + $0x428] sm:$0xf]  ;;  %v6122_v24 = vld [vmem:[#allocation4 + $0xa0] sm:$0xf0] }
 0x2a6   :  { %v7531_v42 = vld [vmem:[#allocation4 + $0x4a4] sm:$0xf0] }
 0x2a7   :  { %4499 = vmatpush.bf16.msra.mxu0 %v6881_v43  ;;  %4512 = vmatpush.bf16.msra.mxu1 %v6885_v47  ;;  %v7384_v43 = vld [vmem:[#allocation4 + $0x14] sm:$0xf]  ;;  %v7401_v47 = vld [vmem:[#allocation4 + $0x94] sm:$0xf0] }
 0x2a8   :  { %4487 = vmatpush.bf16.msrb.mxu3 %v6749_v54  ;;  %4478 = vmatpush.bf16.msrb.mxu2 %v6233_v33  ;;  %v6109_v48 = vor.u32 %v7384_v43, %v6106_v45  ;;  %v6113_v49 = vor.u32 %v7401_v47, %v6112_v46  ;;  %v2698_v54 = vperm.slane %v2695_v53, 1  ;;  %v6770_v33 = vld [vmem:[#allocation4 + $0x5a8] sm:$0xf0]  ;;  %v6504_v47 = vld [vmem:[#allocation4 + $0x320] sm:$0xf] }
 0x2a9   :  { %v6773_v38 = vor.u32 %v7547_v32, %v6770_v33  ;;  %v7515_v43 = vld [vmem:[#allocation4 + $0x42c] sm:$0xf]  ;;  %v7628_v32 = vld [vmem:[#allocation4 + $0x7ac] sm:$0xf0]  ;;  %v7612_v33 = vld [vmem:[#allocation4 + $0x734] sm:$0xf] }
 0x2ab   :  { %4500 = vmatpush.bf16.msra.mxu0 %v6753_v55  ;;  %4513 = vmatpush.bf16.msra.mxu1 %v6757_v59  ;;  %v2697_v55 = vperm.slane %v2695_v53, 0  ;;  %v7016_v59 = vld [vmem:[#allocation4 + $0x720] sm:$0xf]  ;;  %v6512_v53 = vld [vmem:[#allocation4 + $0x328] sm:$0xf] }
 0x2ac   :  { %4488 = vmatpush.bf16.msrb.mxu3 %v6621_v4  ;;  %4479 = vmatpush.bf16.msrb.mxu2 %v6105_v44  ;;  %v7627_v4 = vld [vmem:[#allocation4 + $0x7a4] sm:$0xf0]  ;;  %v6642_v44 = vld [vmem:[#allocation4 + $0x4a8] sm:$0xf0] }
 0x2ad   :  { %v7025_v14 = vor.u32 %v7627_v4, %v7024_v3  ;;  %v6645_v50 = vor.u32 %v7515_v43, %v6642_v44  ;;  %v6384_v3 = vld [vmem:[#allocation4 + $0x228] sm:$0xf]  ;;  %v6904_v44 = vld [vmem:[#allocation4 + $0x630] sm:$0xf] }
 0x2ae   :  { %v7467_v4 = vld [vmem:[#allocation4 + $0x2a4] sm:$0xf0] }
 0x2af   :  { %4501 = vmatpush.bf16.msra.mxu0 %v6625_v5  ;;  %4514 = vmatpush.bf16.msra.mxu1 %v6629_v9  ;;  %v7611_v5 = vld [vmem:[#allocation4 + $0x72c] sm:$0xf]  ;;  %v7017_v9 = vor.u32 %v7626_v60, %v7016_v59  ;;  %v6376_v59 = vld [vmem:[#allocation4 + $0x220] sm:$0xf]  ;;  %v6385_v13 = vor.u32 %v7467_v4, %v6384_v3  ;;  %v6786_v3 = vld [vmem:[#allocation4 + $0x5b8] sm:$0xf0] }
 0x2b0   :  { %4489 = vmatpush.bf16.msrb.mxu3 %v6493_v16  ;;  %v7029_v12 = vor.u32 %v7611_v5, %v7026_v6  ;;  %v6890_v16 = vld [vmem:[#allocation4 + $0x6a0] sm:$0xf0]  ;;  %v7466_v60 = vld [vmem:[#allocation4 + $0x29c] sm:$0xf0]  ;;  %v7451_v5 = vld [vmem:[#allocation4 + $0x22c] sm:$0xf] }
 0x2b1   :  { %v6893_v23 = vor.u32 %v7578_v15, %v6890_v16  ;;  %v6386_v6 = vld [vmem:[#allocation4 + $0x2a8] sm:$0xf0]  ;;  %v6250_v15 = vld [vmem:[#allocation4 + $0x1a0] sm:$0xf0]  ;;  %v6256_v16 = vld [vmem:[#allocation4 + $0x128] sm:$0xf] }
 0x2b3   :  { %4502 = vmatpush.bf16.msra.mxu0 %v6497_v17  ;;  %4515 = vmatpush.bf16.msra.mxu1 %v6501_v20  ;;  %v6896_v17 = vld [vmem:[#allocation4 + $0x628] sm:$0xf]  ;;  %v7579_v20 = vld [vmem:[#allocation4 + $0x62c] sm:$0xf] }
 0x2b4   :  { %4490 = vmatpush.bf16.msrb.mxu3 %v6365_v27  ;;  %v6897_v26 = vor.u32 %v7595_v19, %v6896_v17  ;;  %v6901_v27 = vor.u32 %v7579_v20, %v6898_v21  ;;  %v7435_v17 = vld [vmem:[#allocation4 + $0x1a4] sm:$0xf0]  ;;  %v6120_v19 = vld [vmem:[#allocation4 + $0x20] sm:$0xf] }
 0x2b5   :  { %v6257_v25 = vor.u32 %v7435_v17, %v6256_v16  ;;  %v6658_v16 = vld [vmem:[#allocation4 + $0x4b8] sm:$0xf0] }
 0x2b7   :  { %4503 = vmatpush.bf16.msra.mxu0 %v6369_v28  ;;  %4516 = vmatpush.bf16.msra.mxu1 %v6373_v29  ;;  %v7546_v28 = vld [vmem:[#allocation4 + $0x524] sm:$0xf] }
 0x2b8   :  { %4491 = vmatpush.bf16.msrb.mxu3 %v6237_v36  ;;  %v6762_v29 = vld [vmem:[#allocation4 + $0x5a0] sm:$0xf0]  ;;  %v7530_v36 = vld [vmem:[#allocation4 + $0x49c] sm:$0xf0] }
 0x2b9   :  { %v6765_v35 = vor.u32 %v7546_v28, %v6762_v29  ;;  %v6633_v45 = vor.u32 %v7530_v36, %v6632_v0  ;;  %v7403_v28 = vld [vmem:[#allocation4 + $0xa4] sm:$0xf0]  ;;  %v7387_v29 = vld [vmem:[#allocation4 + $0x2c] sm:$0xf] }
 0x2bb   :  { %4504 = vmatpush.bf16.msra.mxu0 %v6241_v37  ;;  %4517 = vmatpush.bf16.msra.mxu1 %v6245_v40  ;;  %v6769_v37 = vor.u32 %v7563_v31, %v6768_v30  ;;  %v6634_v40 = vld [vmem:[#allocation4 + $0x4a0] sm:$0xf0]  ;;  %v6130_v30 = vld [vmem:[#allocation4 + $0xa8] sm:$0xf0]  ;;  %v7032_v31 = vld [vmem:[#allocation4 + $0x730] sm:$0xf] }
 0x2bc   :  { %4492 = vmatpush.bf16.msrb.mxu3 %v6109_v48  ;;  %v6637_v46 = vor.u32 %v7514_v39, %v6634_v40  ;;  %v7498_v48 = vld [vmem:[#allocation4 + $0x39c] sm:$0xf0]  ;;  %v7042_v39 = vld [vmem:[#allocation4 + $0x7b8] sm:$0xf0] }
 0x2bf   :  { %4505 = vmatpush.bf16.msra.mxu0 %v6113_v49  ;;  %4518 = vmatpush.bf16.msra.mxu1 %v6117_v52  ;;  %v6641_v49 = vor.u32 %v7531_v42, %v6640_v41  ;;  %v6506_v52 = vld [vmem:[#allocation4 + $0x3a0] sm:$0xf0]  ;;  %v6133_v41 = vor.u32 %v7387_v29, %v6130_v30  ;;  %v7033_v42 = vor.u32 %v7628_v32, %v7032_v31  ;;  %v6392_v30 = vld [vmem:[#allocation4 + $0x230] sm:$0xf] }
 0x2c0   :  { %v7468_v31 = vld [vmem:[#allocation4 + $0x2ac] sm:$0xf0] }
 0x31f   :  { %v2790_v56 = vpop.f32.mrf.mxu0  ;;  %v2803_v57 = vpop.f32.mrf.mxu1 }
 0x320   :  { %v2804_v58 = vadd.f32 %v2803_v57, %v2698_v54  ;;  %v2791_v63 = vadd.f32 %v2790_v56, %v2697_v55  ;;  %v7499_v54 = vld [vmem:[#allocation4 + $0x3a4] sm:$0xf0]  ;;  %v7483_v55 = vld [vmem:[#allocation4 + $0x32c] sm:$0xf]  ;;  %v6505_v57 = vor.u32 %v7498_v48, %v6504_v47  ;;  %v7580_v48 = vld [vmem:[#allocation4 + $0x634] sm:$0xf] }
 0x321   :  { %v6514_v56 = vld [vmem:[#allocation4 + $0x3a8] sm:$0xf0]  ;;  %v6513_v62 = vor.u32 %v7499_v54, %v6512_v53  ;;  %v6914_v53 = vld [vmem:[#allocation4 + $0x6b8] sm:$0xf0] }
 0x322   :  { %v2808_v1 = vrot.slane %v2804_v58, 6  ;;  %v6509_v58 = vor.u32 %v7482_v51, %v6506_v52  ;;  %v7597_v51 = vld [vmem:[#allocation4 + $0x6b4] sm:$0xf0]  ;;  %v7581_v52 = vld [vmem:[#allocation4 + $0x63c] sm:$0xf] }
 0x324   :  { %v2810_v7 = vsel %vm2648_vm0, %v2791_v63, %v2808_v1  ;;  %v6517_v63 = vor.u32 %v7483_v55, %v6514_v56  ;;  %v7450_v1 = vld [vmem:[#allocation4 + $0x224] sm:$0xf]  ;;  %v6776_v56 = vld [vmem:[#allocation4 + $0x530] sm:$0xf] }
 0x325   :  { %v7918_v8 = vpack.c.bf16 %v2810_v7, %v2810_v7  ;;  %v6377_v7 = vor.u32 %v7466_v60, %v6376_v59  ;;  %v6917_v59 = vor.u32 %v7581_v52, %v6914_v53  ;;  %v7548_v60 = vld [vmem:[#allocation4 + $0x534] sm:$0xf] }
 0x327   :  { %v2792_v61 = vpop.f32.mrf.mxu0  ;;  %v2805_v18 = vpop.f32.mrf.mxu1  ;;  %4428 = vmatmul.bf16.vlgmr.msra.gmra.mxu2 %v7918_v8  ;;  %4441 = vmatmul.bf16.vlgmr.msra.gmra.mxu3 %v7918_v8 }
 0x328   :  { %4454 = vmatmul.bf16.vlgmr.msrb.gmra.mxu0 %v7918_v8  ;;  %4467 = vmatmul.bf16.vlgmr.msrb.gmra.mxu1 %v7918_v8  ;;  %v7419_v61 = vld [vmem:[#allocation4 + $0x12c] sm:$0xf] }
 0x329   :  { %4524 = vmatpush.bf16.msra.mxu2 %v7017_v9  ;;  %4537 = vmatpush.bf16.msra.mxu3 %v7021_v10  ;;  %v6381_v9 = vor.u32 %v7450_v1, %v6378_v2  ;;  %v6248_v10 = vld [vmem:[#allocation4 + $0x120] sm:$0xf]  ;;  %v6258_v18 = vld [vmem:[#allocation4 + $0x1a8] sm:$0xf0]  ;;  %v7565_v1 = vld [vmem:[#allocation4 + $0x5b4] sm:$0xf0] }
 0x32a   :  { %4550 = vmatpush.bf16.msrb.mxu0 %v7025_v14  ;;  %4563 = vmatpush.bf16.msrb.mxu1 %v7029_v12  ;;  %v6389_v14 = vor.u32 %v7451_v5, %v6386_v6  ;;  %v7418_v12 = vld [vmem:[#allocation4 + $0x124] sm:$0xf]  ;;  %v6249_v20 = vor.u32 %v7434_v11, %v6248_v10  ;;  %v7549_v2 = vld [vmem:[#allocation4 + $0x53c] sm:$0xf]  ;;  %v6648_v6 = vld [vmem:[#allocation4 + $0x430] sm:$0xf] }
 0x32b   :  { %v6253_v21 = vor.u32 %v7418_v12, %v6250_v15  ;;  %v6789_v10 = vor.u32 %v7549_v2, %v6786_v3  ;;  %v7516_v11 = vld [vmem:[#allocation4 + $0x434] sm:$0xf]  ;;  %v7533_v12 = vld [vmem:[#allocation4 + $0x4b4] sm:$0xf0]  ;;  %v7517_v15 = vld [vmem:[#allocation4 + $0x43c] sm:$0xf] }
 0x32c   :  { %v7630_v2 = vld [vmem:[#allocation4 + $0x7bc] sm:$0xf0]  ;;  %v7614_v3 = vld [vmem:[#allocation4 + $0x744] sm:$0xf] }
 0x32d   :  { %4525 = vmatpush.bf16.msra.mxu2 %v6889_v22  ;;  %4538 = vmatpush.bf16.msra.mxu3 %v6893_v23  ;;  %v7402_v22 = vld [vmem:[#allocation4 + $0x9c] sm:$0xf0]  ;;  %v7386_v23 = vld [vmem:[#allocation4 + $0x24] sm:$0xf] }
 0x32e   :  { %4551 = vmatpush.bf16.msrb.mxu0 %v6897_v26  ;;  %4564 = vmatpush.bf16.msrb.mxu1 %v6901_v27  ;;  %v6261_v26 = vor.u32 %v7419_v61, %v6258_v18  ;;  %v6128_v27 = vld [vmem:[#allocation4 + $0x28] sm:$0xf]  ;;  %v6121_v0 = vor.u32 %v7402_v22, %v6120_v19  ;;  %v6125_v36 = vor.u32 %v7386_v23, %v6122_v24  ;;  %v6520_v18 = vld [vmem:[#allocation4 + $0x330] sm:$0xf]  ;;  %v7484_v22 = vld [vmem:[#allocation4 + $0x334] sm:$0xf] }
 0x32f   :  { %v6129_v40 = vor.u32 %v7403_v28, %v6128_v27  ;;  %v7500_v19 = vld [vmem:[#allocation4 + $0x3ac] sm:$0xf0]  ;;  %v6522_v23 = vld [vmem:[#allocation4 + $0x3b0] sm:$0xf0]  ;;  %v6528_v24 = vld [vmem:[#allocation4 + $0x338] sm:$0xf] }
 0x330   :  { %v6530_v27 = vld [vmem:[#allocation4 + $0x3b8] sm:$0xf0]  ;;  %v6521_v28 = vor.u32 %v7500_v19, %v6520_v18  ;;  %v6525_v29 = vor.u32 %v7484_v22, %v6522_v23  ;;  %v7582_v19 = vld [vmem:[#allocation4 + $0x644] sm:$0xf]  ;;  %v7599_v22 = vld [vmem:[#allocation4 + $0x6c4] sm:$0xf0] }
 0x331   :  { %4526 = vmatpush.bf16.msra.mxu2 %v6761_v34  ;;  %4539 = vmatpush.bf16.msra.mxu3 %v6765_v35  ;;  %v7034_v34 = vld [vmem:[#allocation4 + $0x7b0] sm:$0xf0]  ;;  %v7040_v35 = vld [vmem:[#allocation4 + $0x738] sm:$0xf]  ;;  %v7583_v23 = vld [vmem:[#allocation4 + $0x64c] sm:$0xf] }
 0x332   :  { %4552 = vmatpush.bf16.msrb.mxu0 %v6769_v37  ;;  %4565 = vmatpush.bf16.msrb.mxu1 %v6773_v38  ;;  %v7629_v37 = vld [vmem:[#allocation4 + $0x7b4] sm:$0xf0]  ;;  %v7613_v38 = vld [vmem:[#allocation4 + $0x73c] sm:$0xf]  ;;  %v7037_v43 = vor.u32 %v7612_v33, %v7034_v34  ;;  %v7452_v34 = vld [vmem:[#allocation4 + $0x234] sm:$0xf] }
 0x333   :  { %v7045_v47 = vor.u32 %v7613_v38, %v7042_v39  ;;  %v6402_v38 = vld [vmem:[#allocation4 + $0x2b8] sm:$0xf0]  ;;  %v6393_v39 = vor.u32 %v7468_v31, %v6392_v30  ;;  %v7550_v31 = vld [vmem:[#allocation4 + $0x544] sm:$0xf] }
 0x335   :  { %4527 = vmatpush.bf16.msra.mxu2 %v6633_v45  ;;  %4540 = vmatpush.bf16.msra.mxu3 %v6637_v46  ;;  %v7596_v45 = vld [vmem:[#allocation4 + $0x6ac] sm:$0xf0]  ;;  %v7041_v46 = vor.u32 %v7629_v37, %v7040_v35  ;;  %v6394_v35 = vld [vmem:[#allocation4 + $0x2b0] sm:$0xf0]  ;;  %v7453_v37 = vld [vmem:[#allocation4 + $0x23c] sm:$0xf] }
 0x336   :  { %4553 = vmatpush.bf16.msrb.mxu0 %v6641_v49  ;;  %4566 = vmatpush.bf16.msrb.mxu1 %v6645_v50  ;;  %v6906_v49 = vld [vmem:[#allocation4 + $0x6b0] sm:$0xf0]  ;;  %v6912_v50 = vld [vmem:[#allocation4 + $0x638] sm:$0xf]  ;;  %v6905_v54 = vor.u32 %v7596_v45, %v6904_v44  ;;  %v6405_v44 = vor.u32 %v7453_v37, %v6402_v38  ;;  %v6664_v38 = vld [vmem:[#allocation4 + $0x440] sm:$0xf] }
 0x337   :  { %4480 = vmatmul.bf16.vlgmr.msrb.gmra.mxu2 %v7918_v8  ;;  %4493 = vmatmul.bf16.vlgmr.msrb.gmra.mxu3 %v7918_v8  ;;  %v6909_v55 = vor.u32 %v7580_v48, %v6906_v49  ;;  %v7420_v45 = vld [vmem:[#allocation4 + $0x134] sm:$0xf]  ;;  %v7437_v48 = vld [vmem:[#allocation4 + $0x1b4] sm:$0xf0]  ;;  %v7421_v49 = vld [vmem:[#allocation4 + $0x13c] sm:$0xf] }
 0x338   :  { %4506 = vmatmul.bf16.vlgmr.msra.gmra.mxu0 %v7918_v8  ;;  %4519 = vmatmul.bf16.vlgmr.msra.gmra.mxu1 %v7918_v8 }
 0x339   :  { %4528 = vmatpush.bf16.msra.mxu2 %v6505_v57  ;;  %4541 = vmatpush.bf16.msra.mxu3 %v6509_v58  ;;  %v7564_v57 = vld [vmem:[#allocation4 + $0x5ac] sm:$0xf0]  ;;  %v6913_v58 = vor.u32 %v7597_v51, %v6912_v50  ;;  %v6274_v50 = vld [vmem:[#allocation4 + $0x1b8] sm:$0xf0] }
 0x33a   :  { %4554 = vmatpush.bf16.msrb.mxu0 %v6513_v62  ;;  %4567 = vmatpush.bf16.msrb.mxu1 %v6517_v63  ;;  %v6778_v62 = vld [vmem:[#allocation4 + $0x5b0] sm:$0xf0]  ;;  %v6784_v63 = vld [vmem:[#allocation4 + $0x538] sm:$0xf]  ;;  %v6777_v4 = vor.u32 %v7564_v57, %v6776_v56  ;;  %v6136_v51 = vld [vmem:[#allocation4 + $0x30] sm:$0xf] }
 0x33b   :  { %v6781_v5 = vor.u32 %v7548_v60, %v6778_v62  ;;  %v6138_v56 = vld [vmem:[#allocation4 + $0xb0] sm:$0xf0]  ;;  %v7405_v60 = vld [vmem:[#allocation4 + $0xb4] sm:$0xf0]  ;;  %v7389_v62 = vld [vmem:[#allocation4 + $0x3c] sm:$0xf] }
 0x33d   :  { %4529 = vmatpush.bf16.msra.mxu2 %v6377_v7  ;;  %4542 = vmatpush.bf16.msra.mxu3 %v6381_v9  ;;  %v7532_v7 = vld [vmem:[#allocation4 + $0x4ac] sm:$0xf0]  ;;  %v6785_v9 = vor.u32 %v7565_v1, %v6784_v63  ;;  %v6146_v63 = vld [vmem:[#allocation4 + $0xb8] sm:$0xf0]  ;;  %v7048_v1 = vld [vmem:[#allocation4 + $0x740] sm:$0xf] }
 0x33e   :  { %4555 = vmatpush.bf16.msrb.mxu0 %v6385_v13  ;;  %4568 = vmatpush.bf16.msrb.mxu1 %v6389_v14  ;;  %v6650_v13 = vld [vmem:[#allocation4 + $0x4b0] sm:$0xf0]  ;;  %v6656_v14 = vld [vmem:[#allocation4 + $0x438] sm:$0xf]  ;;  %v6649_v17 = vor.u32 %v7532_v7, %v6648_v6 }
 0x33f   :  { %v6653_v61 = vor.u32 %v7516_v11, %v6650_v13  ;;  %v7058_v11 = vld [vmem:[#allocation4 + $0x7c8] sm:$0xf0] }
 0x341   :  { %4530 = vmatpush.bf16.msra.mxu2 %v6249_v20  ;;  %4543 = vmatpush.bf16.msra.mxu3 %v6253_v21  ;;  %v6657_v20 = vor.u32 %v7533_v12, %v6656_v14  ;;  %v6661_v21 = vor.u32 %v7517_v15, %v6658_v16  ;;  %v6149_v14 = vor.u32 %v7389_v62, %v6146_v63  ;;  %v6920_v16 = vld [vmem:[#allocation4 + $0x640] sm:$0xf] }
 0x342   :  { %4556 = vmatpush.bf16.msrb.mxu0 %v6257_v25  ;;  %4569 = vmatpush.bf16.msrb.mxu1 %v6261_v26  ;;  %v7501_v25 = vld [vmem:[#allocation4 + $0x3b4] sm:$0xf0]  ;;  %v7485_v26 = vld [vmem:[#allocation4 + $0x33c] sm:$0xf]  ;;  %v7049_v12 = vor.u32 %v7630_v2, %v7048_v1  ;;  %v6408_v63 = vld [vmem:[#allocation4 + $0x240] sm:$0xf] }
 0x343   :  { %v6529_v32 = vor.u32 %v7501_v25, %v6528_v24  ;;  %v6533_v33 = vor.u32 %v7485_v26, %v6530_v27  ;;  %v6930_v24 = vld [vmem:[#allocation4 + $0x6c8] sm:$0xf0]  ;;  %v6792_v27 = vld [vmem:[#allocation4 + $0x540] sm:$0xf] }
 0x344   :  { %v6933_v30 = vor.u32 %v7583_v23, %v6930_v24  ;;  %v7470_v1 = vld [vmem:[#allocation4 + $0x2bc] sm:$0xf0] }
 0x345   :  { %4531 = vmatpush.bf16.msra.mxu2 %v6121_v0  ;;  %4544 = vmatpush.bf16.msra.mxu3 %v6125_v36  ;;  %v6400_v0 = vld [vmem:[#allocation4 + $0x238] sm:$0xf] }
 0x346   :  { %4557 = vmatpush.bf16.msrb.mxu0 %v6129_v40  ;;  %4570 = vmatpush.bf16.msrb.mxu1 %v6133_v41  ;;  %v7469_v36 = vld [vmem:[#allocation4 + $0x2b4] sm:$0xf0]  ;;  %v6397_v40 = vor.u32 %v7452_v34, %v6394_v35  ;;  %v6264_v41 = vld [vmem:[#allocation4 + $0x130] sm:$0xf]  ;;  %v7567_v34 = vld [vmem:[#allocation4 + $0x5c4] sm:$0xf0] }
 0x347   :  { %v7551_v35 = vld [vmem:[#allocation4 + $0x54c] sm:$0xf] }
 0x348   :  { %4532 = vmatmul.bf16.vlgmr.msra.gmra.mxu2 %v7918_v8  ;;  %4545 = vmatmul.bf16.vlgmr.msra.gmra.mxu3 %v7918_v8 }
 0x349   :  { %4576 = vmatpush.bf16.msrb.mxu2 %v7033_v42  ;;  %4589 = vmatpush.bf16.msrb.mxu3 %v7037_v43  ;;  %v7436_v42 = vld [vmem:[#allocation4 + $0x1ac] sm:$0xf0]  ;;  %v6401_v43 = vor.u32 %v7469_v36, %v6400_v0  ;;  %v6802_v0 = vld [vmem:[#allocation4 + $0x5c8] sm:$0xf0] }
 0x34a   :  { %4602 = vmatpush.bf16.msra.mxu0 %v7041_v46  ;;  %4615 = vmatpush.bf16.msra.mxu1 %v7045_v47  ;;  %v6266_v46 = vld [vmem:[#allocation4 + $0x1b0] sm:$0xf0]  ;;  %v6272_v47 = vld [vmem:[#allocation4 + $0x138] sm:$0xf]  ;;  %v6265_v52 = vor.u32 %v7436_v42, %v6264_v41  ;;  %v6805_v41 = vor.u32 %v7551_v35, %v6802_v0  ;;  %v7518_v42 = vld [vmem:[#allocation4 + $0x444] sm:$0xf] }
 0x34b   :  { %4558 = vmatmul.bf16.vlgmr.msrb.gmra.mxu0 %v7918_v8  ;;  %4571 = vmatmul.bf16.vlgmr.msrb.gmra.mxu1 %v7918_v8  ;;  %v6269_v53 = vor.u32 %v7420_v45, %v6266_v46  ;;  %v6273_v57 = vor.u32 %v7437_v48, %v6272_v47  ;;  %v7535_v45 = vld [vmem:[#allocation4 + $0x4c4] sm:$0xf0]  ;;  %v7519_v46 = vld [vmem:[#allocation4 + $0x44c] sm:$0xf]  ;;  %v7632_v35 = vld [vmem:[#allocation4 + $0x7cc] sm:$0xf0] }
 0x34c   :  { %v6674_v47 = vld [vmem:[#allocation4 + $0x4c8] sm:$0xf0]  ;;  %v7616_v0 = vld [vmem:[#allocation4 + $0x754] sm:$0xf] }
 0x34d   :  { %4577 = vmatpush.bf16.msrb.mxu2 %v6905_v54  ;;  %4590 = vmatpush.bf16.msrb.mxu3 %v6909_v55  ;;  %v7404_v54 = vld [vmem:[#allocation4 + $0xac] sm:$0xf0]  ;;  %v7388_v55 = vld [vmem:[#allocation4 + $0x34] sm:$0xf] }
 0x34e   :  { %4603 = vmatpush.bf16.msra.mxu0 %v6913_v58  ;;  %4616 = vmatpush.bf16.msra.mxu1 %v6917_v59  ;;  %v6277_v58 = vor.u32 %v7421_v49, %v6274_v50  ;;  %v6144_v59 = vld [vmem:[#allocation4 + $0x38] sm:$0xf]  ;;  %v6137_v6 = vor.u32 %v7404_v54, %v6136_v51  ;;  %v6141_v7 = vor.u32 %v7388_v55, %v6138_v56  ;;  %v6536_v50 = vld [vmem:[#allocation4 + $0x340] sm:$0xf]  ;;  %v7486_v54 = vld [vmem:[#allocation4 + $0x344] sm:$0xf] }
 0x34f   :  { %v6145_v13 = vor.u32 %v7405_v60, %v6144_v59  ;;  %v7502_v51 = vld [vmem:[#allocation4 + $0x3bc] sm:$0xf0]  ;;  %v6538_v55 = vld [vmem:[#allocation4 + $0x3c0] sm:$0xf0]  ;;  %v6544_v56 = vld [vmem:[#allocation4 + $0x348] sm:$0xf] }
 0x350   :  { %v6546_v59 = vld [vmem:[#allocation4 + $0x3c8] sm:$0xf0]  ;;  %v6537_v60 = vor.u32 %v7502_v51, %v6536_v50  ;;  %v6541_v62 = vor.u32 %v7486_v54, %v6538_v55  ;;  %v7584_v51 = vld [vmem:[#allocation4 + $0x654] sm:$0xf]  ;;  %v7601_v54 = vld [vmem:[#allocation4 + $0x6d4] sm:$0xf0] }
 0x351   :  { %4578 = vmatpush.bf16.msrb.mxu2 %v6777_v4  ;;  %4591 = vmatpush.bf16.msrb.mxu3 %v6781_v5  ;;  %v7050_v4 = vld [vmem:[#allocation4 + $0x7c0] sm:$0xf0]  ;;  %v7056_v5 = vld [vmem:[#allocation4 + $0x748] sm:$0xf]  ;;  %v7585_v55 = vld [vmem:[#allocation4 + $0x65c] sm:$0xf] }
 0x352   :  { %4604 = vmatpush.bf16.msra.mxu0 %v6785_v9  ;;  %4617 = vmatpush.bf16.msra.mxu1 %v6789_v10  ;;  %v7631_v9 = vld [vmem:[#allocation4 + $0x7c4] sm:$0xf0]  ;;  %v7615_v10 = vld [vmem:[#allocation4 + $0x74c] sm:$0xf]  ;;  %v7053_v15 = vor.u32 %v7614_v3, %v7050_v4  ;;  %v7454_v4 = vld [vmem:[#allocation4 + $0x244] sm:$0xf] }
 0x353   :  { %v7061_v18 = vor.u32 %v7615_v10, %v7058_v11  ;;  %v6418_v10 = vld [vmem:[#allocation4 + $0x2c8] sm:$0xf0]  ;;  %v6409_v11 = vor.u32 %v7470_v1, %v6408_v63  ;;  %v7552_v1 = vld [vmem:[#allocation4 + $0x554] sm:$0xf] }
 0x355   :  { %4579 = vmatpush.bf16.msrb.mxu2 %v6649_v17  ;;  %4592 = vmatpush.bf16.msrb.mxu3 %v6653_v61  ;;  %v7598_v17 = vld [vmem:[#allocation4 + $0x6bc] sm:$0xf0]  ;;  %v7057_v61 = vor.u32 %v7631_v9, %v7056_v5  ;;  %v6410_v5 = vld [vmem:[#allocation4 + $0x2c0] sm:$0xf0]  ;;  %v7455_v9 = vld [vmem:[#allocation4 + $0x24c] sm:$0xf] }
 0x356   :  { %4605 = vmatpush.bf16.msra.mxu0 %v6657_v20  ;;  %4618 = vmatpush.bf16.msra.mxu1 %v6661_v21  ;;  %v6922_v20 = vld [vmem:[#allocation4 + $0x6c0] sm:$0xf0]  ;;  %v6928_v21 = vld [vmem:[#allocation4 + $0x648] sm:$0xf]  ;;  %v6921_v25 = vor.u32 %v7598_v17, %v6920_v16  ;;  %v6421_v16 = vor.u32 %v7455_v9, %v6418_v10  ;;  %v6680_v10 = vld [vmem:[#allocation4 + $0x450] sm:$0xf] }
 0x357   :  { %v6925_v26 = vor.u32 %v7582_v19, %v6922_v20  ;;  %v7422_v17 = vld [vmem:[#allocation4 + $0x144] sm:$0xf]  ;;  %v7439_v19 = vld [vmem:[#allocation4 + $0x1c4] sm:$0xf0]  ;;  %v7423_v20 = vld [vmem:[#allocation4 + $0x14c] sm:$0xf] }
 0x359   :  { %4580 = vmatpush.bf16.msrb.mxu2 %v6521_v28  ;;  %4593 = vmatpush.bf16.msrb.mxu3 %v6525_v29  ;;  %v7566_v28 = vld [vmem:[#allocation4 + $0x5bc] sm:$0xf0]  ;;  %v6929_v29 = vor.u32 %v7599_v22, %v6928_v21  ;;  %v6290_v21 = vld [vmem:[#allocation4 + $0x1c8] sm:$0xf0] }
 0x35a   :  { %4606 = vmatpush.bf16.msra.mxu0 %v6529_v32  ;;  %4619 = vmatpush.bf16.msra.mxu1 %v6533_v33  ;;  %v6794_v32 = vld [vmem:[#allocation4 + $0x5c0] sm:$0xf0]  ;;  %v6800_v33 = vld [vmem:[#allocation4 + $0x548] sm:$0xf]  ;;  %v6793_v36 = vor.u32 %v7566_v28, %v6792_v27  ;;  %v6152_v22 = vld [vmem:[#allocation4 + $0x40] sm:$0xf] }
 0x35b   :  { %v6797_v37 = vor.u32 %v7550_v31, %v6794_v32  ;;  %v6154_v27 = vld [vmem:[#allocation4 + $0xc0] sm:$0xf0]  ;;  %v7407_v31 = vld [vmem:[#allocation4 + $0xc4] sm:$0xf0]  ;;  %v7391_v32 = vld [vmem:[#allocation4 + $0x4c] sm:$0xf] }
 0x35d   :  { %4581 = vmatpush.bf16.msrb.mxu2 %v6393_v39  ;;  %4594 = vmatpush.bf16.msrb.mxu3 %v6397_v40  ;;  %v7534_v39 = vld [vmem:[#allocation4 + $0x4bc] sm:$0xf0]  ;;  %v6801_v40 = vor.u32 %v7567_v34, %v6800_v33  ;;  %v6162_v33 = vld [vmem:[#allocation4 + $0xc8] sm:$0xf0]  ;;  %v7064_v34 = vld [vmem:[#allocation4 + $0x750] sm:$0xf] }
 0x35e   :  { %4607 = vmatpush.bf16.msra.mxu0 %v6401_v43  ;;  %4620 = vmatpush.bf16.msra.mxu1 %v6405_v44  ;;  %v6666_v43 = vld [vmem:[#allocation4 + $0x4c0] sm:$0xf0]  ;;  %v6672_v44 = vld [vmem:[#allocation4 + $0x448] sm:$0xf]  ;;  %v6665_v48 = vor.u32 %v7534_v39, %v6664_v38 }
 0x35f   :  { %v6669_v49 = vor.u32 %v7518_v42, %v6666_v43  ;;  %v7074_v42 = vld [vmem:[#allocation4 + $0x7d8] sm:$0xf0] }
 0x361   :  { %4582 = vmatpush.bf16.msrb.mxu2 %v6265_v52  ;;  %4595 = vmatpush.bf16.msrb.mxu3 %v6269_v53  ;;  %v6673_v52 = vor.u32 %v7535_v45, %v6672_v44  ;;  %v6677_v53 = vor.u32 %v7519_v46, %v6674_v47  ;;  %v6165_v44 = vor.u32 %v7391_v32, %v6162_v33  ;;  %v6936_v47 = vld [vmem:[#allocation4 + $0x650] sm:$0xf] }
 0x362   :  { %4608 = vmatpush.bf16.msra.mxu0 %v6273_v57  ;;  %4621 = vmatpush.bf16.msra.mxu1 %v6277_v58  ;;  %v7503_v57 = vld [vmem:[#allocation4 + $0x3c4] sm:$0xf0]  ;;  %v7487_v58 = vld [vmem:[#allocation4 + $0x34c] sm:$0xf]  ;;  %v7065_v45 = vor.u32 %v7632_v35, %v7064_v34  ;;  %v6424_v33 = vld [vmem:[#allocation4 + $0x250] sm:$0xf] }
 0x363   :  { %v6545_v2 = vor.u32 %v7503_v57, %v6544_v56  ;;  %v6549_v3 = vor.u32 %v7487_v58, %v6546_v59  ;;  %v6946_v56 = vld [vmem:[#allocation4 + $0x6d8] sm:$0xf0]  ;;  %v6808_v59 = vld [vmem:[#allocation4 + $0x550] sm:$0xf] }
 0x364   :  { %v6949_v63 = vor.u32 %v7585_v55, %v6946_v56  ;;  %v7472_v34 = vld [vmem:[#allocation4 + $0x2cc] sm:$0xf0] }
 0x365   :  { %4583 = vmatpush.bf16.msrb.mxu2 %v6137_v6  ;;  %4596 = vmatpush.bf16.msrb.mxu3 %v6141_v7  ;;  %v6416_v6 = vld [vmem:[#allocation4 + $0x248] sm:$0xf] }
 0x366   :  { %4609 = vmatpush.bf16.msra.mxu0 %v6145_v13  ;;  %4622 = vmatpush.bf16.msra.mxu1 %v6149_v14  ;;  %v7471_v7 = vld [vmem:[#allocation4 + $0x2c4] sm:$0xf0]  ;;  %v6413_v13 = vor.u32 %v7454_v4, %v6410_v5  ;;  %v6280_v14 = vld [vmem:[#allocation4 + $0x140] sm:$0xf]  ;;  %v7569_v4 = vld [vmem:[#allocation4 + $0x5d4] sm:$0xf0] }
 0x367   :  { %v7553_v5 = vld [vmem:[#allocation4 + $0x55c] sm:$0xf] }
 0x368   :  { %4584 = vmatmul.bf16.vlgmr.msrb.gmra.mxu2 %v7918_v8  ;;  %4597 = vmatmul.bf16.vlgmr.msrb.gmra.mxu3 %v7918_v8 }
 0x369   :  { %4628 = vmatpush.bf16.msra.mxu2 %v7049_v12  ;;  %4641 = vmatpush.bf16.msra.mxu3 %v7053_v15  ;;  %v7438_v12 = vld [vmem:[#allocation4 + $0x1bc] sm:$0xf0]  ;;  %v6417_v15 = vor.u32 %v7471_v7, %v6416_v6  ;;  %v6818_v6 = vld [vmem:[#allocation4 + $0x5d8] sm:$0xf0] }
 0x36a   :  { %4654 = vmatpush.bf16.msrb.mxu0 %v7057_v61  ;;  %4667 = vmatpush.bf16.msrb.mxu1 %v7061_v18  ;;  %v6282_v61 = vld [vmem:[#allocation4 + $0x1c0] sm:$0xf0]  ;;  %v6288_v18 = vld [vmem:[#allocation4 + $0x148] sm:$0xf]  ;;  %v6281_v23 = vor.u32 %v7438_v12, %v6280_v14  ;;  %v6821_v14 = vor.u32 %v7553_v5, %v6818_v6  ;;  %v7520_v12 = vld [vmem:[#allocation4 + $0x454] sm:$0xf] }
 0x36b   :  { %4610 = vmatmul.bf16.vlgmr.msra.gmra.mxu0 %v7918_v8  ;;  %4623 = vmatmul.bf16.vlgmr.msra.gmra.mxu1 %v7918_v8  ;;  %v6285_v24 = vor.u32 %v7422_v17, %v6282_v61  ;;  %v6289_v28 = vor.u32 %v7439_v19, %v6288_v18  ;;  %v7537_v17 = vld [vmem:[#allocation4 + $0x4d4] sm:$0xf0]  ;;  %v7521_v61 = vld [vmem:[#allocation4 + $0x45c] sm:$0xf]  ;;  %v7634_v5 = vld [vmem:[#allocation4 + $0x7dc] sm:$0xf0] }
 0x36c   :  { %v6690_v18 = vld [vmem:[#allocation4 + $0x4d8] sm:$0xf0]  ;;  %v7618_v6 = vld [vmem:[#allocation4 + $0x764] sm:$0xf] }
 0x36d   :  { %4629 = vmatpush.bf16.msra.mxu2 %v6921_v25  ;;  %4642 = vmatpush.bf16.msra.mxu3 %v6925_v26  ;;  %v7406_v25 = vld [vmem:[#allocation4 + $0xbc] sm:$0xf0]  ;;  %v7390_v26 = vld [vmem:[#allocation4 + $0x44] sm:$0xf] }
 0x36e   :  { %4655 = vmatpush.bf16.msrb.mxu0 %v6929_v29  ;;  %4668 = vmatpush.bf16.msrb.mxu1 %v6933_v30  ;;  %v6293_v29 = vor.u32 %v7423_v20, %v6290_v21  ;;  %v6160_v30 = vld [vmem:[#allocation4 + $0x48] sm:$0xf]  ;;  %v6153_v38 = vor.u32 %v7406_v25, %v6152_v22  ;;  %v6157_v39 = vor.u32 %v7390_v26, %v6154_v27  ;;  %v6552_v21 = vld [vmem:[#allocation4 + $0x350] sm:$0xf]  ;;  %v7488_v25 = vld [vmem:[#allocation4 + $0x354] sm:$0xf] }
 0x36f   :  { %v6161_v43 = vor.u32 %v7407_v31, %v6160_v30  ;;  %v7504_v22 = vld [vmem:[#allocation4 + $0x3cc] sm:$0xf0]  ;;  %v6554_v26 = vld [vmem:[#allocation4 + $0x3d0] sm:$0xf0]  ;;  %v6560_v27 = vld [vmem:[#allocation4 + $0x358] sm:$0xf] }
 0x370   :  { %v6562_v30 = vld [vmem:[#allocation4 + $0x3d8] sm:$0xf0]  ;;  %v6553_v31 = vor.u32 %v7504_v22, %v6552_v21  ;;  %v6557_v32 = vor.u32 %v7488_v25, %v6554_v26  ;;  %v7603_v25 = vld [vmem:[#allocation4 + $0x6e4] sm:$0xf0]  ;;  %v7587_v26 = vld [vmem:[#allocation4 + $0x66c] sm:$0xf] }
 0x371   :  { %4630 = vmatpush.bf16.msra.mxu2 %v6793_v36  ;;  %4643 = vmatpush.bf16.msra.mxu3 %v6797_v37  ;;  %v7066_v36 = vld [vmem:[#allocation4 + $0x7d0] sm:$0xf0]  ;;  %v7072_v37 = vld [vmem:[#allocation4 + $0x758] sm:$0xf] }
 0x372   :  { %4656 = vmatpush.bf16.msrb.mxu0 %v6801_v40  ;;  %4669 = vmatpush.bf16.msrb.mxu1 %v6805_v41  ;;  %v7633_v40 = vld [vmem:[#allocation4 + $0x7d4] sm:$0xf0]  ;;  %v7617_v41 = vld [vmem:[#allocation4 + $0x75c] sm:$0xf]  ;;  %v7069_v46 = vor.u32 %v7616_v0, %v7066_v36  ;;  %v7456_v36 = vld [vmem:[#allocation4 + $0x254] sm:$0xf] }
 0x373   :  { %v7077_v50 = vor.u32 %v7617_v41, %v7074_v42  ;;  %v6434_v41 = vld [vmem:[#allocation4 + $0x2d8] sm:$0xf0]  ;;  %v6425_v42 = vor.u32 %v7472_v34, %v6424_v33  ;;  %v7554_v33 = vld [vmem:[#allocation4 + $0x564] sm:$0xf] }
 0x374   :  { %v6826_v34 = vld [vmem:[#allocation4 + $0x5e0] sm:$0xf0] }
 0x375   :  { %4631 = vmatpush.bf16.msra.mxu2 %v6665_v48  ;;  %4644 = vmatpush.bf16.msra.mxu3 %v6669_v49  ;;  %v7600_v48 = vld [vmem:[#allocation4 + $0x6cc] sm:$0xf0]  ;;  %v7073_v49 = vor.u32 %v7633_v40, %v7072_v37  ;;  %v6426_v37 = vld [vmem:[#allocation4 + $0x2d0] sm:$0xf0]  ;;  %v7457_v40 = vld [vmem:[#allocation4 + $0x25c] sm:$0xf] }
 0x376   :  { %4657 = vmatpush.bf16.msrb.mxu0 %v6673_v52  ;;  %4670 = vmatpush.bf16.msrb.mxu1 %v6677_v53  ;;  %v6938_v52 = vld [vmem:[#allocation4 + $0x6d0] sm:$0xf0]  ;;  %v6944_v53 = vld [vmem:[#allocation4 + $0x658] sm:$0xf]  ;;  %v6937_v57 = vor.u32 %v7600_v48, %v6936_v47  ;;  %v6437_v47 = vor.u32 %v7457_v40, %v6434_v41  ;;  %v7555_v40 = vld [vmem:[#allocation4 + $0x56c] sm:$0xf] }
 0x377   :  { %v6941_v58 = vor.u32 %v7584_v51, %v6938_v52  ;;  %v7424_v48 = vld [vmem:[#allocation4 + $0x154] sm:$0xf]  ;;  %v7441_v51 = vld [vmem:[#allocation4 + $0x1d4] sm:$0xf0]  ;;  %v7425_v52 = vld [vmem:[#allocation4 + $0x15c] sm:$0xf] }
 0x378   :  { %v6834_v41 = vld [vmem:[#allocation4 + $0x5e8] sm:$0xf0] }
 0x379   :  { %4632 = vmatpush.bf16.msra.mxu2 %v6537_v60  ;;  %4645 = vmatpush.bf16.msra.mxu3 %v6541_v62  ;;  %v7568_v60 = vld [vmem:[#allocation4 + $0x5cc] sm:$0xf0]  ;;  %v6945_v62 = vor.u32 %v7601_v54, %v6944_v53  ;;  %v6306_v53 = vld [vmem:[#allocation4 + $0x1d8] sm:$0xf0] }
 0x37a   :  { %4658 = vmatpush.bf16.msrb.mxu0 %v6545_v2  ;;  %4671 = vmatpush.bf16.msrb.mxu1 %v6549_v3  ;;  %v6810_v2 = vld [vmem:[#allocation4 + $0x5d0] sm:$0xf0]  ;;  %v6816_v3 = vld [vmem:[#allocation4 + $0x558] sm:$0xf]  ;;  %v6809_v7 = vor.u32 %v7568_v60, %v6808_v59  ;;  %v6168_v54 = vld [vmem:[#allocation4 + $0x50] sm:$0xf] }
 0x37b   :  { %v6813_v9 = vor.u32 %v7552_v1, %v6810_v2  ;;  %v6170_v59 = vld [vmem:[#allocation4 + $0xd0] sm:$0xf0]  ;;  %v7409_v1 = vld [vmem:[#allocation4 + $0xd4] sm:$0xf0]  ;;  %v7393_v2 = vld [vmem:[#allocation4 + $0x5c] sm:$0xf] }
 0x37d   :  { %4633 = vmatpush.bf16.msra.mxu2 %v6409_v11  ;;  %4646 = vmatpush.bf16.msra.mxu3 %v6413_v13  ;;  %v7536_v11 = vld [vmem:[#allocation4 + $0x4cc] sm:$0xf0]  ;;  %v6817_v13 = vor.u32 %v7569_v4, %v6816_v3  ;;  %v6178_v3 = vld [vmem:[#allocation4 + $0xd8] sm:$0xf0]  ;;  %v7080_v4 = vld [vmem:[#allocation4 + $0x760] sm:$0xf] }
 0x37e   :  { %4659 = vmatpush.bf16.msrb.mxu0 %v6417_v15  ;;  %4672 = vmatpush.bf16.msrb.mxu1 %v6421_v16  ;;  %v6682_v15 = vld [vmem:[#allocation4 + $0x4d0] sm:$0xf0]  ;;  %v6688_v16 = vld [vmem:[#allocation4 + $0x458] sm:$0xf]  ;;  %v6681_v19 = vor.u32 %v7536_v11, %v6680_v10 }
 0x37f   :  { %v6685_v20 = vor.u32 %v7520_v12, %v6682_v15  ;;  %v7090_v12 = vld [vmem:[#allocation4 + $0x7e8] sm:$0xf0] }
 0x381   :  { %4634 = vmatpush.bf16.msra.mxu2 %v6281_v23  ;;  %4647 = vmatpush.bf16.msra.mxu3 %v6285_v24  ;;  %v6689_v23 = vor.u32 %v7537_v17, %v6688_v16  ;;  %v6693_v24 = vor.u32 %v7521_v61, %v6690_v18  ;;  %v6181_v16 = vor.u32 %v7393_v2, %v6178_v3  ;;  %v6952_v18 = vld [vmem:[#allocation4 + $0x660] sm:$0xf]  ;;  %v7490_v2 = vld [vmem:[#allocation4 + $0x364] sm:$0xf] }
 0x382   :  { %4660 = vmatpush.bf16.msrb.mxu0 %v6289_v28  ;;  %4673 = vmatpush.bf16.msrb.mxu1 %v6293_v29  ;;  %v7505_v28 = vld [vmem:[#allocation4 + $0x3d4] sm:$0xf0]  ;;  %v7489_v29 = vld [vmem:[#allocation4 + $0x35c] sm:$0xf]  ;;  %v7081_v17 = vor.u32 %v7634_v5, %v7080_v4 }
 0x383   :  { %v6561_v35 = vor.u32 %v7505_v28, %v6560_v27  ;;  %v6565_v0 = vor.u32 %v7489_v29, %v6562_v30  ;;  %v6962_v27 = vld [vmem:[#allocation4 + $0x6e8] sm:$0xf0]  ;;  %v7943_v28 = vld [vmem:[%s8062_s6] sm:$0xff]  ;;  %v6824_v29 = vld [vmem:[#allocation4 + $0x560] sm:$0xf] }
 0x385   :  { %4635 = vmatpush.bf16.msra.mxu2 %v6153_v38  ;;  %4648 = vmatpush.bf16.msra.mxu3 %v6157_v39  ;;  %v6432_v38 = vld [vmem:[#allocation4 + $0x258] sm:$0xf] }
 0x386   :  { %4661 = vmatpush.bf16.msrb.mxu0 %v6161_v43  ;;  %4674 = vmatpush.bf16.msrb.mxu1 %v6165_v44  ;;  %v7473_v39 = vld [vmem:[#allocation4 + $0x2d4] sm:$0xf0]  ;;  %v6429_v43 = vor.u32 %v7456_v36, %v6426_v37  ;;  %v6296_v44 = vld [vmem:[#allocation4 + $0x150] sm:$0xf]  ;;  %v6832_v36 = vld [vmem:[#allocation4 + $0x568] sm:$0xf] }
 0x387   :  { %v7571_v37 = vld [vmem:[#allocation4 + $0x5e4] sm:$0xf0] }
 0x388   :  { %4636 = vmatmul.bf16.vlgmr.msra.gmra.mxu2 %v7918_v8  ;;  %4649 = vmatmul.bf16.vlgmr.msra.gmra.mxu3 %v7918_v8 }
 0x389   :  { %4680 = vmatpush.bf16.msrb.mxu2 %v7065_v45  ;;  %4693 = vmatpush.bf16.msrb.mxu3 %v7069_v46  ;;  %v7440_v45 = vld [vmem:[#allocation4 + $0x1cc] sm:$0xf0]  ;;  %v6433_v46 = vor.u32 %v7473_v39, %v6432_v38  ;;  %v3078_v38 = vperm.slane %v7943_v28, 2  ;;  %v3079_v39 = vperm.slane %v7943_v28, 3 }
 0x38a   :  { %4706 = vmatpush.bf16.msra.mxu0 %v7073_v49  ;;  %4719 = vmatpush.bf16.msra.mxu1 %v7077_v50  ;;  %v6298_v49 = vld [vmem:[#allocation4 + $0x1d0] sm:$0xf0]  ;;  %v6304_v50 = vld [vmem:[#allocation4 + $0x158] sm:$0xf]  ;;  %v6297_v55 = vor.u32 %v7440_v45, %v6296_v44  ;;  %v6833_v44 = vor.u32 %v7571_v37, %v6832_v36  ;;  %v7442_v37 = vld [vmem:[#allocation4 + $0x1dc] sm:$0xf0] }
 0x38b   :  { %4662 = vmatmul.bf16.vlgmr.msrb.gmra.mxu0 %v7918_v8  ;;  %4675 = vmatmul.bf16.vlgmr.msrb.gmra.mxu1 %v7918_v8  ;;  %v6301_v56 = vor.u32 %v7424_v48, %v6298_v49  ;;  %v6305_v60 = vor.u32 %v7441_v51, %v6304_v50  ;;  %v7538_v48 = vld [vmem:[#allocation4 + $0x4dc] sm:$0xf0]  ;;  %v7522_v49 = vld [vmem:[#allocation4 + $0x464] sm:$0xf]  ;;  %v6837_v50 = vor.u32 %v7555_v40, %v6834_v41 }
 0x38d   :  { %4681 = vmatpush.bf16.msrb.mxu2 %v6937_v57  ;;  %4694 = vmatpush.bf16.msrb.mxu3 %v6941_v58  ;;  %v7408_v57 = vld [vmem:[#allocation4 + $0xcc] sm:$0xf0]  ;;  %v7392_v58 = vld [vmem:[#allocation4 + $0x54] sm:$0xf] }
 0x38e   :  { %4707 = vmatpush.bf16.msra.mxu0 %v6945_v62  ;;  %4720 = vmatpush.bf16.msra.mxu1 %v6949_v63  ;;  %v6309_v62 = vor.u32 %v7425_v52, %v6306_v53  ;;  %v6176_v63 = vld [vmem:[#allocation4 + $0x58] sm:$0xf]  ;;  %v6169_v10 = vor.u32 %v7408_v57, %v6168_v54  ;;  %v6173_v11 = vor.u32 %v7392_v58, %v6170_v59  ;;  %v6698_v53 = vld [vmem:[#allocation4 + $0x4e0] sm:$0xf0]  ;;  %v6704_v54 = vld [vmem:[#allocation4 + $0x468] sm:$0xf] }
 0x38f   :  { %v6177_v15 = vor.u32 %v7409_v1, %v6176_v63  ;;  %v6706_v57 = vld [vmem:[#allocation4 + $0x4e8] sm:$0xf0]  ;;  %v3076_v58 = vperm.slane %v7943_v28, 0  ;;  %v3077_v59 = vperm.slane %v7943_v28, 1  ;;  %v6701_v1 = vor.u32 %v7522_v49, %v6698_v53  ;;  %v6186_v53 = vld [vmem:[#allocation4 + $0xe0] sm:$0xf0] }
 0x390   :  { %v6322_v49 = vld [vmem:[#allocation4 + $0x1e8] sm:$0xf0] }
 0x391   :  { %4682 = vmatpush.bf16.msrb.mxu2 %v6809_v7  ;;  %4695 = vmatpush.bf16.msrb.mxu3 %v6813_v9  ;;  %v7082_v7 = vld [vmem:[#allocation4 + $0x7e0] sm:$0xf0]  ;;  %v7088_v9 = vld [vmem:[#allocation4 + $0x768] sm:$0xf] }
 0x392   :  { %4708 = vmatpush.bf16.msra.mxu0 %v6817_v13  ;;  %4721 = vmatpush.bf16.msra.mxu1 %v6821_v14  ;;  %v7635_v13 = vld [vmem:[#allocation4 + $0x7e4] sm:$0xf0]  ;;  %v7619_v14 = vld [vmem:[#allocation4 + $0x76c] sm:$0xf]  ;;  %v7085_v61 = vor.u32 %v7618_v6, %v7082_v7  ;;  %v6570_v7 = vld [vmem:[#allocation4 + $0x3e0] sm:$0xf0] }
 0x393   :  { %v7089_v21 = vor.u32 %v7635_v13, %v7088_v9  ;;  %v7093_v22 = vor.u32 %v7619_v14, %v7090_v12  ;;  %v6576_v9 = vld [vmem:[#allocation4 + $0x368] sm:$0xf] }
 0x395   :  { %4683 = vmatpush.bf16.msrb.mxu2 %v6681_v19  ;;  %4696 = vmatpush.bf16.msrb.mxu3 %v6685_v20  ;;  %v7602_v19 = vld [vmem:[#allocation4 + $0x6dc] sm:$0xf0]  ;;  %v7586_v20 = vld [vmem:[#allocation4 + $0x664] sm:$0xf] }
 0x396   :  { %4709 = vmatpush.bf16.msra.mxu0 %v6689_v23  ;;  %4722 = vmatpush.bf16.msra.mxu1 %v6693_v24  ;;  %v6954_v23 = vld [vmem:[#allocation4 + $0x6e0] sm:$0xf0]  ;;  %v6960_v24 = vld [vmem:[#allocation4 + $0x668] sm:$0xf]  ;;  %v6953_v30 = vor.u32 %v7602_v19, %v6952_v18 }
 0x397   :  { %v7458_v18 = vld [vmem:[#allocation4 + $0x264] sm:$0xf] }
 0x399   :  { %4684 = vmatpush.bf16.msrb.mxu2 %v6553_v31  ;;  %4697 = vmatpush.bf16.msrb.mxu3 %v6557_v32  ;;  %v6957_v31 = vor.u32 %v7586_v20, %v6954_v23  ;;  %v7570_v32 = vld [vmem:[#allocation4 + $0x5dc] sm:$0xf0] }
 0x39a   :  { %4710 = vmatpush.bf16.msra.mxu0 %v6561_v35  ;;  %4723 = vmatpush.bf16.msra.mxu1 %v6565_v0  ;;  %v6961_v35 = vor.u32 %v7603_v25, %v6960_v24  ;;  %v6965_v0 = vor.u32 %v7587_v26, %v6962_v27  ;;  %v6442_v24 = vld [vmem:[#allocation4 + $0x2e0] sm:$0xf0]  ;;  %v6448_v27 = vld [vmem:[#allocation4 + $0x268] sm:$0xf] }
 0x39b   :  { %v6445_v36 = vor.u32 %v7458_v18, %v6442_v24  ;;  %v7604_v24 = vld [vmem:[#allocation4 + $0x6ec] sm:$0xf0] }
 0x39d   :  { %4685 = vmatpush.bf16.msrb.mxu2 %v6425_v42  ;;  %4698 = vmatpush.bf16.msrb.mxu3 %v6429_v43  ;;  %v6825_v42 = vor.u32 %v7570_v32, %v6824_v29  ;;  %v6829_v43 = vor.u32 %v7554_v33, %v6826_v34  ;;  %v7459_v32 = vld [vmem:[#allocation4 + $0x26c] sm:$0xf] }
 0x39e   :  { %4711 = vmatpush.bf16.msra.mxu0 %v6433_v46  ;;  %4724 = vmatpush.bf16.msra.mxu1 %v6437_v47  ;;  %v6696_v47 = vld [vmem:[#allocation4 + $0x460] sm:$0xf]  ;;  %v6450_v33 = vld [vmem:[#allocation4 + $0x2e8] sm:$0xf0] }
 0x39f   :  { %v6697_v63 = vor.u32 %v7538_v48, %v6696_v47  ;;  %v6453_v41 = vor.u32 %v7459_v32, %v6450_v33  ;;  %v3083_v47 = vperm.slane %v7943_v28, 7  ;;  %v7427_v48 = vld [vmem:[#allocation4 + $0x16c] sm:$0xf]  ;;  %v6976_v33 = vld [vmem:[#allocation4 + $0x678] sm:$0xf] }
 0x3a1   :  { %4686 = vmatpush.bf16.msrb.mxu2 %v6297_v55  ;;  %4699 = vmatpush.bf16.msrb.mxu3 %v6301_v56  ;;  %v7539_v55 = vld [vmem:[#allocation4 + $0x4e4] sm:$0xf0]  ;;  %v7523_v56 = vld [vmem:[#allocation4 + $0x46c] sm:$0xf] }
 0x3a2   :  { %4712 = vmatpush.bf16.msra.mxu0 %v6305_v60  ;;  %4725 = vmatpush.bf16.msra.mxu1 %v6309_v62  ;;  %v6568_v60 = vld [vmem:[#allocation4 + $0x360] sm:$0xf]  ;;  %v6705_v3 = vor.u32 %v7539_v55, %v6704_v54  ;;  %v6709_v4 = vor.u32 %v7523_v56, %v6706_v57  ;;  %v6192_v54 = vld [vmem:[#allocation4 + $0x68] sm:$0xf] }
 0x3a3   :  { %v7506_v62 = vld [vmem:[#allocation4 + $0x3dc] sm:$0xf0]  ;;  %v7411_v55 = vld [vmem:[#allocation4 + $0xe4] sm:$0xf0] }
 0x3a4   :  { %v6569_v20 = vor.u32 %v7506_v62, %v6568_v60  ;;  %v7395_v62 = vld [vmem:[#allocation4 + $0x6c] sm:$0xf] }
 0x3a5   :  { %4687 = vmatpush.bf16.msrb.mxu2 %v6169_v10  ;;  %4700 = vmatpush.bf16.msrb.mxu3 %v6173_v11  ;;  %v4455_v45 = vpop.f32.mrf.mxu0  ;;  %v4468_v46 = vpop.f32.mrf.mxu1  ;;  %v7507_v10 = vld [vmem:[#allocation4 + $0x3e4] sm:$0xf0] }
 0x3a6   :  { %4713 = vmatpush.bf16.msra.mxu0 %v6177_v15  ;;  %4726 = vmatpush.bf16.msra.mxu1 %v6181_v16  ;;  %v4456_v51 = vadd.f32 %v4455_v45, %v3078_v38  ;;  %v4469_v52 = vadd.f32 %v4468_v46, %v3079_v39  ;;  %v7491_v15 = vld [vmem:[#allocation4 + $0x36c] sm:$0xf]  ;;  %v6577_v25 = vor.u32 %v7507_v10, %v6576_v9  ;;  %v7426_v38 = vld [vmem:[#allocation4 + $0x164] sm:$0xf]  ;;  %v7443_v45 = vld [vmem:[#allocation4 + $0x1e4] sm:$0xf0] }
 0x3a7   :  { %v6578_v16 = vld [vmem:[#allocation4 + $0x3e8] sm:$0xf0]  ;;  %v6314_v39 = vld [vmem:[#allocation4 + $0x1e0] sm:$0xf0]  ;;  %v3082_v46 = vperm.slane %v7943_v28, 6 }
 0x3a8   :  { %4688 = vmatmul.bf16.vlgmr.msrb.gmra.mxu2 %v7918_v8  ;;  %4701 = vmatmul.bf16.vlgmr.msrb.gmra.mxu3 %v7918_v8  ;;  %4936 = vst.sshfl [vmem:[#allocation1 + $0x10] sm:$0xff pattern:$0x73625140] %v4456_v51  ;;  %v4869_v11 = vrot.slane %v4456_v51, 4  ;;  %v4870_v13 = vrot.slane %v4469_v52, 2  ;;  %v6581_v26 = vor.u32 %v7491_v15, %v6578_v16  ;;  %v6317_v57 = vor.u32 %v7426_v38, %v6314_v39 }
 0x3a9   :  { %4732 = vmatpush.bf16.msra.mxu2 %v7081_v17  ;;  %4745 = vmatpush.bf16.msra.mxu3 %v7085_v61  ;;  %4937 = vst.sshfl [vmem:[#allocation1 + $0x18] sm:$0xff pattern:$0x73625140] %v4469_v52  ;;  %v6440_v17 = vld [vmem:[#allocation4 + $0x260] sm:$0xf] }
 0x3aa   :  { %4758 = vmatpush.bf16.msrb.mxu0 %v7089_v21  ;;  %4771 = vmatpush.bf16.msrb.mxu1 %v7093_v22  ;;  %v4429_v5 = vpop.f32.mrf.mxu2  ;;  %v4442_v6 = vpop.f32.mrf.mxu3  ;;  %v7474_v61 = vld [vmem:[#allocation4 + $0x2dc] sm:$0xf0]  ;;  %v6573_v21 = vor.u32 %v7490_v2, %v6570_v7  ;;  %v4894_v29 = vsel %vm4893_vm5, %v4869_v11, %v4870_v13  ;;  %v7394_v52 = vld [vmem:[#allocation4 + $0x64] sm:$0xf]  ;;  %v7636_v2 = vld [vmem:[#allocation4 + $0x7ec] sm:$0xf0] }
 0x3ab   :  { %4714 = vmatmul.bf16.vlgmr.msra.gmra.mxu0 %v7918_v8  ;;  %4727 = vmatmul.bf16.vlgmr.msra.gmra.mxu1 %v7918_v8  ;;  %v4430_v14 = vadd.f32 %v4429_v5, %v3076_v58  ;;  %v4443_v12 = vadd.f32 %v4442_v6, %v3077_v59  ;;  %v7410_v51 = vld [vmem:[#allocation4 + $0xdc] sm:$0xf0]  ;;  %v7620_v7 = vld [vmem:[#allocation4 + $0x774] sm:$0xf]  ;;  %v7104_v10 = vld [vmem:[#allocation4 + $0x778] sm:$0xf]  ;;  %v6189_v16 = vor.u32 %v7394_v52, %v6186_v53 }
 0x3ac   :  { %v7098_v9 = vld [vmem:[#allocation4 + $0x7f0] sm:$0xf0]  ;;  %v7637_v11 = vld [vmem:[#allocation4 + $0x7f4] sm:$0xf0]  ;;  %v3080_v13 = vperm.slane %v7943_v28, 4  ;;  %v7972_v52 = vld [vmem:[%s8062_s6 + $0x8] sm:$0xff] }
 0x3ad   :  { %4733 = vmatpush.bf16.msra.mxu2 %v6953_v30  ;;  %4746 = vmatpush.bf16.msra.mxu3 %v6957_v31  ;;  %4934 = vst.sshfl [vmem:[#allocation1] sm:$0xff pattern:$0x73625140] %v4430_v14  ;;  %v4868_v19 = vrot.slane %v4443_v12, 6  ;;  %v4457_v22 = vpop.f32.mrf.mxu0  ;;  %v4470_v23 = vpop.f32.mrf.mxu1  ;;  %v7475_v31 = vld [vmem:[#allocation4 + $0x2e4] sm:$0xf0] }
 0x3ae   :  { %4759 = vmatpush.bf16.msrb.mxu0 %v6961_v35  ;;  %4772 = vmatpush.bf16.msrb.mxu1 %v6965_v0  ;;  %4935 = vst.sshfl [vmem:[#allocation1 + $0x8] sm:$0xff pattern:$0x73625140] %v4443_v12  ;;  %v6312_v35 = vld [vmem:[#allocation4 + $0x160] sm:$0xf]  ;;  %v6441_v0 = vor.u32 %v7474_v61, %v6440_v17  ;;  %v6449_v40 = vor.u32 %v7475_v31, %v6448_v27 }
 0x3af   :  { %v4892_v30 = vsel %vm2648_vm0, %v4430_v14, %v4868_v19  ;;  %v6313_v56 = vor.u32 %v7442_v37, %v6312_v35  ;;  %v3081_v14 = vperm.slane %v7943_v28, 5  ;;  %v7621_v12 = vld [vmem:[#allocation4 + $0x77c] sm:$0xf]  ;;  %v6193_v17 = vor.u32 %v7411_v55, %v6192_v54  ;;  %v6968_v23 = vld [vmem:[#allocation4 + $0x670] sm:$0xf] }
 0x3b0   :  { %v4896_v34 = vsel %vm4895_vm6, %v4892_v30, %v4894_v29  ;;  %v7106_v61 = vld [vmem:[#allocation4 + $0x7f8] sm:$0xf0]  ;;  %v7588_v29 = vld [vmem:[#allocation4 + $0x674] sm:$0xf]  ;;  %v7105_v31 = vor.u32 %v7637_v11, %v7104_v10  ;;  %v6969_v39 = vor.u32 %v7604_v24, %v6968_v23  ;;  %v7509_v23 = vld [vmem:[#allocation4 + $0x3f4] sm:$0xf0] }
 0x3b1   :  { %4734 = vmatpush.bf16.msra.mxu2 %v6825_v42  ;;  %4747 = vmatpush.bf16.msra.mxu3 %v6829_v43  ;;  %4926 = vst [vmem:[%s8063_s7] sm:$0xff] %v4896_v34  ;;  %v6970_v30 = vld [vmem:[#allocation4 + $0x6f0] sm:$0xf0]  ;;  %v7109_v32 = vor.u32 %v7621_v12, %v7106_v61  ;;  %v7605_v34 = vld [vmem:[#allocation4 + $0x6f4] sm:$0xf0]  ;;  %v7589_v35 = vld [vmem:[#allocation4 + $0x67c] sm:$0xf] }
 0x3b2   :  { %4760 = vmatpush.bf16.msrb.mxu0 %v6833_v44  ;;  %4773 = vmatpush.bf16.msrb.mxu1 %v6837_v50  ;;  %v4431_v42 = vpop.f32.mrf.mxu2  ;;  %v4444_v43 = vpop.f32.mrf.mxu3  ;;  %v6320_v44 = vld [vmem:[#allocation4 + $0x168] sm:$0xf]  ;;  %v6184_v50 = vld [vmem:[#allocation4 + $0x60] sm:$0xf]  ;;  %v6978_v38 = vld [vmem:[#allocation4 + $0x6f8] sm:$0xf0] }
 0x3b3   :  { %v6321_v58 = vor.u32 %v7443_v45, %v6320_v44  ;;  %v6185_v15 = vor.u32 %v7410_v51, %v6184_v50  ;;  %v6973_v43 = vor.u32 %v7588_v29, %v6970_v30  ;;  %v7572_v44 = vld [vmem:[#allocation4 + $0x5ec] sm:$0xf0]  ;;  %v7556_v45 = vld [vmem:[#allocation4 + $0x574] sm:$0xf]  ;;  %v6848_v50 = vld [vmem:[#allocation4 + $0x578] sm:$0xf] }
 0x3b4   :  { %v7573_v51 = vld [vmem:[#allocation4 + $0x5f4] sm:$0xf0]  ;;  %v7557_v53 = vld [vmem:[#allocation4 + $0x57c] sm:$0xf]  ;;  %v7492_v61 = vld [vmem:[#allocation4 + $0x374] sm:$0xf] }
 0x3b5   :  { %4735 = vmatpush.bf16.msra.mxu2 %v6697_v63  ;;  %4748 = vmatpush.bf16.msra.mxu3 %v6701_v1  ;;  %v4507_v59 = vpop.f32.mrf.mxu0  ;;  %v4520_v60 = vpop.f32.mrf.mxu1  ;;  %v6194_v63 = vld [vmem:[#allocation4 + $0xe8] sm:$0xf0]  ;;  %v7096_v1 = vld [vmem:[#allocation4 + $0x770] sm:$0xf]  ;;  %v6850_v54 = vld [vmem:[#allocation4 + $0x5f8] sm:$0xf0] }
 0x3b6   :  { %4761 = vmatpush.bf16.msrb.mxu0 %v6705_v3  ;;  %4774 = vmatpush.bf16.msrb.mxu1 %v6709_v4  ;;  %v4943_v3 = vld [vmem:[#allocation1 + $0x1] ss:$4 sm:$0xff]  ;;  %v6325_v4 = vor.u32 %v7427_v48, %v6322_v49  ;;  %v4508_v5 = vadd.f32 %v4507_v59, %v3082_v46  ;;  %v4521_v6 = vadd.f32 %v4520_v60, %v3083_v47  ;;  %v3086_v60 = vperm.slane %v7972_v52, 2 }
 0x3b7   :  { %4984 = vst [vmem:[%s8063_s7 + $0x40] sm:$0xff] %v4943_v3  ;;  %v6197_v18 = vor.u32 %v7395_v62, %v6194_v63  ;;  %v7097_v19 = vor.u32 %v7636_v2, %v7096_v1  ;;  %v6842_v46 = vld [vmem:[#allocation4 + $0x5f0] sm:$0xf0]  ;;  %v6977_v48 = vor.u32 %v7605_v34, %v6976_v33  ;;  %v6981_v49 = vor.u32 %v7589_v35, %v6978_v38  ;;  %v7540_v63 = vld [vmem:[#allocation4 + $0x4ec] sm:$0xf0] }
 0x3b8   :  { %4940 = vst.sshfl [vmem:[#allocation1 + $0x30] sm:$0xff pattern:$0x73625140] %v4508_v5  ;;  %v4873_v28 = vrot.slane %v4521_v6, 2  ;;  %v6845_v59 = vor.u32 %v7556_v45, %v6842_v46  ;;  %v3087_v62 = vperm.slane %v7972_v52, 3  ;;  %v6849_v2 = vor.u32 %v7573_v51, %v6848_v50 }
 0x3b9   :  { %4736 = vmatpush.bf16.msra.mxu2 %v6569_v20  ;;  %4749 = vmatpush.bf16.msra.mxu3 %v6573_v21  ;;  %4941 = vst.sshfl [vmem:[#allocation1 + $0x38] sm:$0xff pattern:$0x73625140] %v4521_v6  ;;  %v7101_v20 = vor.u32 %v7620_v7, %v7098_v9  ;;  %v7524_v1 = vld [vmem:[#allocation4 + $0x474] sm:$0xf]  ;;  %v6853_v3 = vor.u32 %v7557_v53, %v6850_v54 }
 0x3ba   :  { %4762 = vmatpush.bf16.msrb.mxu0 %v6577_v25  ;;  %4775 = vmatpush.bf16.msrb.mxu1 %v6581_v26  ;;  %v4481_v21 = vpop.f32.mrf.mxu2  ;;  %v4494_v22 = vpop.f32.mrf.mxu3  ;;  %v4872_v25 = vrot.slane %v4508_v5, 4  ;;  %v6720_v5 = vld [vmem:[#allocation4 + $0x478] sm:$0xf]  ;;  %v7525_v7 = vld [vmem:[#allocation4 + $0x47c] sm:$0xf] }
 0x3bb   :  { %v4482_v26 = vadd.f32 %v4481_v21, %v3080_v13  ;;  %v4495_v27 = vadd.f32 %v4494_v22, %v3081_v14  ;;  %v7541_v6 = vld [vmem:[#allocation4 + $0x4f4] sm:$0xf0]  ;;  %v6722_v9 = vld [vmem:[#allocation4 + $0x4f8] sm:$0xf0]  ;;  %v6586_v21 = vld [vmem:[#allocation4 + $0x3f0] sm:$0xf0] }
 0x3bc   :  { %v6592_v22 = vld [vmem:[#allocation4 + $0x378] sm:$0xf]  ;;  %v7493_v24 = vld [vmem:[#allocation4 + $0x37c] sm:$0xf]  ;;  %v7476_v29 = vld [vmem:[#allocation4 + $0x2ec] sm:$0xf0] }
 0x3bd   :  { %4737 = vmatpush.bf16.msra.mxu2 %v6441_v0  ;;  %4750 = vmatpush.bf16.msra.mxu3 %v6445_v36  ;;  %4938 = vst.sshfl [vmem:[#allocation1 + $0x20] sm:$0xff pattern:$0x73625140] %v4482_v26  ;;  %v4871_v0 = vrot.slane %v4495_v27, 6  ;;  %v4509_v36 = vpop.f32.mrf.mxu0  ;;  %v4522_v37 = vpop.f32.mrf.mxu1  ;;  %v6593_v33 = vor.u32 %v7509_v23, %v6592_v22  ;;  %v7477_v38 = vld [vmem:[#allocation4 + $0x2f4] sm:$0xf0] }
 0x3be   :  { %4763 = vmatpush.bf16.msrb.mxu0 %v6449_v40  ;;  %4776 = vmatpush.bf16.msrb.mxu1 %v6453_v41  ;;  %4939 = vst.sshfl [vmem:[#allocation1 + $0x28] sm:$0xff pattern:$0x73625140] %v4495_v27  ;;  %v6840_v40 = vld [vmem:[#allocation4 + $0x570] sm:$0xf]  ;;  %v4898_v41 = vsel %vm4893_vm5, %v4872_v25, %v4873_v28  ;;  %v3084_v28 = vperm.slane %v7972_v52, 0 }
 0x3bf   :  { %v4897_v42 = vsel %vm2648_vm0, %v4482_v26, %v4871_v0  ;;  %v6594_v25 = vld [vmem:[#allocation4 + $0x3f8] sm:$0xf0]  ;;  %v3085_v26 = vperm.slane %v7972_v52, 1  ;;  %v6456_v27 = vld [vmem:[#allocation4 + $0x270] sm:$0xf]  ;;  %v3091_v22 = vperm.slane %v7972_v52, 7 }
 0x3c0   :  { %v4899_v47 = vsel %vm4895_vm6, %v4897_v42, %v4898_v41  ;;  %v6597_v34 = vor.u32 %v7493_v24, %v6594_v25  ;;  %v6458_v36 = vld [vmem:[#allocation4 + $0x2f0] sm:$0xf0]  ;;  %v6464_v37 = vld [vmem:[#allocation4 + $0x278] sm:$0xf]  ;;  %v6328_v45 = vld [vmem:[#allocation4 + $0x170] sm:$0xf]  ;;  %v6457_v51 = vor.u32 %v7476_v29, %v6456_v27 }
 0x3c1   :  { %4738 = vmatpush.bf16.msra.mxu2 %v6313_v56  ;;  %4751 = vmatpush.bf16.msra.mxu3 %v6317_v57  ;;  %4927 = vst [vmem:[%s8063_s7 + $0x8] sm:$0xff] %v4899_v47  ;;  %v6712_v57 = vld [vmem:[#allocation4 + $0x470] sm:$0xf]  ;;  %v7428_v47 = vld [vmem:[#allocation4 + $0x174] sm:$0xf]  ;;  %v3089_v27 = vperm.slane %v7972_v52, 5 }
 0x3c2   :  { %4764 = vmatpush.bf16.msrb.mxu0 %v6321_v58  ;;  %4777 = vmatpush.bf16.msrb.mxu1 %v6325_v4  ;;  %v4483_v55 = vpop.f32.mrf.mxu2  ;;  %v4496_v56 = vpop.f32.mrf.mxu3  ;;  %v6841_v58 = vor.u32 %v7572_v44, %v6840_v40  ;;  %v6714_v4 = vld [vmem:[#allocation4 + $0x4f0] sm:$0xf0]  ;;  %v6713_v14 = vor.u32 %v7540_v63, %v6712_v57  ;;  %v6466_v44 = vld [vmem:[#allocation4 + $0x2f8] sm:$0xf0]  ;;  %v7444_v46 = vld [vmem:[#allocation4 + $0x1ec] sm:$0xf0] }
 0x3c3   :  { %v6717_v12 = vor.u32 %v7524_v1, %v6714_v4  ;;  %v6330_v54 = vld [vmem:[#allocation4 + $0x1f0] sm:$0xf0]  ;;  %v6465_v55 = vor.u32 %v7477_v38, %v6464_v37  ;;  %v6336_v57 = vld [vmem:[#allocation4 + $0x178] sm:$0xf]  ;;  %v6338_v63 = vld [vmem:[#allocation4 + $0x1f8] sm:$0xf0] }
 0x3c4   :  { %v6200_v4 = vld [vmem:[#allocation4 + $0x70] sm:$0xf] }
 0x3c5   :  { %4739 = vmatpush.bf16.msra.mxu2 %v6185_v15  ;;  %4752 = vmatpush.bf16.msra.mxu3 %v6189_v16  ;;  %v4945_v10 = vld [vmem:[#allocation1 + $0x21] ss:$4 sm:$0xff]  ;;  %v6721_v15 = vor.u32 %v7541_v6, %v6720_v5 }
 0x3c6   :  { %4765 = vmatpush.bf16.msrb.mxu0 %v6193_v17  ;;  %4778 = vmatpush.bf16.msrb.mxu1 %v6197_v18  ;;  %4985 = vst [vmem:[%s8063_s7 + $0x48] sm:$0xff] %v4945_v10  ;;  %v6584_v16 = vld [vmem:[#allocation4 + $0x370] sm:$0xf] }
 0x3c7   :  { %v7508_v17 = vld [vmem:[#allocation4 + $0x3ec] sm:$0xf0] }
 0x3c8   :  { %4740 = vmatmul.bf16.vlgmr.msra.gmra.mxu2 %v7918_v8  ;;  %4753 = vmatmul.bf16.vlgmr.msra.gmra.mxu3 %v7918_v8  ;;  %v4559_v11 = vpop.f32.mrf.mxu0  ;;  %v4572_v13 = vpop.f32.mrf.mxu1  ;;  %v6585_v30 = vor.u32 %v7508_v17, %v6584_v16  ;;  %v7412_v5 = vld [vmem:[#allocation4 + $0xec] sm:$0xf0]  ;;  %v6210_v16 = vld [vmem:[#allocation4 + $0xf8] sm:$0xf0] }
 0x3c9   :  { %4784 = vmatpush.bf16.msrb.mxu2 %v7097_v19  ;;  %4797 = vmatpush.bf16.msrb.mxu3 %v7101_v20  ;;  %v4560_v18 = vadd.f32 %v4559_v11, %v3086_v60  ;;  %v4573_v19 = vadd.f32 %v4572_v13, %v3087_v62  ;;  %v6725_v20 = vor.u32 %v7525_v7, %v6722_v9  ;;  %v7445_v60 = vld [vmem:[#allocation4 + $0x1f4] sm:$0xf0]  ;;  %v7429_v62 = vld [vmem:[#allocation4 + $0x17c] sm:$0xf]  ;;  %v7396_v11 = vld [vmem:[#allocation4 + $0x74] sm:$0xf] }
 0x3ca   :  { %4810 = vmatpush.bf16.msra.mxu0 %v7105_v31  ;;  %4823 = vmatpush.bf16.msra.mxu1 %v7109_v32  ;;  %v6589_v31 = vor.u32 %v7492_v61, %v6586_v21  ;;  %v7460_v32 = vld [vmem:[#allocation4 + $0x274] sm:$0xf]  ;;  %v6337_v6 = vor.u32 %v7445_v60, %v6336_v57  ;;  %v6341_v7 = vor.u32 %v7429_v62, %v6338_v63  ;;  %v3090_v21 = vperm.slane %v7972_v52, 6 }
 0x3cb   :  { %4766 = vmatmul.bf16.vlgmr.msrb.gmra.mxu0 %v7918_v8  ;;  %4779 = vmatmul.bf16.vlgmr.msrb.gmra.mxu1 %v7918_v8  ;;  %4948 = vst.sshfl [vmem:[#allocation1 + $0x10] sm:$0xff pattern:$0x73625140] %v4560_v18  ;;  %v4533_v35 = vpop.f32.mrf.mxu2  ;;  %v4546_v0 = vpop.f32.mrf.mxu3  ;;  %v4876_v40 = vrot.slane %v4573_v19, 2  ;;  %v6461_v53 = vor.u32 %v7460_v32, %v6458_v36  ;;  %v6202_v13 = vld [vmem:[#allocation4 + $0xf0] sm:$0xf0]  ;;  %v6201_v17 = vor.u32 %v7412_v5, %v6200_v4 }
 0x3cc   :  { %4949 = vst.sshfl [vmem:[#allocation1 + $0x18] sm:$0xff pattern:$0x73625140] %v4573_v19  ;;  %v4534_v41 = vadd.f32 %v4533_v35, %v3084_v28  ;;  %v4547_v42 = vadd.f32 %v4546_v0, %v3085_v26  ;;  %v6205_v61 = vor.u32 %v7396_v11, %v6202_v13  ;;  %v3088_v26 = vperm.slane %v7972_v52, 4 }
 0x3cd   :  { %4785 = vmatpush.bf16.msrb.mxu2 %v6969_v39  ;;  %4798 = vmatpush.bf16.msrb.mxu3 %v6973_v43  ;;  %v4875_v39 = vrot.slane %v4560_v18, 4  ;;  %v7461_v43 = vld [vmem:[#allocation4 + $0x27c] sm:$0xf] }
 0x3ce   :  { %4811 = vmatpush.bf16.msra.mxu0 %v6977_v48  ;;  %4824 = vmatpush.bf16.msra.mxu1 %v6981_v49  ;;  %4946 = vst.sshfl [vmem:[#allocation1] sm:$0xff pattern:$0x73625140] %v4534_v41  ;;  %v4874_v48 = vrot.slane %v4547_v42, 6  ;;  %v6469_v56 = vor.u32 %v7461_v43, %v6466_v44 }
 0x3cf   :  { %4947 = vst.sshfl [vmem:[#allocation1 + $0x8] sm:$0xff pattern:$0x73625140] %v4547_v42 }
 0x3d0   :  { %v4561_v49 = vpop.f32.mrf.mxu0  ;;  %v4574_v50 = vpop.f32.mrf.mxu1 }
 0x3d1   :  { %4786 = vmatpush.bf16.msrb.mxu2 %v6841_v58  ;;  %4799 = vmatpush.bf16.msrb.mxu3 %v6845_v59  ;;  %v4901_v58 = vsel %vm4893_vm5, %v4875_v39, %v4876_v40  ;;  %v4900_v59 = vsel %vm2648_vm0, %v4534_v41, %v4874_v48  ;;  %v3070_v41 = vld [vmem:[%s8062_s6 + $0x10] sm:$0xff] }
 0x3d2   :  { %4812 = vmatpush.bf16.msra.mxu0 %v6849_v2  ;;  %4825 = vmatpush.bf16.msra.mxu1 %v6853_v3  ;;  %v4902_v1 = vsel %vm4895_vm6, %v4900_v59, %v4901_v58  ;;  %v6329_v2 = vor.u32 %v7444_v46, %v6328_v45  ;;  %v6333_v3 = vor.u32 %v7428_v47, %v6330_v54  ;;  %v3094_v42 = vperm.slane %v3070_v41, 2 }
 0x3d3   :  { %4928 = vst [vmem:[%s8063_s7 + $0x10] sm:$0xff] %v4902_v1  ;;  %v4535_v9 = vpop.f32.mrf.mxu2  ;;  %v4548_v10 = vpop.f32.mrf.mxu3  ;;  %v3095_v43 = vperm.slane %v3070_v41, 3  ;;  %v3092_v48 = vperm.slane %v3070_v41, 0  ;;  %v3093_v49 = vperm.slane %v3070_v41, 1  ;;  %v3098_v4 = vperm.slane %v3070_v41, 6 }
 0x3d4   :  { %v3099_v5 = vperm.slane %v3070_v41, 7  ;;  %v3096_v11 = vperm.slane %v3070_v41, 4  ;;  %v3097_v13 = vperm.slane %v3070_v41, 5 }
 0x3d5   :  { %4787 = vmatpush.bf16.msrb.mxu2 %v6713_v14  ;;  %4800 = vmatpush.bf16.msrb.mxu3 %v6717_v12  ;;  %v6208_v14 = vld [vmem:[#allocation4 + $0x78] sm:$0xf] }
 0x3d6   :  { %4813 = vmatpush.bf16.msra.mxu0 %v6721_v15  ;;  %4826 = vmatpush.bf16.msra.mxu1 %v6725_v20  ;;  %v7413_v12 = vld [vmem:[#allocation4 + $0xf4] sm:$0xf0]  ;;  %v7397_v15 = vld [vmem:[#allocation4 + $0x7c] sm:$0xf] }
 0x3d7   :  { %v4954_v18 = vld [vmem:[#allocation1 + $0x1] ss:$4 sm:$0xff]  ;;  %v6209_v19 = vor.u32 %v7413_v12, %v6208_v14  ;;  %v6213_v20 = vor.u32 %v7397_v15, %v6210_v16 }
 0x3d8   :  { %4986 = vst [vmem:[%s8063_s7 + $0x50] sm:$0xff] %v4954_v18 }
 0x3d9   :  { %4788 = vmatpush.bf16.msrb.mxu2 %v6585_v30  ;;  %4801 = vmatpush.bf16.msrb.mxu3 %v6589_v31 }
 0x3da   :  { %4814 = vmatpush.bf16.msra.mxu0 %v6593_v33  ;;  %4827 = vmatpush.bf16.msra.mxu1 %v6597_v34 }
 0x3dd   :  { %4789 = vmatpush.bf16.msrb.mxu2 %v6457_v51  ;;  %4802 = vmatpush.bf16.msrb.mxu3 %v6461_v53 }
 0x3de   :  { %4815 = vmatpush.bf16.msra.mxu0 %v6465_v55  ;;  %4828 = vmatpush.bf16.msra.mxu1 %v6469_v56 }
 0x3e1   :  { %4790 = vmatpush.bf16.msrb.mxu2 %v6329_v2  ;;  %4803 = vmatpush.bf16.msrb.mxu3 %v6333_v3 }
 0x3e2   :  { %4816 = vmatpush.bf16.msra.mxu0 %v6337_v6  ;;  %4829 = vmatpush.bf16.msra.mxu1 %v6341_v7 }
 0x3e5   :  { %4791 = vmatpush.bf16.msrb.mxu2 %v6201_v17  ;;  %4804 = vmatpush.bf16.msrb.mxu3 %v6205_v61 }
 0x3e6   :  { %4817 = vmatpush.bf16.msra.mxu0 %v6209_v19  ;;  %4830 = vmatpush.bf16.msra.mxu1 %v6213_v20 }
 0x3e8   :  { %4792 = vmatmul.bf16.vlgmr.msrb.gmra.mxu2 %v7918_v8  ;;  %4805 = vmatmul.bf16.vlgmr.msrb.gmra.mxu3 %v7918_v8  ;;  %v4611_v23 = vpop.f32.mrf.mxu0  ;;  %v4624_v24 = vpop.f32.mrf.mxu1 }
 0x3e9   :  { %4818 = vmatmul.bf16.vlgmr.msra.gmra.mxu0 %v7918_v8  ;;  %4831 = vmatmul.bf16.vlgmr.msra.gmra.mxu1 %v7918_v8  ;;  %v4612_v25 = vadd.f32 %v4611_v23, %v3090_v21  ;;  %v4625_v28 = vadd.f32 %v4624_v24, %v3091_v22 }
 0x3eb   :  { %4952 = vst.sshfl [vmem:[#allocation1 + $0x30] sm:$0xff pattern:$0x73625140] %v4612_v25  ;;  %v4585_v29 = vpop.f32.mrf.mxu2  ;;  %v4598_v30 = vpop.f32.mrf.mxu3  ;;  %v4878_v31 = vrot.slane %v4612_v25, 4  ;;  %v4879_v32 = vrot.slane %v4625_v28, 2 }
 0x3ec   :  { %4953 = vst.sshfl [vmem:[#allocation1 + $0x38] sm:$0xff pattern:$0x73625140] %v4625_v28  ;;  %v4586_v33 = vadd.f32 %v4585_v29, %v3088_v26  ;;  %v4599_v8 = vadd.f32 %v4598_v30, %v3089_v27  ;;  %v3071_v26 = vld [vmem:[%s8062_s6 + $0x18] sm:$0xff] }
 0x3ed   :  { %v4904_v36 = vsel %vm4893_vm5, %v4878_v31, %v4879_v32  ;;  %v3102_v27 = vperm.slane %v3071_v26, 2  ;;  %v3103_v29 = vperm.slane %v3071_v26, 3 }
 0x3ee   :  { %4950 = vst.sshfl [vmem:[#allocation1 + $0x20] sm:$0xff pattern:$0x73625140] %v4586_v33  ;;  %v4877_v34 = vrot.slane %v4599_v8, 6 }
 0x3ef   :  { %4951 = vst.sshfl [vmem:[#allocation1 + $0x28] sm:$0xff pattern:$0x73625140] %v4599_v8  ;;  %v3100_v8 = vperm.slane %v3071_v26, 0 }
 0x3f0   :  { %v4613_v35 = vpop.f32.mrf.mxu0  ;;  %v4626_v0 = vpop.f32.mrf.mxu1  ;;  %v4903_v37 = vsel %vm2648_vm0, %v4586_v33, %v4877_v34  ;;  %v3101_v34 = vperm.slane %v3071_v26, 1 }
 0x3f1   :  { %v4905_v38 = vsel %vm4895_vm6, %v4903_v37, %v4904_v36 }
 0x3f2   :  { %4929 = vst [vmem:[%s8063_s7 + $0x18] sm:$0xff] %v4905_v38 }
 0x3f3   :  { %v4587_v52 = vpop.f32.mrf.mxu2  ;;  %v4600_v39 = vpop.f32.mrf.mxu3 }
 0x3f6   :  { %v4955_v40 = vld [vmem:[#allocation1 + $0x21] ss:$4 sm:$0xff] }
 0x3f7   :  { %4987 = vst [vmem:[%s8063_s7 + $0x58] sm:$0xff] %v4955_v40 }
 0x408   :  { %v4663_v44 = vpop.f32.mrf.mxu0  ;;  %v4676_v45 = vpop.f32.mrf.mxu1 }
 0x409   :  { %v4664_v46 = vadd.f32 %v4663_v44, %v3094_v42  ;;  %v4677_v47 = vadd.f32 %v4676_v45, %v3095_v43 }
 0x40b   :  { %4958 = vst.sshfl [vmem:[#allocation1 + $0x10] sm:$0xff pattern:$0x73625140] %v4664_v46  ;;  %v4637_v50 = vpop.f32.mrf.mxu2  ;;  %v4650_v51 = vpop.f32.mrf.mxu3  ;;  %v4881_v53 = vrot.slane %v4664_v46, 4  ;;  %v4882_v54 = vrot.slane %v4677_v47, 2 }
 0x40c   :  { %4959 = vst.sshfl [vmem:[#allocation1 + $0x18] sm:$0xff pattern:$0x73625140] %v4677_v47  ;;  %v4638_v55 = vadd.f32 %v4637_v50, %v3092_v48  ;;  %v4651_v56 = vadd.f32 %v4650_v51, %v3093_v49  ;;  %v3106_v48 = vperm.slane %v3071_v26, 6  ;;  %v3107_v49 = vperm.slane %v3071_v26, 7 }
 0x40d   :  { %v4907_v60 = vsel %vm4893_vm5, %v4881_v53, %v4882_v54 }
 0x40e   :  { %4956 = vst.sshfl [vmem:[#allocation1] sm:$0xff pattern:$0x73625140] %v4638_v55  ;;  %v4880_v57 = vrot.slane %v4651_v56, 6 }
 0x40f   :  { %4957 = vst.sshfl [vmem:[#allocation1 + $0x8] sm:$0xff pattern:$0x73625140] %v4651_v56  ;;  %v3105_v56 = vperm.slane %v3071_v26, 5 }
 0x410   :  { %v4665_v58 = vpop.f32.mrf.mxu0  ;;  %v4678_v59 = vpop.f32.mrf.mxu1  ;;  %v4906_v62 = vsel %vm2648_vm0, %v4638_v55, %v4880_v57  ;;  %v3104_v55 = vperm.slane %v3071_v26, 4 }
 0x411   :  { %v4908_v63 = vsel %vm4895_vm6, %v4906_v62, %v4907_v60 }
 0x412   :  { %4930 = vst [vmem:[%s8063_s7 + $0x20] sm:$0xff] %v4908_v63 }
 0x413   :  { %v4639_v1 = vpop.f32.mrf.mxu2  ;;  %v4652_v2 = vpop.f32.mrf.mxu3 }
 0x416   :  { %v4964_v3 = vld [vmem:[#allocation1 + $0x1] ss:$4 sm:$0xff] }
 0x417   :  { %4988 = vst [vmem:[%s8063_s7 + $0x60] sm:$0xff] %v4964_v3 }
 0x428   :  { %v4715_v6 = vpop.f32.mrf.mxu0  ;;  %v4728_v7 = vpop.f32.mrf.mxu1 }
 0x429   :  { %v4716_v9 = vadd.f32 %v4715_v6, %v3098_v4  ;;  %v4729_v10 = vadd.f32 %v4728_v7, %v3099_v5 }
 0x42b   :  { %4962 = vst.sshfl [vmem:[#allocation1 + $0x30] sm:$0xff pattern:$0x73625140] %v4716_v9  ;;  %v4689_v14 = vpop.f32.mrf.mxu2  ;;  %v4702_v12 = vpop.f32.mrf.mxu3  ;;  %v4884_v15 = vrot.slane %v4716_v9, 4  ;;  %v4885_v16 = vrot.slane %v4729_v10, 2 }
 0x42c   :  { %4963 = vst.sshfl [vmem:[#allocation1 + $0x38] sm:$0xff pattern:$0x73625140] %v4729_v10  ;;  %v4690_v17 = vadd.f32 %v4689_v14, %v3096_v11  ;;  %v4703_v61 = vadd.f32 %v4702_v12, %v3097_v13 }
 0x42d   :  { %v4910_v21 = vsel %vm4893_vm5, %v4884_v15, %v4885_v16 }
 0x42e   :  { %4960 = vst.sshfl [vmem:[#allocation1 + $0x20] sm:$0xff pattern:$0x73625140] %v4690_v17  ;;  %v4883_v18 = vrot.slane %v4703_v61, 6 }
 0x42f   :  { %4961 = vst.sshfl [vmem:[#allocation1 + $0x28] sm:$0xff pattern:$0x73625140] %v4703_v61 }
 0x430   :  { %v4717_v19 = vpop.f32.mrf.mxu0  ;;  %v4730_v20 = vpop.f32.mrf.mxu1  ;;  %v4909_v22 = vsel %vm2648_vm0, %v4690_v17, %v4883_v18 }
 0x431   :  { %v4911_v23 = vsel %vm4895_vm6, %v4909_v22, %v4910_v21 }
 0x432   :  { %4931 = vst [vmem:[%s8063_s7 + $0x28] sm:$0xff] %v4911_v23 }
 0x433   :  { %v4691_v24 = vpop.f32.mrf.mxu2  ;;  %v4704_v25 = vpop.f32.mrf.mxu3 }
 0x436   :  { %v4965_v28 = vld [vmem:[#allocation1 + $0x21] ss:$4 sm:$0xff] }
 0x437   :  { %4989 = vst [vmem:[%s8063_s7 + $0x68] sm:$0xff] %v4965_v28 }
 0x448   :  { %v4767_v30 = vpop.f32.mrf.mxu0  ;;  %v4780_v31 = vpop.f32.mrf.mxu1 }
 0x449   :  { %v4768_v32 = vadd.f32 %v4767_v30, %v3102_v27  ;;  %v4781_v33 = vadd.f32 %v4780_v31, %v3103_v29 }
 0x44b   :  { %4968 = vst.sshfl [vmem:[#allocation1 + $0x10] sm:$0xff pattern:$0x73625140] %v4768_v32  ;;  %v4741_v35 = vpop.f32.mrf.mxu2  ;;  %v4754_v0 = vpop.f32.mrf.mxu3  ;;  %v4887_v36 = vrot.slane %v4768_v32, 4  ;;  %v4888_v37 = vrot.slane %v4781_v33, 2 }
 0x44c   :  { %4969 = vst.sshfl [vmem:[#allocation1 + $0x18] sm:$0xff pattern:$0x73625140] %v4781_v33  ;;  %v4742_v38 = vadd.f32 %v4741_v35, %v3100_v8  ;;  %v4755_v52 = vadd.f32 %v4754_v0, %v3101_v34 }
 0x44d   :  { %v4913_v42 = vsel %vm4893_vm5, %v4887_v36, %v4888_v37 }
 0x44e   :  { %4966 = vst.sshfl [vmem:[#allocation1] sm:$0xff pattern:$0x73625140] %v4742_v38  ;;  %v4886_v39 = vrot.slane %v4755_v52, 6 }
 0x44f   :  { %4967 = vst.sshfl [vmem:[#allocation1 + $0x8] sm:$0xff pattern:$0x73625140] %v4755_v52 }
 0x450   :  { %v4769_v40 = vpop.f32.mrf.mxu0  ;;  %v4782_v41 = vpop.f32.mrf.mxu1  ;;  %v4912_v43 = vsel %vm2648_vm0, %v4742_v38, %v4886_v39 }
 0x451   :  { %v4914_v44 = vsel %vm4895_vm6, %v4912_v43, %v4913_v42 }
 0x452   :  { %4932 = vst [vmem:[%s8063_s7 + $0x30] sm:$0xff] %v4914_v44 }
 0x453   :  { %v4743_v45 = vpop.f32.mrf.mxu2  ;;  %v4756_v46 = vpop.f32.mrf.mxu3 }
 0x456   :  { %v4974_v47 = vld [vmem:[#allocation1 + $0x1] ss:$4 sm:$0xff] }
 0x457   :  { %4990 = vst [vmem:[%s8063_s7 + $0x70] sm:$0xff] %v4974_v47 }
 0x466   :  { %v4819_v50 = vpop.f32.mrf.mxu0  ;;  %v4832_v51 = vpop.f32.mrf.mxu1 }
 0x467   :  { %v4820_v53 = vadd.f32 %v4819_v50, %v3106_v48  ;;  %v4833_v54 = vadd.f32 %v4832_v51, %v3107_v49 }
 0x469   :  { %4972 = vst.sshfl [vmem:[#allocation1 + $0x30] sm:$0xff pattern:$0x73625140] %v4820_v53  ;;  %v4890_v59 = vrot.slane %v4820_v53, 4  ;;  %v4891_v60 = vrot.slane %v4833_v54, 2 }
 0x46a   :  { %4973 = vst.sshfl [vmem:[#allocation1 + $0x38] sm:$0xff pattern:$0x73625140] %v4833_v54 }
 0x46b   :  { %v4793_v57 = vpop.f32.mrf.mxu2  ;;  %v4806_v58 = vpop.f32.mrf.mxu3  ;;  %v4916_v4 = vsel %vm4893_vm5, %v4890_v59, %v4891_v60 }
 0x46c   :  { %v4794_v62 = vadd.f32 %v4793_v57, %v3104_v55  ;;  %v4807_v63 = vadd.f32 %v4806_v58, %v3105_v56 }
 0x46e   :  { %4970 = vst.sshfl [vmem:[#allocation1 + $0x20] sm:$0xff pattern:$0x73625140] %v4794_v62  ;;  %v4889_v1 = vrot.slane %v4807_v63, 6  ;;  %v4821_v2 = vpop.f32.mrf.mxu0  ;;  %v4834_v3 = vpop.f32.mrf.mxu1 }
 0x46f   :  { %4971 = vst.sshfl [vmem:[#allocation1 + $0x28] sm:$0xff pattern:$0x73625140] %v4807_v63 }
 0x470   :  { %v4915_v5 = vsel %vm2648_vm0, %v4794_v62, %v4889_v1 }
 0x471   :  { %v4917_v6 = vsel %vm4895_vm6, %v4915_v5, %v4916_v4 }
 0x472   :  { %4933 = vst [vmem:[%s8063_s7 + $0x38] sm:$0xff] %v4917_v6 }
 0x473   :  { %v4795_v7 = vpop.f32.mrf.mxu2  ;;  %v4808_v9 = vpop.f32.mrf.mxu3 }
 0x476   :  { %v4975_v10 = vld [vmem:[#allocation1 + $0x21] ss:$4 sm:$0xff] }
 0x477   :  { %4991 = vst [vmem:[%s8063_s7 + $0x78] sm:$0xff] %v4975_v10 }
 0x478   :  { %4996 = vsyncpa [#allocation3], 1 }
 0x479   :  { %4997 = vsyncpa [#allocation5], 1 }

</bundles_post_ra>
